<compile_context>
chip_gen: v5e
topology: v5e:2x2
jax: 0.10.0
libtpu: 0.0.40
codegen_flags: <defaults>
</compile_context>

<pallas_src>
import jax
import jax.numpy as jnp
from jax.experimental import pallas as pl
from jax.experimental.pallas import tpu as pltpu

# --- constants -------------------------------------------------------------
_MIX1 = 0x85EBCA6B - (1 << 32)        # murmur3-style mix constants as int32
_MIX2 = 0xC2B2AE35 - (1 << 32)
_GOLD = 0x9E3779B9 - (1 << 32)

_DROP_P = 0.3
_KEEP_SCALE = 1.0 / (1.0 - _DROP_P)
_DROP_THRESH = int(_DROP_P * float(1 << 31))   # integer-domain threshold
_LEAKY_SLOPE = 0.2


def _mix32(x):
    """lowbias32-style integer mix (int32, logical right shifts via masking)."""
    x = x ^ ((x >> 16) & jnp.int32(0xFFFF))
    x = x * jnp.int32(_MIX1)
    x = x ^ ((x >> 13) & jnp.int32(0x7FFFF))
    x = x * jnp.int32(_MIX2)
    x = x ^ ((x >> 16) & jnp.int32(0xFFFF))
    return x


def _leaky_relu(v):
    return jnp.where(v >= 0, v, jnp.float32(_LEAKY_SLOPE) * v)


def _dropout(h, seed, layer_salt, row_offset):
    """Train-mode dropout(p=0.3).

    Stateless counter hash keyed on (global row, col, layer, seed): masks are
    independent across batch tiles and layers.  Keep-test stays in the integer
    domain (no float convert / scale ops).
    # TODO(synk): masks will not match torch's RNG bit-for-bit (different PRNG).
    """
    r, c = h.shape
    rows = jax.lax.broadcasted_iota(jnp.int32, (r, c), 0) + row_offset
    cols = jax.lax.broadcasted_iota(jnp.int32, (r, c), 1)
    key = rows * jnp.int32(c) + cols
    key = key ^ (seed * jnp.int32(_GOLD)) ^ jnp.int32(layer_salt)
    u31 = _mix32(key) & jnp.int32(0x7FFFFFFF)          # uniform in [0, 2^31)
    keep = u31 >= jnp.int32(_DROP_THRESH)
    return jnp.where(keep, h * jnp.float32(_KEEP_SCALE), jnp.float32(0.0))


# --- kernel ----------------------------------------------------------------
def _discriminator_kernel(seed_ref,                    # scalar prefetch (SMEM)
                          x_ref,
                          w1_ref, b1_ref,
                          w2_ref, b2_ref,
                          w3_ref, b3_ref,
                          w4_ref, b4_ref,
                          o_ref):
    seed = seed_ref[0]
    tb = x_ref.shape[0]
    row_off = pl.program_id(0) * tb                    # global row offset of this tile

    x = x_ref[...]                                     # (TB, 784) bf16

    # fc1 + leaky_relu + dropout   (bf16 matmul, f32 accumulate)
    h = jnp.dot(x, w1_ref[...], preferred_element_type=jnp.float32) + b1_ref[...]
    h = _dropout(_leaky_relu(h), seed, 0x243F6A88, row_off)

    # fc2 + leaky_relu + dropout
    h = jnp.dot(h.astype(jnp.bfloat16), w2_ref[...],
                preferred_element_type=jnp.float32) + b2_ref[...]
    h = _dropout(_leaky_relu(h), seed, 0x13198A2E, row_off)

    # fc3 + leaky_relu + dropout
    h = jnp.dot(h.astype(jnp.bfloat16), w3_ref[...],
                preferred_element_type=jnp.float32) + b3_ref[...]
    h = _dropout(_leaky_relu(h), seed, 0x03707344, row_off)

    # fc4 (K=256, N=1): VPU multiply + lane reduction (skips a wasteful N=1 matmul)
    z = jnp.sum(h * w4_ref[...], axis=-1, keepdims=True) + b4_ref[...]
    o_ref[...] = 1.0 / (1.0 + jnp.exp(-z))             # (TB, 1), tiny


# --- wrapper ---------------------------------------------------------------
def _round_up(n, m):
    return ((n + m - 1) // m) * m


@jax.jit
def discriminator_forward(x, params, seed):
    (w1, b1), (w2, b2), (w3, b3), (w4, b4) = params
    B = x.shape[0]

    # Batch tile: 256 rows to fill the v6e/v7x MXU (2x128 on v5e); small
    # batches padded up to one sublane-aligned tile.
    TB = 256 if B >= 256 else _round_up(max(B, 8), 8)
    B_pad = _round_up(B, TB)
    nb = B_pad // TB

    x_p = x.astype(jnp.bfloat16)
    if B_pad != B:
        x_p = jnp.pad(x_p, ((0, B_pad - B), (0, 0)))

    # bf16 weights for the MXU (halve weight DMA); biases stay f32.
    w1b = w1.astype(jnp.bfloat16)
    w2b = w2.astype(jnp.bfloat16)
    w3b = w3.astype(jnp.bfloat16)
    w4_row = w4.reshape(1, -1).astype(jnp.float32)     # (1, 256) for VPU reduce
    b4_r = b4.reshape(1, 1).astype(jnp.float32)

    const = lambda i, s: (0, 0)                        # weights resident across tiles
    grid_spec = pltpu.PrefetchScalarGridSpec(
        num_scalar_prefetch=1,                         # seed -> SMEM before grid
        grid=(nb,),
        in_specs=[
            pl.BlockSpec((TB, 784), lambda i, s: (i, 0)),
            pl.BlockSpec((784, 1024), const), pl.BlockSpec((1, 1024), const),
            pl.BlockSpec((1024, 512), const), pl.BlockSpec((1, 512), const),
            pl.BlockSpec((512, 256), const), pl.BlockSpec((1, 256), const),
            pl.BlockSpec((1, 256), const), pl.BlockSpec((1, 1), const),
        ],
        out_specs=pl.BlockSpec((TB, 1), lambda i, s: (i, 0)),
    )

    out = pl.pallas_call(
        _discriminator_kernel,
        out_shape=jax.ShapeDtypeStruct((B_pad, 1), jnp.float32),
        grid_spec=grid_spec,
        compiler_params=pltpu.CompilerParams(
            dimension_semantics=("parallel",),         # megacore shard on v7x
        ),
    )(seed, x_p, w1b, b1, w2b, b2, w3b, b3, w4_row, b4_r)

    return out[:B]


def init_params(key):
    """Deterministic init mimicking nn.Linear default (U[-1/sqrt(fan_in), +])."""
    dims = [784, 1024, 512, 256, 1]
    params = []
    for i in range(4):
        fan_in, fan_out = dims[i], dims[i + 1]
        key, kw, kb = jax.random.split(key, 3)
        bound = 1.0 / jnp.sqrt(jnp.float32(fan_in))
        w = jax.random.uniform(kw, (fan_in, fan_out), jnp.float32, -bound, bound)
        b = jax.random.uniform(kb, (1, fan_out), jnp.float32, -bound, bound)
        params.append((w, b))
    return params


if __name__ == "__main__":
    key = jax.random.PRNGKey(0)
    k_x, k_p = jax.random.split(key)

    B = 2
    x = jax.random.normal(k_x, (B, 784), jnp.float32)
    params = init_params(k_p)
    seed = jnp.array([0], dtype=jnp.int32)

    y = discriminator_forward(x, params, seed)
    y = jax.block_until_ready(y)

    assert y.shape == (B, 1), y.shape
    assert bool(jnp.all((y >= 0.0) & (y <= 1.0))), "sigmoid output out of range"
    print("KERNEL_OK")
</pallas_src>

<mosaic_0001>
module attributes {stable_mosaic.version = 11 : i64} {
  func.func @_discriminator_kernel(%arg0: i32, %arg1: memref<1xi32, #tpu.memory_space<smem>>, %arg2: memref<8x784xbf16, #tpu.memory_space<vmem>>, %arg3: memref<784x1024xbf16, #tpu.memory_space<vmem>>, %arg4: memref<1x1024xf32, #tpu.memory_space<vmem>>, %arg5: memref<1024x512xbf16, #tpu.memory_space<vmem>>, %arg6: memref<1x512xf32, #tpu.memory_space<vmem>>, %arg7: memref<512x256xbf16, #tpu.memory_space<vmem>>, %arg8: memref<1x256xf32, #tpu.memory_space<vmem>>, %arg9: memref<1x256xf32, #tpu.memory_space<vmem>>, %arg10: memref<1x1xf32, #tpu.memory_space<vmem>>, %arg11: memref<8x1xf32, #tpu.memory_space<vmem>>) attributes {dimension_semantics = [#tpu.dimension_semantics<parallel>], iteration_bounds = array<i64: 1>, scalar_prefetch = 1 : i64, scratch_operands = 0 : i64, tpu.core_type = #tpu.core_type<tc>, window_params = [{transform_indices = @transform_0, window_bounds = array<i64: 8, 784>}, {pipeline_mode = #tpu.pipeline_mode<synchronous>, transform_indices = @transform_1, window_bounds = array<i64: 784, 1024>}, {pipeline_mode = #tpu.pipeline_mode<synchronous>, transform_indices = @transform_2, window_bounds = array<i64: 1, 1024>}, {pipeline_mode = #tpu.pipeline_mode<synchronous>, transform_indices = @transform_3, window_bounds = array<i64: 1024, 512>}, {pipeline_mode = #tpu.pipeline_mode<synchronous>, transform_indices = @transform_4, window_bounds = array<i64: 1, 512>}, {pipeline_mode = #tpu.pipeline_mode<synchronous>, transform_indices = @transform_5, window_bounds = array<i64: 512, 256>}, {pipeline_mode = #tpu.pipeline_mode<synchronous>, transform_indices = @transform_6, window_bounds = array<i64: 1, 256>}, {pipeline_mode = #tpu.pipeline_mode<synchronous>, transform_indices = @transform_7, window_bounds = array<i64: 1, 256>}, {pipeline_mode = #tpu.pipeline_mode<synchronous>, transform_indices = @transform_8, window_bounds = array<i64: 1, 1>}, {transform_indices = @transform_9, window_bounds = array<i64: 8, 1>}]} {
    %c0 = arith.constant 0 : index
    %0 = memref.load %arg1[%c0] : memref<1xi32, #tpu.memory_space<smem>>
    %c8_i32 = arith.constant 8 : i32
    %1 = arith.muli %arg0, %c8_i32 : i32
    %c0_0 = arith.constant 0 : index
    %c0_1 = arith.constant 0 : index
    %2 = vector.load %arg2[%c0_0, %c0_1] : memref<8x784xbf16, #tpu.memory_space<vmem>>, vector<8x784xbf16>
    %c0_2 = arith.constant 0 : index
    %c0_3 = arith.constant 0 : index
    %3 = vector.load %arg3[%c0_2, %c0_3] : memref<784x1024xbf16, #tpu.memory_space<vmem>>, vector<784x1024xbf16>
    %cst = arith.constant dense<0.000000e+00> : vector<8x1024xf32>
    %4 = tpu.matmul %2, %3, %cst {dimension_numbers = #tpu.dot_dimension_numbers<[1], [0], [0], [1], [0, 0, 1, 1], [], []>} : vector<8x784xbf16>, vector<784x1024xbf16>, vector<8x1024xf32> -> vector<8x1024xf32>
    %c0_4 = arith.constant 0 : index
    %c0_5 = arith.constant 0 : index
    %5 = vector.load %arg4[%c0_4, %c0_5] : memref<1x1024xf32, #tpu.memory_space<vmem>>, vector<1x1024xf32>
    %6 = vector.broadcast %5 : vector<1x1024xf32> to vector<8x1024xf32>
    %7 = arith.addf %4, %6 : vector<8x1024xf32>
    %cst_6 = arith.constant 0.000000e+00 : f32
    %8 = vector.broadcast %cst_6 : f32 to vector<8x1024xf32>
    %9 = arith.cmpf oge, %7, %8 : vector<8x1024xf32>
    %cst_7 = arith.constant 2.000000e-01 : f32
    %10 = vector.broadcast %cst_7 : f32 to vector<8x1024xf32>
    %11 = arith.mulf %10, %7 : vector<8x1024xf32>
    %12 = arith.select %9, %7, %11 : vector<8x1024xi1>, vector<8x1024xf32>
    %13 = tpu.iota {dimensions = array<i32: 0>} : vector<8x1024xi32>
    %14 = vector.broadcast %1 : i32 to vector<8x1024xi32>
    %15 = arith.addi %13, %14 : vector<8x1024xi32>
    %16 = tpu.iota {dimensions = array<i32: 1>} : vector<8x1024xi32>
    %c1024_i32 = arith.constant 1024 : i32
    %17 = vector.broadcast %c1024_i32 : i32 to vector<8x1024xi32>
    %18 = arith.muli %15, %17 : vector<8x1024xi32>
    %19 = arith.addi %18, %16 : vector<8x1024xi32>
    %c-1640531527_i32 = arith.constant -1640531527 : i32
    %20 = arith.muli %0, %c-1640531527_i32 : i32
    %21 = vector.broadcast %20 : i32 to vector<8x1024xi32>
    %22 = arith.xori %19, %21 : vector<8x1024xi32>
    %c608135816_i32 = arith.constant 608135816 : i32
    %23 = vector.broadcast %c608135816_i32 : i32 to vector<8x1024xi32>
    %24 = arith.xori %22, %23 : vector<8x1024xi32>
    %c16_i32 = arith.constant 16 : i32
    %25 = vector.broadcast %c16_i32 : i32 to vector<8x1024xi32>
    %26 = arith.shrsi %24, %25 : vector<8x1024xi32>
    %c65535_i32 = arith.constant 65535 : i32
    %27 = vector.broadcast %c65535_i32 : i32 to vector<8x1024xi32>
    %28 = arith.andi %26, %27 : vector<8x1024xi32>
    %29 = arith.xori %24, %28 : vector<8x1024xi32>
    %c-2048144789_i32 = arith.constant -2048144789 : i32
    %30 = vector.broadcast %c-2048144789_i32 : i32 to vector<8x1024xi32>
    %31 = arith.muli %29, %30 : vector<8x1024xi32>
    %c13_i32 = arith.constant 13 : i32
    %32 = vector.broadcast %c13_i32 : i32 to vector<8x1024xi32>
    %33 = arith.shrsi %31, %32 : vector<8x1024xi32>
    %c524287_i32 = arith.constant 524287 : i32
    %34 = vector.broadcast %c524287_i32 : i32 to vector<8x1024xi32>
    %35 = arith.andi %33, %34 : vector<8x1024xi32>
    %36 = arith.xori %31, %35 : vector<8x1024xi32>
    %c-1028477387_i32 = arith.constant -1028477387 : i32
    %37 = vector.broadcast %c-1028477387_i32 : i32 to vector<8x1024xi32>
    %38 = arith.muli %36, %37 : vector<8x1024xi32>
    %c16_i32_8 = arith.constant 16 : i32
    %39 = vector.broadcast %c16_i32_8 : i32 to vector<8x1024xi32>
    %40 = arith.shrsi %38, %39 : vector<8x1024xi32>
    %c65535_i32_9 = arith.constant 65535 : i32
    %41 = vector.broadcast %c65535_i32_9 : i32 to vector<8x1024xi32>
    %42 = arith.andi %40, %41 : vector<8x1024xi32>
    %43 = arith.xori %38, %42 : vector<8x1024xi32>
    %c2147483647_i32 = arith.constant 2147483647 : i32
    %44 = vector.broadcast %c2147483647_i32 : i32 to vector<8x1024xi32>
    %45 = arith.andi %43, %44 : vector<8x1024xi32>
    %c644245094_i32 = arith.constant 644245094 : i32
    %46 = vector.broadcast %c644245094_i32 : i32 to vector<8x1024xi32>
    %47 = arith.cmpi sge, %45, %46 : vector<8x1024xi32>
    %cst_10 = arith.constant 1.42857146 : f32
    %48 = vector.broadcast %cst_10 : f32 to vector<8x1024xf32>
    %49 = arith.mulf %12, %48 : vector<8x1024xf32>
    %cst_11 = arith.constant 0.000000e+00 : f32
    %50 = vector.broadcast %cst_11 : f32 to vector<8x1024xf32>
    %51 = arith.select %47, %49, %50 : vector<8x1024xi1>, vector<8x1024xf32>
    %52 = arith.truncf %51 : vector<8x1024xf32> to vector<8x1024xbf16>
    %c0_12 = arith.constant 0 : index
    %c0_13 = arith.constant 0 : index
    %53 = vector.load %arg5[%c0_12, %c0_13] : memref<1024x512xbf16, #tpu.memory_space<vmem>>, vector<1024x512xbf16>
    %cst_14 = arith.constant dense<0.000000e+00> : vector<8x512xf32>
    %54 = tpu.matmul %52, %53, %cst_14 {dimension_numbers = #tpu.dot_dimension_numbers<[1], [0], [0], [1], [0, 0, 1, 1], [], []>} : vector<8x1024xbf16>, vector<1024x512xbf16>, vector<8x512xf32> -> vector<8x512xf32>
    %c0_15 = arith.constant 0 : index
    %c0_16 = arith.constant 0 : index
    %55 = vector.load %arg6[%c0_15, %c0_16] : memref<1x512xf32, #tpu.memory_space<vmem>>, vector<1x512xf32>
    %56 = vector.broadcast %55 : vector<1x512xf32> to vector<8x512xf32>
    %57 = arith.addf %54, %56 : vector<8x512xf32>
    %cst_17 = arith.constant 0.000000e+00 : f32
    %58 = vector.broadcast %cst_17 : f32 to vector<8x512xf32>
    %59 = arith.cmpf oge, %57, %58 : vector<8x512xf32>
    %cst_18 = arith.constant 2.000000e-01 : f32
    %60 = vector.broadcast %cst_18 : f32 to vector<8x512xf32>
    %61 = arith.mulf %60, %57 : vector<8x512xf32>
    %62 = arith.select %59, %57, %61 : vector<8x512xi1>, vector<8x512xf32>
    %63 = tpu.iota {dimensions = array<i32: 0>} : vector<8x512xi32>
    %64 = vector.broadcast %1 : i32 to vector<8x512xi32>
    %65 = arith.addi %63, %64 : vector<8x512xi32>
    %66 = tpu.iota {dimensions = array<i32: 1>} : vector<8x512xi32>
    %c512_i32 = arith.constant 512 : i32
    %67 = vector.broadcast %c512_i32 : i32 to vector<8x512xi32>
    %68 = arith.muli %65, %67 : vector<8x512xi32>
    %69 = arith.addi %68, %66 : vector<8x512xi32>
    %c-1640531527_i32_19 = arith.constant -1640531527 : i32
    %70 = arith.muli %0, %c-1640531527_i32_19 : i32
    %71 = vector.broadcast %70 : i32 to vector<8x512xi32>
    %72 = arith.xori %69, %71 : vector<8x512xi32>
    %c320440878_i32 = arith.constant 320440878 : i32
    %73 = vector.broadcast %c320440878_i32 : i32 to vector<8x512xi32>
    %74 = arith.xori %72, %73 : vector<8x512xi32>
    %c16_i32_20 = arith.constant 16 : i32
    %75 = vector.broadcast %c16_i32_20 : i32 to vector<8x512xi32>
    %76 = arith.shrsi %74, %75 : vector<8x512xi32>
    %c65535_i32_21 = arith.constant 65535 : i32
    %77 = vector.broadcast %c65535_i32_21 : i32 to vector<8x512xi32>
    %78 = arith.andi %76, %77 : vector<8x512xi32>
    %79 = arith.xori %74, %78 : vector<8x512xi32>
    %c-2048144789_i32_22 = arith.constant -2048144789 : i32
    %80 = vector.broadcast %c-2048144789_i32_22 : i32 to vector<8x512xi32>
    %81 = arith.muli %79, %80 : vector<8x512xi32>
    %c13_i32_23 = arith.constant 13 : i32
    %82 = vector.broadcast %c13_i32_23 : i32 to vector<8x512xi32>
    %83 = arith.shrsi %81, %82 : vector<8x512xi32>
    %c524287_i32_24 = arith.constant 524287 : i32
    %84 = vector.broadcast %c524287_i32_24 : i32 to vector<8x512xi32>
    %85 = arith.andi %83, %84 : vector<8x512xi32>
    %86 = arith.xori %81, %85 : vector<8x512xi32>
    %c-1028477387_i32_25 = arith.constant -1028477387 : i32
    %87 = vector.broadcast %c-1028477387_i32_25 : i32 to vector<8x512xi32>
    %88 = arith.muli %86, %87 : vector<8x512xi32>
    %c16_i32_26 = arith.constant 16 : i32
    %89 = vector.broadcast %c16_i32_26 : i32 to vector<8x512xi32>
    %90 = arith.shrsi %88, %89 : vector<8x512xi32>
    %c65535_i32_27 = arith.constant 65535 : i32
    %91 = vector.broadcast %c65535_i32_27 : i32 to vector<8x512xi32>
    %92 = arith.andi %90, %91 : vector<8x512xi32>
    %93 = arith.xori %88, %92 : vector<8x512xi32>
    %c2147483647_i32_28 = arith.constant 2147483647 : i32
    %94 = vector.broadcast %c2147483647_i32_28 : i32 to vector<8x512xi32>
    %95 = arith.andi %93, %94 : vector<8x512xi32>
    %c644245094_i32_29 = arith.constant 644245094 : i32
    %96 = vector.broadcast %c644245094_i32_29 : i32 to vector<8x512xi32>
    %97 = arith.cmpi sge, %95, %96 : vector<8x512xi32>
    %cst_30 = arith.constant 1.42857146 : f32
    %98 = vector.broadcast %cst_30 : f32 to vector<8x512xf32>
    %99 = arith.mulf %62, %98 : vector<8x512xf32>
    %cst_31 = arith.constant 0.000000e+00 : f32
    %100 = vector.broadcast %cst_31 : f32 to vector<8x512xf32>
    %101 = arith.select %97, %99, %100 : vector<8x512xi1>, vector<8x512xf32>
    %102 = arith.truncf %101 : vector<8x512xf32> to vector<8x512xbf16>
    %c0_32 = arith.constant 0 : index
    %c0_33 = arith.constant 0 : index
    %103 = vector.load %arg7[%c0_32, %c0_33] : memref<512x256xbf16, #tpu.memory_space<vmem>>, vector<512x256xbf16>
    %cst_34 = arith.constant dense<0.000000e+00> : vector<8x256xf32>
    %104 = tpu.matmul %102, %103, %cst_34 {dimension_numbers = #tpu.dot_dimension_numbers<[1], [0], [0], [1], [0, 0, 1, 1], [], []>} : vector<8x512xbf16>, vector<512x256xbf16>, vector<8x256xf32> -> vector<8x256xf32>
    %c0_35 = arith.constant 0 : index
    %c0_36 = arith.constant 0 : index
    %105 = vector.load %arg8[%c0_35, %c0_36] : memref<1x256xf32, #tpu.memory_space<vmem>>, vector<1x256xf32>
    %106 = vector.broadcast %105 : vector<1x256xf32> to vector<8x256xf32>
    %107 = arith.addf %104, %106 : vector<8x256xf32>
    %cst_37 = arith.constant 0.000000e+00 : f32
    %108 = vector.broadcast %cst_37 : f32 to vector<8x256xf32>
    %109 = arith.cmpf oge, %107, %108 : vector<8x256xf32>
    %cst_38 = arith.constant 2.000000e-01 : f32
    %110 = vector.broadcast %cst_38 : f32 to vector<8x256xf32>
    %111 = arith.mulf %110, %107 : vector<8x256xf32>
    %112 = arith.select %109, %107, %111 : vector<8x256xi1>, vector<8x256xf32>
    %113 = tpu.iota {dimensions = array<i32: 0>} : vector<8x256xi32>
    %114 = vector.broadcast %1 : i32 to vector<8x256xi32>
    %115 = arith.addi %113, %114 : vector<8x256xi32>
    %116 = tpu.iota {dimensions = array<i32: 1>} : vector<8x256xi32>
    %c256_i32 = arith.constant 256 : i32
    %117 = vector.broadcast %c256_i32 : i32 to vector<8x256xi32>
    %118 = arith.muli %115, %117 : vector<8x256xi32>
    %119 = arith.addi %118, %116 : vector<8x256xi32>
    %c-1640531527_i32_39 = arith.constant -1640531527 : i32
    %120 = arith.muli %0, %c-1640531527_i32_39 : i32
    %121 = vector.broadcast %120 : i32 to vector<8x256xi32>
    %122 = arith.xori %119, %121 : vector<8x256xi32>
    %c57701188_i32 = arith.constant 57701188 : i32
    %123 = vector.broadcast %c57701188_i32 : i32 to vector<8x256xi32>
    %124 = arith.xori %122, %123 : vector<8x256xi32>
    %c16_i32_40 = arith.constant 16 : i32
    %125 = vector.broadcast %c16_i32_40 : i32 to vector<8x256xi32>
    %126 = arith.shrsi %124, %125 : vector<8x256xi32>
    %c65535_i32_41 = arith.constant 65535 : i32
    %127 = vector.broadcast %c65535_i32_41 : i32 to vector<8x256xi32>
    %128 = arith.andi %126, %127 : vector<8x256xi32>
    %129 = arith.xori %124, %128 : vector<8x256xi32>
    %c-2048144789_i32_42 = arith.constant -2048144789 : i32
    %130 = vector.broadcast %c-2048144789_i32_42 : i32 to vector<8x256xi32>
    %131 = arith.muli %129, %130 : vector<8x256xi32>
    %c13_i32_43 = arith.constant 13 : i32
    %132 = vector.broadcast %c13_i32_43 : i32 to vector<8x256xi32>
    %133 = arith.shrsi %131, %132 : vector<8x256xi32>
    %c524287_i32_44 = arith.constant 524287 : i32
    %134 = vector.broadcast %c524287_i32_44 : i32 to vector<8x256xi32>
    %135 = arith.andi %133, %134 : vector<8x256xi32>
    %136 = arith.xori %131, %135 : vector<8x256xi32>
    %c-1028477387_i32_45 = arith.constant -1028477387 : i32
    %137 = vector.broadcast %c-1028477387_i32_45 : i32 to vector<8x256xi32>
    %138 = arith.muli %136, %137 : vector<8x256xi32>
    %c16_i32_46 = arith.constant 16 : i32
    %139 = vector.broadcast %c16_i32_46 : i32 to vector<8x256xi32>
    %140 = arith.shrsi %138, %139 : vector<8x256xi32>
    %c65535_i32_47 = arith.constant 65535 : i32
    %141 = vector.broadcast %c65535_i32_47 : i32 to vector<8x256xi32>
    %142 = arith.andi %140, %141 : vector<8x256xi32>
    %143 = arith.xori %138, %142 : vector<8x256xi32>
    %c2147483647_i32_48 = arith.constant 2147483647 : i32
    %144 = vector.broadcast %c2147483647_i32_48 : i32 to vector<8x256xi32>
    %145 = arith.andi %143, %144 : vector<8x256xi32>
    %c644245094_i32_49 = arith.constant 644245094 : i32
    %146 = vector.broadcast %c644245094_i32_49 : i32 to vector<8x256xi32>
    %147 = arith.cmpi sge, %145, %146 : vector<8x256xi32>
    %cst_50 = arith.constant 1.42857146 : f32
    %148 = vector.broadcast %cst_50 : f32 to vector<8x256xf32>
    %149 = arith.mulf %112, %148 : vector<8x256xf32>
    %cst_51 = arith.constant 0.000000e+00 : f32
    %150 = vector.broadcast %cst_51 : f32 to vector<8x256xf32>
    %151 = arith.select %147, %149, %150 : vector<8x256xi1>, vector<8x256xf32>
    %c0_52 = arith.constant 0 : index
    %c0_53 = arith.constant 0 : index
    %152 = vector.load %arg9[%c0_52, %c0_53] : memref<1x256xf32, #tpu.memory_space<vmem>>, vector<1x256xf32>
    %153 = vector.broadcast %152 : vector<1x256xf32> to vector<8x256xf32>
    %154 = arith.mulf %151, %153 : vector<8x256xf32>
    %cst_54 = arith.constant dense<0.000000e+00> : vector<8xf32>
    %155 = vector.multi_reduction <add>, %154, %cst_54 [1] : vector<8x256xf32> to vector<8xf32>
    %156 = vector.shape_cast %155 : vector<8xf32> to vector<8x1xf32>
    %c0_55 = arith.constant 0 : index
    %c0_56 = arith.constant 0 : index
    %157 = vector.load %arg10[%c0_55, %c0_56] : memref<1x1xf32, #tpu.memory_space<vmem>>, vector<1x1xf32>
    %158 = vector.broadcast %157 : vector<1x1xf32> to vector<8x1xf32>
    %159 = arith.addf %156, %158 : vector<8x1xf32>
    %cst_57 = arith.constant 0.000000e+00 : f32
    %160 = vector.broadcast %cst_57 : f32 to vector<8x1xf32>
    %161 = arith.subf %160, %159 : vector<8x1xf32>
    %162 = math.exp %161 : vector<8x1xf32>
    %cst_58 = arith.constant 1.000000e+00 : f32
    %163 = vector.broadcast %cst_58 : f32 to vector<8x1xf32>
    %164 = arith.addf %163, %162 : vector<8x1xf32>
    %cst_59 = arith.constant 1.000000e+00 : f32
    %165 = vector.broadcast %cst_59 : f32 to vector<8x1xf32>
    %166 = arith.divf %165, %164 : vector<8x1xf32>
    %c0_60 = arith.constant 0 : index
    %c0_61 = arith.constant 0 : index
    %167 = vector.load %arg11[%c0_60, %c0_61] : memref<8x1xf32, #tpu.memory_space<vmem>>, vector<8x1xf32>
    tpu.vector_store %arg11[%c0_60, %c0_61], %166 {strides = array<i32>} : memref<8x1xf32, #tpu.memory_space<vmem>>, vector<8x1xf32>,
    return
  }
  func.func @transform_0(%arg0: i32, %arg1: memref<1xi32, #tpu.memory_space<smem>>) -> (i32, i32) {
    %c0_i32 = arith.constant 0 : i32
    %c0_i32_0 = arith.constant 0 : i32
    return %arg0, %c0_i32 : i32, i32
  }
  func.func @transform_1(%arg0: i32, %arg1: memref<1xi32, #tpu.memory_space<smem>>) -> (i32, i32) {
    %c0_i32 = arith.constant 0 : i32
    %c0_i32_0 = arith.constant 0 : i32
    %c0_i32_1 = arith.constant 0 : i32
    return %c0_i32, %c0_i32_0 : i32, i32
  }
  func.func @transform_2(%arg0: i32, %arg1: memref<1xi32, #tpu.memory_space<smem>>) -> (i32, i32) {
    %c0_i32 = arith.constant 0 : i32
    %c0_i32_0 = arith.constant 0 : i32
    %c0_i32_1 = arith.constant 0 : i32
    return %c0_i32, %c0_i32_0 : i32, i32
  }
  func.func @transform_3(%arg0: i32, %arg1: memref<1xi32, #tpu.memory_space<smem>>) -> (i32, i32) {
    %c0_i32 = arith.constant 0 : i32
    %c0_i32_0 = arith.constant 0 : i32
    %c0_i32_1 = arith.constant 0 : i32
    return %c0_i32, %c0_i32_0 : i32, i32
  }
  func.func @transform_4(%arg0: i32, %arg1: memref<1xi32, #tpu.memory_space<smem>>) -> (i32, i32) {
    %c0_i32 = arith.constant 0 : i32
    %c0_i32_0 = arith.constant 0 : i32
    %c0_i32_1 = arith.constant 0 : i32
    return %c0_i32, %c0_i32_0 : i32, i32
  }
  func.func @transform_5(%arg0: i32, %arg1: memref<1xi32, #tpu.memory_space<smem>>) -> (i32, i32) {
    %c0_i32 = arith.constant 0 : i32
    %c0_i32_0 = arith.constant 0 : i32
    %c0_i32_1 = arith.constant 0 : i32
    return %c0_i32, %c0_i32_0 : i32, i32
  }
  func.func @transform_6(%arg0: i32, %arg1: memref<1xi32, #tpu.memory_space<smem>>) -> (i32, i32) {
    %c0_i32 = arith.constant 0 : i32
    %c0_i32_0 = arith.constant 0 : i32
    %c0_i32_1 = arith.constant 0 : i32
    return %c0_i32, %c0_i32_0 : i32, i32
  }
  func.func @transform_7(%arg0: i32, %arg1: memref<1xi32, #tpu.memory_space<smem>>) -> (i32, i32) {
    %c0_i32 = arith.constant 0 : i32
    %c0_i32_0 = arith.constant 0 : i32
    %c0_i32_1 = arith.constant 0 : i32
    return %c0_i32, %c0_i32_0 : i32, i32
  }
  func.func @transform_8(%arg0: i32, %arg1: memref<1xi32, #tpu.memory_space<smem>>) -> (i32, i32) {
    %c0_i32 = arith.constant 0 : i32
    %c0_i32_0 = arith.constant 0 : i32
    %c0_i32_1 = arith.constant 0 : i32
    return %c0_i32, %c0_i32_0 : i32, i32
  }
  func.func @transform_9(%arg0: i32, %arg1: memref<1xi32, #tpu.memory_space<smem>>) -> (i32, i32) {
    %c0_i32 = arith.constant 0 : i32
    %c0_i32_0 = arith.constant 0 : i32
    return %arg0, %c0_i32 : i32, i32
  }
}

</mosaic_0001>

<bundles_post_ra>
// kernel: discriminator_forward.1
= control target key start
LH: loop header
LB: loop body
LE: loop exit
PB: predicated region body
PF: predicated region fallthrough
CT: control target
= control target key end

     0   :  { %vm2437_vm0 = vcmask 130048   ;;  %s14668_s2 = inlined_call_operand.vmem [shape: bf16[784,1024], index: 2, kind: input, shape index: {}]   ;;  %s14669_s1 = inlined_call_operand.vmem [shape: bf16[8,784], index: 1, kind: input, shape index: {}]   ;;  %s14670_s3 = inlined_call_operand.vmem [shape: f32[1,1024], index: 3, kind: input, shape index: {}]   ;;  %s14671_s0 = inlined_call_operand.<no memory space> [shape: s32[1], index: 0, kind: input, shape index: {}]   ;;  %s14672_s4 = inlined_call_operand.vmem [shape: bf16[1024,512], index: 4, kind: input, shape index: {}]   ;;  %s14673_s5 = inlined_call_operand.vmem [shape: f32[1,512], index: 5, kind: input, shape index: {}]   ;;  %s14674_s6 = inlined_call_operand.vmem [shape: bf16[512,256], index: 6, kind: input, shape index: {}]   ;;  %s14675_s7 = inlined_call_operand.vmem [shape: f32[1,256], index: 7, kind: input, shape index: {}]   ;;  %s14676_s9 = inlined_call_operand.<no memory space> [shape: f32[1,1], index: 9, kind: input, shape index: {}]   ;;  %s14677_s8 = inlined_call_operand.vmem [shape: f32[1,256], index: 8, kind: input, shape index: {}]   ;;  %s14678_s10 = inlined_call_operand.vmem [shape: f32[8,1], index: 10, kind: output, shape index: {}]  }
   0x1   :  { %v6216_v0 = vld [vmem:[%s14668_s2 + $0x1c0] sm:$0xf]  ;;  %s3215_s20 = smul.u32 2654435769, %s14671_s0 }
   0x2   :  { %v9068_v1 = vld [vmem:[%s14668_s2 + $0x1dc] sm:$0xf0] }
   0x3   :  { %v6472_v2 = vld [vmem:[%s14668_s2 + $0x3c0] sm:$0xf]  ;;  %v6217_v3 = vor.u32 %v9068_v1, %v6216_v0 }
   0x4   :  { %v9132_v4 = vld [vmem:[%s14668_s2 + $0x3dc] sm:$0xf0] }
   0x5   :  { %v6728_v5 = vld [vmem:[%s14668_s2 + $0x5c0] sm:$0xf]  ;;  %v6473_v7 = vor.u32 %v9132_v4, %v6472_v2  ;;  %2441 = vmatpush.bf16.msra.mxu0 %v6217_v3 }
   0x6   :  { %v9196_v6 = vld [vmem:[%s14668_s2 + $0x5dc] sm:$0xf0] }
   0x7   :  { %v6729_v8 = vor.u32 %v9196_v6, %v6728_v5  ;;  %v6984_v9 = vld [vmem:[%s14668_s2 + $0x7c0] sm:$0xf]  ;;  %2454 = vmatpush.bf16.msra.mxu1 %v6473_v7 }
   0x8   :  { %v9260_v10 = vld [vmem:[%s14668_s2 + $0x7dc] sm:$0xf0] }
   0x9   :  { %v6184_v11 = vld [vmem:[%s14668_s2 + $0x180] sm:$0xf]  ;;  %v6985_v12 = vor.u32 %v9260_v10, %v6984_v9  ;;  %2467 = vmatpush.bf16.msra.mxu2 %v6729_v8 }
   0xa   :  { %v9060_v13 = vld [vmem:[%s14668_s2 + $0x19c] sm:$0xf0] }
   0xb   :  { %v6440_v14 = vld [vmem:[%s14668_s2 + $0x380] sm:$0xf]  ;;  %v6185_v16 = vor.u32 %v9060_v13, %v6184_v11  ;;  %2480 = vmatpush.bf16.msra.mxu3 %v6985_v12 }
   0xc   :  { %v9124_v15 = vld [vmem:[%s14668_s2 + $0x39c] sm:$0xf0] }
   0xd   :  { %v6441_v17 = vor.u32 %v9124_v15, %v6440_v14  ;;  %v6696_v18 = vld [vmem:[%s14668_s2 + $0x580] sm:$0xf]  ;;  %2442 = vmatpush.bf16.msra.mxu0 %v6185_v16 }
   0xe   :  { %v9188_v19 = vld [vmem:[%s14668_s2 + $0x59c] sm:$0xf0] }
   0xf   :  { %v6952_v20 = vld [vmem:[%s14668_s2 + $0x780] sm:$0xf]  ;;  %v6697_v21 = vor.u32 %v9188_v19, %v6696_v18  ;;  %2455 = vmatpush.bf16.msra.mxu1 %v6441_v17 }
  0x10   :  { %v9252_v22 = vld [vmem:[%s14668_s2 + $0x79c] sm:$0xf0] }
  0x11   :  { %v6152_v23 = vld [vmem:[%s14668_s2 + $0x140] sm:$0xf]  ;;  %v6953_v25 = vor.u32 %v9252_v22, %v6952_v20  ;;  %2468 = vmatpush.bf16.msra.mxu2 %v6697_v21 }
  0x12   :  { %v9052_v24 = vld [vmem:[%s14668_s2 + $0x15c] sm:$0xf0] }
  0x13   :  { %v6408_v26 = vld [vmem:[%s14668_s2 + $0x340] sm:$0xf]  ;;  %v6153_v29 = vor.u32 %v9052_v24, %v6152_v23  ;;  %2481 = vmatpush.bf16.msra.mxu3 %v6953_v25  ;;  %v40_v25 = vld [vmem:[%s14669_s1 + $0x8] sm:$0xff] }
  0x14   :  { %v9116_v27 = vld [vmem:[%s14668_s2 + $0x35c] sm:$0xf0] }
  0x15   :  { %v6664_v28 = vld [vmem:[%s14668_s2 + $0x540] sm:$0xf]  ;;  %v6409_v33 = vor.u32 %v9116_v27, %v6408_v26  ;;  %2443 = vmatpush.bf16.msra.mxu0 %v6153_v29 }
  0x16   :  { %v9180_v30 = vld [vmem:[%s14668_s2 + $0x55c] sm:$0xf0] }
  0x17   :  { %v6920_v31 = vld [vmem:[%s14668_s2 + $0x740] sm:$0xf]  ;;  %v6665_v34 = vor.u32 %v9180_v30, %v6664_v28  ;;  %2456 = vmatpush.bf16.msra.mxu1 %v6409_v33 }
  0x18   :  { %v9244_v32 = vld [vmem:[%s14668_s2 + $0x75c] sm:$0xf0] }
  0x19   :  { %v6120_v35 = vld [vmem:[%s14668_s2 + $0x100] sm:$0xf]  ;;  %v6921_v38 = vor.u32 %v9244_v32, %v6920_v31  ;;  %2469 = vmatpush.bf16.msra.mxu2 %v6665_v34  ;;  %v9064_v34 = vld [vmem:[%s14668_s2 + $0x1c4] sm:$0xf] }
  0x1a   :  { %v9044_v36 = vld [vmem:[%s14668_s2 + $0x11c] sm:$0xf0] }
  0x1b   :  { %v6376_v37 = vld [vmem:[%s14668_s2 + $0x300] sm:$0xf]  ;;  %v6121_v44 = vor.u32 %v9044_v36, %v6120_v35  ;;  %2482 = vmatpush.bf16.msra.mxu3 %v6921_v38  ;;  %v6218_v35 = vld [vmem:[%s14668_s2 + $0x1e0] sm:$0xf0]  ;;  %v459_v36 = vunpack.c.l.b16 %v40_v25 }
  0x1c   :  { %v9108_v39 = vld [vmem:[%s14668_s2 + $0x31c] sm:$0xf0] }
  0x1d   :  { %v6632_v40 = vld [vmem:[%s14668_s2 + $0x500] sm:$0xf]  ;;  %v6377_v45 = vor.u32 %v9108_v39, %v6376_v37  ;;  %2444 = vmatpush.bf16.msra.mxu0 %v6121_v44 }
  0x1e   :  { %v9172_v41 = vld [vmem:[%s14668_s2 + $0x51c] sm:$0xf0] }
  0x1f   :  { %v6888_v42 = vld [vmem:[%s14668_s2 + $0x700] sm:$0xf]  ;;  %v6633_v46 = vor.u32 %v9172_v41, %v6632_v40  ;;  %2457 = vmatpush.bf16.msra.mxu1 %v6377_v45 }
  0x20   :  { %v9236_v43 = vld [vmem:[%s14668_s2 + $0x71c] sm:$0xf0] }
  0x21   :  { %v6088_v47 = vld [vmem:[%s14668_s2 + $0xc0] sm:$0xf]  ;;  %v6889_v50 = vor.u32 %v9236_v43, %v6888_v42  ;;  %2470 = vmatpush.bf16.msra.mxu2 %v6633_v46  ;;  %v460_v42 = vunpack.c.h.b16 %v40_v25  ;;  %v9128_v46 = vld [vmem:[%s14668_s2 + $0x3c4] sm:$0xf] }
  0x22   :  { %v9036_v48 = vld [vmem:[%s14668_s2 + $0xdc] sm:$0xf0]  ;;  %v9104_v25 = vld [vmem:[%s14668_s2 + $0x304] sm:$0xf] }
  0x23   :  { %v6344_v49 = vld [vmem:[%s14668_s2 + $0x2c0] sm:$0xf]  ;;  %v6089_v56 = vor.u32 %v9036_v48, %v6088_v47  ;;  %2483 = vmatpush.bf16.msra.mxu3 %v6889_v50  ;;  %v6474_v47 = vld [vmem:[%s14668_s2 + $0x3e0] sm:$0xf0] }
  0x24   :  { %v9100_v51 = vld [vmem:[%s14668_s2 + $0x2dc] sm:$0xf0] }
  0x25   :  { %v6600_v52 = vld [vmem:[%s14668_s2 + $0x4c0] sm:$0xf]  ;;  %v6345_v57 = vor.u32 %v9100_v51, %v6344_v49  ;;  %2445 = vmatpush.bf16.msra.mxu0 %v6089_v56  ;;  %v6221_v49 = vor.u32 %v9064_v34, %v6218_v35  ;;  %v6186_v56 = vld [vmem:[%s14668_s2 + $0x1a0] sm:$0xf0] }
  0x26   :  { %v9164_v53 = vld [vmem:[%s14668_s2 + $0x4dc] sm:$0xf0]  ;;  %v6090_v34 = vld [vmem:[%s14668_s2 + $0xe0] sm:$0xf0] }
  0x27   :  { %v6856_v54 = vld [vmem:[%s14668_s2 + $0x6c0] sm:$0xf]  ;;  %v6601_v58 = vor.u32 %v9164_v53, %v6600_v52  ;;  %2458 = vmatpush.bf16.msra.mxu1 %v6345_v57  ;;  %v10020_v53 = vpack.c.b16 %v459_v36, %v459_v36 }
  0x28   :  { %v9228_v55 = vld [vmem:[%s14668_s2 + $0x6dc] sm:$0xf0] }
  0x29   :  { %v6056_v59 = vld [vmem:[%s14668_s2 + $0x80] sm:$0xf]  ;;  %v6857_v62 = vor.u32 %v9228_v55, %v6856_v54  ;;  %2471 = vmatpush.bf16.msra.mxu2 %v6601_v58  ;;  %v9056_v55 = vld [vmem:[%s14668_s2 + $0x184] sm:$0xf] }
  0x2a   :  { %v9028_v60 = vld [vmem:[%s14668_s2 + $0x9c] sm:$0xf0] }
  0x2b   :  { %v6312_v61 = vld [vmem:[%s14668_s2 + $0x280] sm:$0xf]  ;;  %v6057_v4 = vor.u32 %v9028_v60, %v6056_v59  ;;  %2484 = vmatpush.bf16.msra.mxu3 %v6857_v62  ;;  %v10033_v60 = vpack.c.b16 %v460_v42, %v460_v42 }
  0x2c   :  { %v9092_v63 = vld [vmem:[%s14668_s2 + $0x29c] sm:$0xf0] }
  0x2d   :  { %v6568_v0 = vld [vmem:[%s14668_s2 + $0x480] sm:$0xf]  ;;  %v6313_v5 = vor.u32 %v9092_v63, %v6312_v61  ;;  %2446 = vmatpush.bf16.msra.mxu0 %v6057_v4  ;;  %v6477_v61 = vor.u32 %v9128_v46, %v6474_v47  ;;  %v9120_v63 = vld [vmem:[%s14668_s2 + $0x384] sm:$0xf] }
  0x2e   :  { %v9156_v1 = vld [vmem:[%s14668_s2 + $0x49c] sm:$0xf0]  ;;  %v9024_v46 = vld [vmem:[%s14668_s2 + $0x84] sm:$0xf] }
  0x2f   :  { %v6824_v2 = vld [vmem:[%s14668_s2 + $0x680] sm:$0xf]  ;;  %v6569_v6 = vor.u32 %v9156_v1, %v6568_v0  ;;  %2459 = vmatpush.bf16.msra.mxu1 %v6313_v5  ;;  %v6442_v0 = vld [vmem:[%s14668_s2 + $0x3a0] sm:$0xf0] }
  0x30   :  { %v9220_v3 = vld [vmem:[%s14668_s2 + $0x69c] sm:$0xf0]  ;;  %v6058_v47 = vld [vmem:[%s14668_s2 + $0xa0] sm:$0xf0] }
  0x31   :  { %v6024_v7 = vld [vmem:[%s14668_s2 + $0x40] sm:$0xf]  ;;  %v6825_v10 = vor.u32 %v9220_v3, %v6824_v2  ;;  %2472 = vmatpush.bf16.msra.mxu2 %v6569_v6  ;;  %v6189_v2 = vor.u32 %v9056_v55, %v6186_v56  ;;  %v6061_v55 = vor.u32 %v9024_v46, %v6058_v47  ;;  %v7466_v46 = vld [vmem:[%s14668_s2 + $0xba0] sm:$0xf0] }
  0x32   :  { %v9020_v8 = vld [vmem:[%s14668_s2 + $0x5c] sm:$0xf0]  ;;  %v9176_v47 = vld [vmem:[%s14668_s2 + $0x544] sm:$0xf] }
  0x33   :  { %v6280_v9 = vld [vmem:[%s14668_s2 + $0x240] sm:$0xf]  ;;  %v6025_v17 = vor.u32 %v9020_v8, %v6024_v7  ;;  %2485 = vmatpush.bf16.msra.mxu3 %v6825_v10  ;;  %v9048_v7 = vld [vmem:[%s14668_s2 + $0x144] sm:$0xf]  ;;  %v6445_v10 = vor.u32 %v9120_v63, %v6442_v0 }
  0x34   :  { %v9084_v11 = vld [vmem:[%s14668_s2 + $0x25c] sm:$0xf0]  ;;  %v6154_v8 = vld [vmem:[%s14668_s2 + $0x160] sm:$0xf0] }
  0x35   :  { %v6536_v12 = vld [vmem:[%s14668_s2 + $0x440] sm:$0xf]  ;;  %v6281_v21 = vor.u32 %v9084_v11, %v6280_v9  ;;  %2447 = vmatpush.bf16.msra.mxu0 %v6025_v17  ;;  %v6026_v63 = vld [vmem:[%s14668_s2 + $0x60] sm:$0xf0] }
  0x36   :  { %v9148_v13 = vld [vmem:[%s14668_s2 + $0x45c] sm:$0xf0]  ;;  %v9080_v0 = vld [vmem:[%s14668_s2 + $0x244] sm:$0xf] }
  0x37   :  { %v6792_v14 = vld [vmem:[%s14668_s2 + $0x640] sm:$0xf]  ;;  %v6537_v22 = vor.u32 %v9148_v13, %v6536_v12  ;;  %2460 = vmatpush.bf16.msra.mxu1 %v6281_v21  ;;  %v9112_v12 = vld [vmem:[%s14668_s2 + $0x344] sm:$0xf] }
  0x38   :  { %v9212_v15 = vld [vmem:[%s14668_s2 + $0x65c] sm:$0xf0]  ;;  %v6410_v13 = vld [vmem:[%s14668_s2 + $0x360] sm:$0xf0] }
  0x39   :  { %v5992_v16 = vld [vmem:[%s14668_s2] sm:$0xf]  ;;  %v6793_v26 = vor.u32 %v9212_v15, %v6792_v14  ;;  %2473 = vmatpush.bf16.msra.mxu2 %v6537_v22  ;;  %v6157_v15 = vor.u32 %v9048_v7, %v6154_v8  ;;  %v6122_v21 = vld [vmem:[%s14668_s2 + $0x120] sm:$0xf0]  ;;  %v42_v22 = vld [vmem:[%s14669_s1 + $0x18] sm:$0xf] }
  0x3a   :  { %v9012_v18 = vld [vmem:[%s14668_s2 + $0x1c] sm:$0xf0]  ;;  %v463_v35 = vunpack.c.l.b16 %v42_v22  ;;  %v7242_v22 = vld [vmem:[%s14668_s2 + $0x9e0] sm:$0xf0] }
  0x3b   :  { %v6248_v19 = vld [vmem:[%s14668_s2 + $0x200] sm:$0xf]  ;;  %v5993_v33 = vor.u32 %v9012_v18, %v5992_v16  ;;  %2486 = vmatpush.bf16.msra.mxu3 %v6793_v26  ;;  %v6378_v26 = vld [vmem:[%s14668_s2 + $0x320] sm:$0xf0] }
  0x3c   :  { %v9076_v20 = vld [vmem:[%s14668_s2 + $0x21c] sm:$0xf0]  ;;  %v6381_v36 = vor.u32 %v9104_v25, %v6378_v26  ;;  %v9072_v26 = vld [vmem:[%s14668_s2 + $0x204] sm:$0xf] }
  0x3d   :  { %v6504_v23 = vld [vmem:[%s14668_s2 + $0x400] sm:$0xf]  ;;  %v6249_v38 = vor.u32 %v9076_v20, %v6248_v19  ;;  %2448 = vmatpush.bf16.msra.mxu0 %v5993_v33  ;;  %v9040_v20 = vld [vmem:[%s14668_s2 + $0x104] sm:$0xf] }
  0x3e   :  { %v9140_v24 = vld [vmem:[%s14668_s2 + $0x41c] sm:$0xf0]  ;;  %v9032_v33 = vld [vmem:[%s14668_s2 + $0xc4] sm:$0xf] }
  0x3f   :  { %v6760_v27 = vld [vmem:[%s14668_s2 + $0x600] sm:$0xf]  ;;  %v6505_v39 = vor.u32 %v9140_v24, %v6504_v23  ;;  %2461 = vmatpush.bf16.msra.mxu1 %v6249_v38  ;;  %v6413_v23 = vor.u32 %v9112_v12, %v6410_v13  ;;  %v9096_v38 = vld [vmem:[%s14668_s2 + $0x2c4] sm:$0xf] }
  0x40   :  { %v9204_v28 = vld [vmem:[%s14668_s2 + $0x61c] sm:$0xf0]  ;;  %v9008_v12 = vld [vmem:[%s14668_s2 + $0x4] sm:$0xf] }
  0x41   :  { %v7240_v29 = vld [vmem:[%s14668_s2 + $0x9c0] sm:$0xf]  ;;  %v6761_v43 = vor.u32 %v9204_v28, %v6760_v27  ;;  %2474 = vmatpush.bf16.msra.mxu2 %v6505_v39  ;;  %v6125_v28 = vor.u32 %v9040_v20, %v6122_v21  ;;  %v6346_v39 = vld [vmem:[%s14668_s2 + $0x2e0] sm:$0xf0] }
  0x42   :  { %v9324_v30 = vld [vmem:[%s14668_s2 + $0x9dc] sm:$0xf0]  ;;  %v5994_v13 = vld [vmem:[%s14668_s2 + $0x20] sm:$0xf0] }
  0x43   :  { %v7496_v31 = vld [vmem:[%s14668_s2 + $0xbc0] sm:$0xf]  ;;  %v7241_v44 = vor.u32 %v9324_v30, %v7240_v29  ;;  %2487 = vmatpush.bf16.msra.mxu3 %v6761_v43  ;;  %v9320_v21 = vld [vmem:[%s14668_s2 + $0x9c4] sm:$0xf]  ;;  %v5997_v25 = vor.u32 %v9008_v12, %v5994_v13 }
  0x44   :  { %v9388_v32 = vld [vmem:[%s14668_s2 + $0xbdc] sm:$0xf0]  ;;  %2475 = vmatmul.bf16.vlgmr.msra.gmra.mxu2 %v10020_v53  ;;  %v9160_v12 = vld [vmem:[%s14668_s2 + $0x4c4] sm:$0xf] }
  0x45   :  { %v39_v37 = vld [vmem:[%s14669_s1] sm:$0xff]  ;;  %v7497_v48 = vor.u32 %v9388_v32, %v7496_v31  ;;  %2493 = vmatpush.bf16.msrb.mxu0 %v7241_v44 }
  0x46   :  { %v7528_v40 = vld [vmem:[%s14668_s2 + $0xc00] sm:$0xf]  ;;  %v457_v41 = vunpack.c.l.b16 %v39_v37  ;;  %v458_v58 = vunpack.c.h.b16 %v39_v37  ;;  %2488 = vmatmul.bf16.vlgmr.msra.gmra.mxu3 %v10033_v60 }
  0x47   :  { %v9396_v45 = vld [vmem:[%s14668_s2 + $0xc1c] sm:$0xf0]  ;;  %2506 = vmatpush.bf16.msrb.mxu1 %v7497_v48  ;;  %2532 = vmatpush.bf16.msrb.mxu3 %v6221_v49  ;;  %v10140_v48 = vpack.c.b16 %v463_v35, %v463_v35  ;;  %v6349_v49 = vor.u32 %v9096_v38, %v6346_v39  ;;  %v6698_v35 = vld [vmem:[%s14668_s2 + $0x5a0] sm:$0xf0] }
  0x48   :  { %v7208_v50 = vld [vmem:[%s14668_s2 + $0x980] sm:$0xf]  ;;  %v10031_v57 = vpack.c.b16 %v457_v41, %v457_v41  ;;  %v7529_v59 = vor.u32 %v9396_v45, %v7528_v40  ;;  %v10061_v9 = vpack.c.b16 %v458_v58, %v458_v58  ;;  %v6093_v41 = vor.u32 %v9032_v33, %v6090_v34 }
  0x49   :  { %v9316_v51 = vld [vmem:[%s14668_s2 + $0x99c] sm:$0xf0]  ;;  %v7245_v33 = vor.u32 %v9320_v21, %v7242_v22  ;;  %v9352_v22 = vld [vmem:[%s14668_s2 + $0xac4] sm:$0xf] }
  0x4a   :  { %v7464_v52 = vld [vmem:[%s14668_s2 + $0xb80] sm:$0xf]  ;;  %v7209_v62 = vor.u32 %v9316_v51, %v7208_v50  ;;  %2449 = vmatmul.bf16.vlgmr.msra.gmra.mxu0 %v10031_v57  ;;  %2526 = vmatpush.bf16.msrb.mxu2 %v7529_v59  ;;  %v9088_v51 = vld [vmem:[%s14668_s2 + $0x284] sm:$0xf] }
  0x4b   :  { %v9380_v54 = vld [vmem:[%s14668_s2 + $0xb9c] sm:$0xf0]  ;;  %2533 = vmatpush.bf16.msrb.mxu3 %v6189_v2  ;;  %2462 = vmatmul.bf16.vlgmr.msra.gmra.mxu1 %v10061_v9 }
  0x4c   :  { %v7465_v1 = vor.u32 %v9380_v54, %v7464_v52  ;;  %v7176_v3 = vld [vmem:[%s14668_s2 + $0x940] sm:$0xf]  ;;  %2494 = vmatpush.bf16.msrb.mxu0 %v7209_v62  ;;  %v6314_v52 = vld [vmem:[%s14668_s2 + $0x2a0] sm:$0xf0] }
  0x4d   :  { %v9308_v4 = vld [vmem:[%s14668_s2 + $0x95c] sm:$0xf0]  ;;  %v9016_v62 = vld [vmem:[%s14668_s2 + $0x44] sm:$0xf] }
  0x4e   :  { %v7432_v5 = vld [vmem:[%s14668_s2 + $0xb40] sm:$0xf]  ;;  %2545 = vmatpush.bf16.msra.mxu2 %v6477_v61  ;;  %v7177_v11 = vor.u32 %v9308_v4, %v7176_v3  ;;  %2507 = vmatpush.bf16.msrb.mxu1 %v7465_v1  ;;  %v6317_v1 = vor.u32 %v9088_v51, %v6314_v52  ;;  %v6282_v3 = vld [vmem:[%s14668_s2 + $0x260] sm:$0xf0]  ;;  %v6029_v7 = vor.u32 %v9016_v62, %v6026_v63 }
  0x4f   :  { %v9372_v6 = vld [vmem:[%s14668_s2 + $0xb5c] sm:$0xf0]  ;;  %2534 = vmatpush.bf16.msrb.mxu3 %v6157_v15  ;;  %v6730_v15 = vld [vmem:[%s14668_s2 + $0x5e0] sm:$0xf0] }
  0x50   :  { %v7433_v14 = vor.u32 %v9372_v6, %v7432_v5  ;;  %v7144_v16 = vld [vmem:[%s14668_s2 + $0x900] sm:$0xf]  ;;  %2495 = vmatpush.bf16.msrb.mxu0 %v7177_v11  ;;  %v41_v5 = vld [vmem:[%s14669_s1 + $0x10] sm:$0xff]  ;;  %v9240_v51 = vld [vmem:[%s14668_s2 + $0x744] sm:$0xf] }
  0x51   :  { %v9300_v17 = vld [vmem:[%s14668_s2 + $0x91c] sm:$0xf0]  ;;  %v6922_v52 = vld [vmem:[%s14668_s2 + $0x760] sm:$0xf0] }
  0x52   :  { %v7400_v18 = vld [vmem:[%s14668_s2 + $0xb00] sm:$0xf]  ;;  %2546 = vmatpush.bf16.msra.mxu2 %v6445_v10  ;;  %v7145_v24 = vor.u32 %v9300_v17, %v7144_v16  ;;  %2508 = vmatpush.bf16.msrb.mxu1 %v7433_v14  ;;  %v9192_v14 = vld [vmem:[%s14668_s2 + $0x5c4] sm:$0xf] }
  0x53   :  { %v9364_v19 = vld [vmem:[%s14668_s2 + $0xb1c] sm:$0xf0]  ;;  %2535 = vmatpush.bf16.msrb.mxu3 %v6125_v28  ;;  %v9256_v16 = vld [vmem:[%s14668_s2 + $0x7c4] sm:$0xf]  ;;  %v6733_v28 = vor.u32 %v9192_v14, %v6730_v15 }
  0x54   :  { %v7401_v27 = vor.u32 %v9364_v19, %v7400_v18  ;;  %v7112_v29 = vld [vmem:[%s14668_s2 + $0x8c0] sm:$0xf]  ;;  %2496 = vmatpush.bf16.msrb.mxu0 %v7145_v24  ;;  %7558 = vmatmul.msk.bf16.vlgmr.msrb.gmra.mxu2 %vm2437_vm0, %v10140_v48  ;;  %v6986_v17 = vld [vmem:[%s14668_s2 + $0x7e0] sm:$0xf0]  ;;  %v461_v18 = vunpack.c.l.b16 %v41_v5  ;;  %v6285_v19 = vor.u32 %v9080_v0, %v6282_v3 }
  0x55   :  { %v9292_v30 = vld [vmem:[%s14668_s2 + $0x8dc] sm:$0xf0]  ;;  %v7434_v62 = vld [vmem:[%s14668_s2 + $0xb60] sm:$0xf0] }
  0x56   :  { %v7368_v31 = vld [vmem:[%s14668_s2 + $0xac0] sm:$0xf]  ;;  %2547 = vmatpush.bf16.msra.mxu2 %v6413_v23  ;;  %v7113_v37 = vor.u32 %v9292_v30, %v7112_v29  ;;  %2509 = vmatpush.bf16.msrb.mxu1 %v7401_v27  ;;  %v462_v23 = vunpack.c.h.b16 %v41_v5  ;;  %v6250_v27 = vld [vmem:[%s14668_s2 + $0x220] sm:$0xf0]  ;;  %v6989_v29 = vor.u32 %v9256_v16, %v6986_v17  ;;  %v10228_v34 = vpack.c.b16 %v461_v18, %v461_v18 }
  0x57   :  { %v9356_v32 = vld [vmem:[%s14668_s2 + $0xadc] sm:$0xf0]  ;;  %2536 = vmatpush.bf16.msrb.mxu3 %v6093_v41  ;;  %v9384_v30 = vld [vmem:[%s14668_s2 + $0xbc4] sm:$0xf]  ;;  %v6253_v38 = vor.u32 %v9072_v26, %v6250_v27 }
  0x58   :  { %v7369_v40 = vor.u32 %v9356_v32, %v7368_v31  ;;  %v7080_v42 = vld [vmem:[%s14668_s2 + $0x880] sm:$0xf]  ;;  %2497 = vmatpush.bf16.msrb.mxu0 %v7113_v37  ;;  %v7498_v31 = vld [vmem:[%s14668_s2 + $0xbe0] sm:$0xf0]  ;;  %v10239_v39 = vpack.c.b16 %v462_v23, %v462_v23 }
  0x59   :  { %v9284_v43 = vld [vmem:[%s14668_s2 + $0x89c] sm:$0xf0]  ;;  %v9184_v32 = vld [vmem:[%s14668_s2 + $0x584] sm:$0xf] }
  0x5a   :  { %v7336_v44 = vld [vmem:[%s14668_s2 + $0xa80] sm:$0xf]  ;;  %2548 = vmatpush.bf16.msra.mxu2 %v6381_v36  ;;  %v7081_v50 = vor.u32 %v9284_v43, %v7080_v42  ;;  %2510 = vmatpush.bf16.msrb.mxu1 %v7369_v40  ;;  %v9248_v36 = vld [vmem:[%s14668_s2 + $0x784] sm:$0xf]  ;;  %v7501_v42 = vor.u32 %v9384_v30, %v7498_v31  ;;  %v6701_v43 = vor.u32 %v9184_v32, %v6698_v35 }
  0x5b   :  { %v9348_v45 = vld [vmem:[%s14668_s2 + $0xa9c] sm:$0xf0]  ;;  %2537 = vmatpush.bf16.msrb.mxu3 %v6061_v55  ;;  %v6954_v37 = vld [vmem:[%s14668_s2 + $0x7a0] sm:$0xf0] }
  0x5c   :  { %v7337_v54 = vor.u32 %v9348_v45, %v7336_v44  ;;  %v7048_v56 = vld [vmem:[%s14668_s2 + $0x840] sm:$0xf]  ;;  %2498 = vmatpush.bf16.msrb.mxu0 %v7081_v50  ;;  %v9312_v40 = vld [vmem:[%s14668_s2 + $0x984] sm:$0xf]  ;;  %v6957_v44 = vor.u32 %v9248_v36, %v6954_v37 }
  0x5d   :  { %v9276_v58 = vld [vmem:[%s14668_s2 + $0x85c] sm:$0xf0]  ;;  %v7210_v41 = vld [vmem:[%s14668_s2 + $0x9a0] sm:$0xf0] }
  0x5e   :  { %v7304_v59 = vld [vmem:[%s14668_s2 + $0xa40] sm:$0xf]  ;;  %2549 = vmatpush.bf16.msra.mxu2 %v6349_v49  ;;  %v7049_v2 = vor.u32 %v9276_v58, %v7048_v56  ;;  %2511 = vmatpush.bf16.msrb.mxu1 %v7337_v54  ;;  %v9376_v45 = vld [vmem:[%s14668_s2 + $0xb84] sm:$0xf]  ;;  %v7213_v49 = vor.u32 %v9312_v40, %v7210_v41 }
  0x5f   :  { %v9340_v61 = vld [vmem:[%s14668_s2 + $0xa5c] sm:$0xf0]  ;;  %2538 = vmatpush.bf16.msrb.mxu3 %v6029_v7  ;;  %v6666_v50 = vld [vmem:[%s14668_s2 + $0x560] sm:$0xf0]  ;;  %v7469_v56 = vor.u32 %v9376_v45, %v7466_v46 }
  0x60   :  { %v7016_v4 = vld [vmem:[%s14668_s2 + $0x800] sm:$0xf]  ;;  %v7305_v6 = vor.u32 %v9340_v61, %v7304_v59  ;;  %2499 = vmatpush.bf16.msrb.mxu0 %v7049_v2  ;;  %v9304_v54 = vld [vmem:[%s14668_s2 + $0x944] sm:$0xf]  ;;  %v6669_v58 = vor.u32 %v9176_v47, %v6666_v50  ;;  %v6925_v59 = vor.u32 %v9240_v51, %v6922_v52 }
  0x61   :  { %v9268_v8 = vld [vmem:[%s14668_s2 + $0x81c] sm:$0xf0]  ;;  %v7178_v55 = vld [vmem:[%s14668_s2 + $0x960] sm:$0xf0] }
  0x62   :  { %v7272_v10 = vld [vmem:[%s14668_s2 + $0xa00] sm:$0xf]  ;;  %2550 = vmatpush.bf16.msra.mxu2 %v6317_v1  ;;  %v7017_v20 = vor.u32 %v9268_v8, %v7016_v4  ;;  %2512 = vmatpush.bf16.msrb.mxu1 %v7305_v6  ;;  %v9368_v61 = vld [vmem:[%s14668_s2 + $0xb44] sm:$0xf]  ;;  %v7181_v0 = vor.u32 %v9304_v54, %v7178_v55 }
  0x63   :  { %v9332_v11 = vld [vmem:[%s14668_s2 + $0xa1c] sm:$0xf0]  ;;  %2539 = vmatpush.bf16.msrb.mxu3 %v5997_v25  ;;  %v9168_v63 = vld [vmem:[%s14668_s2 + $0x504] sm:$0xf]  ;;  %v7437_v6 = vor.u32 %v9368_v61, %v7434_v62  ;;  %v6224_v61 = vld [vmem:[%s14668_s2 + $0x1c8] sm:$0xf] }
  0x64   :  { %v7273_v24 = vor.u32 %v9332_v11, %v7272_v10  ;;  %2500 = vmatpush.bf16.msrb.mxu0 %v7017_v20  ;;  %v6634_v1 = vld [vmem:[%s14668_s2 + $0x520] sm:$0xf0]  ;;  %v9069_v62 = vld [vmem:[%s14668_s2 + $0x1e4] sm:$0xf0] }
  0x65   :  { %v9232_v2 = vld [vmem:[%s14668_s2 + $0x704] sm:$0xf]  ;;  %v6637_v7 = vor.u32 %v9168_v63, %v6634_v1  ;;  %v6736_v63 = vld [vmem:[%s14668_s2 + $0x5c8] sm:$0xf] }
  0x66   :  { %2551 = vmatpush.bf16.msra.mxu2 %v6285_v19  ;;  %2513 = vmatpush.bf16.msrb.mxu1 %v7273_v24  ;;  %v6890_v3 = vld [vmem:[%s14668_s2 + $0x720] sm:$0xf0]  ;;  %v9197_v1 = vld [vmem:[%s14668_s2 + $0x5e4] sm:$0xf0] }
  0x67   :  { %2584 = vmatpush.bf16.msra.mxu3 %v7245_v33  ;;  %2501 = vmatmul.bf16.vlgmr.msrb.gmra.mxu0 %v10228_v34  ;;  %v9296_v4 = vld [vmem:[%s14668_s2 + $0x904] sm:$0xf]  ;;  %v6893_v8 = vor.u32 %v9232_v2, %v6890_v3 }
  0x68   :  { %2558 = vmatpush.bf16.msra.mxu0 %v6733_v28  ;;  %2540 = vmatmul.bf16.vlgmr.msrb.gmra.mxu3 %v10031_v57  ;;  %v7146_v5 = vld [vmem:[%s14668_s2 + $0x920] sm:$0xf0] }
  0x69   :  { %2514 = vmatmul.bf16.vlgmr.msrb.gmra.mxu1 %v10239_v39  ;;  %v9360_v10 = vld [vmem:[%s14668_s2 + $0xb04] sm:$0xf]  ;;  %v7149_v13 = vor.u32 %v9296_v4, %v7146_v5 }
  0x6a   :  { %2571 = vmatpush.bf16.msra.mxu1 %v6989_v29  ;;  %2552 = vmatpush.bf16.msra.mxu2 %v6253_v38  ;;  %v7402_v11 = vld [vmem:[%s14668_s2 + $0xb20] sm:$0xf0] }
  0x6b   :  { %2585 = vmatpush.bf16.msra.mxu3 %v7213_v49  ;;  %v6602_v14 = vld [vmem:[%s14668_s2 + $0x4e0] sm:$0xf0]  ;;  %v7405_v19 = vor.u32 %v9360_v10, %v7402_v11  ;;  %v6225_v10 = vor.u32 %v9069_v62, %v6224_v61  ;;  %v6992_v11 = vld [vmem:[%s14668_s2 + $0x7c8] sm:$0xf] }
  0x6c   :  { %2559 = vmatpush.bf16.msra.mxu0 %v6701_v43  ;;  %v9224_v15 = vld [vmem:[%s14668_s2 + $0x6c4] sm:$0xf]  ;;  %v6605_v20 = vor.u32 %v9160_v12, %v6602_v14  ;;  %v9261_v12 = vld [vmem:[%s14668_s2 + $0x7e4] sm:$0xf0] }
  0x6d   :  { %2553 = vmatmul.bf16.vlgmr.msra.gmra.mxu2 %v10061_v9  ;;  %v6858_v16 = vld [vmem:[%s14668_s2 + $0x6e0] sm:$0xf0]  ;;  %v9037_v61 = vld [vmem:[%s14668_s2 + $0xe4] sm:$0xf0] }
  0x6e   :  { %2597 = vmatpush.bf16.msrb.mxu2 %v7501_v42  ;;  %2572 = vmatpush.bf16.msra.mxu1 %v6957_v44  ;;  %v9288_v17 = vld [vmem:[%s14668_s2 + $0x8c4] sm:$0xf]  ;;  %v6861_v21 = vor.u32 %v9224_v15, %v6858_v16  ;;  %v6480_v15 = vld [vmem:[%s14668_s2 + $0x3c8] sm:$0xf] }
  0x6f   :  { %2586 = vmatpush.bf16.msra.mxu3 %v7181_v0  ;;  %v7114_v18 = vld [vmem:[%s14668_s2 + $0x8e0] sm:$0xf0]  ;;  %v9133_v16 = vld [vmem:[%s14668_s2 + $0x3e4] sm:$0xf0] }
  0x70   :  { %2560 = vmatpush.bf16.msra.mxu0 %v6669_v58  ;;  %v7370_v23 = vld [vmem:[%s14668_s2 + $0xae0] sm:$0xf0]  ;;  %v7117_v25 = vor.u32 %v9288_v17, %v7114_v18  ;;  %v6192_v17 = vld [vmem:[%s14668_s2 + $0x188] sm:$0xf] }
  0x71   :  { %v9152_v24 = vld [vmem:[%s14668_s2 + $0x484] sm:$0xf]  ;;  %v7373_v31 = vor.u32 %v9352_v22, %v7370_v23  ;;  %v6993_v22 = vor.u32 %v9261_v12, %v6992_v11  ;;  %v6481_v23 = vor.u32 %v9133_v16, %v6480_v15  ;;  %v6608_v62 = vld [vmem:[%s14668_s2 + $0x4c8] sm:$0xf] }
  0x72   :  { %2598 = vmatpush.bf16.msrb.mxu2 %v7469_v56  ;;  %2573 = vmatpush.bf16.msra.mxu1 %v6925_v59  ;;  %v6570_v26 = vld [vmem:[%s14668_s2 + $0x4a0] sm:$0xf0]  ;;  %v6576_v11 = vld [vmem:[%s14668_s2 + $0x488] sm:$0xf] }
  0x73   :  { %2587 = vmatpush.bf16.msra.mxu3 %v7149_v13  ;;  %v9216_v27 = vld [vmem:[%s14668_s2 + $0x684] sm:$0xf]  ;;  %v6573_v32 = vor.u32 %v9152_v24, %v6570_v26  ;;  %v6737_v13 = vor.u32 %v9197_v1, %v6736_v63  ;;  %v6960_v24 = vld [vmem:[%s14668_s2 + $0x788] sm:$0xf] }
  0x74   :  { %2561 = vmatpush.bf16.msra.mxu0 %v6637_v7  ;;  %v6826_v28 = vld [vmem:[%s14668_s2 + $0x6a0] sm:$0xf0]  ;;  %v9165_v63 = vld [vmem:[%s14668_s2 + $0x4e4] sm:$0xf0] }
  0x75   :  { %v9280_v29 = vld [vmem:[%s14668_s2 + $0x884] sm:$0xf]  ;;  %v6829_v33 = vor.u32 %v9216_v27, %v6826_v28  ;;  %v6448_v28 = vld [vmem:[%s14668_s2 + $0x388] sm:$0xf] }
  0x76   :  { %2599 = vmatpush.bf16.msrb.mxu2 %v7437_v6  ;;  %2574 = vmatpush.bf16.msra.mxu1 %v6893_v8  ;;  %v7082_v30 = vld [vmem:[%s14668_s2 + $0x8a0] sm:$0xf0]  ;;  %v9157_v12 = vld [vmem:[%s14668_s2 + $0x4a4] sm:$0xf0] }
  0x77   :  { %v9344_v35 = vld [vmem:[%s14668_s2 + $0xa84] sm:$0xf]  ;;  %2588 = vmatpush.bf16.msra.mxu3 %v7117_v25  ;;  %v7085_v38 = vor.u32 %v9280_v29, %v7082_v30  ;;  %v9253_v25 = vld [vmem:[%s14668_s2 + $0x7a4] sm:$0xf0] }
  0x78   :  { %2562 = vmatpush.bf16.msra.mxu0 %v6605_v20  ;;  %v7338_v36 = vld [vmem:[%s14668_s2 + $0xaa0] sm:$0xf0]  ;;  %v6704_v20 = vld [vmem:[%s14668_s2 + $0x588] sm:$0xf] }
  0x79   :  { %v9144_v37 = vld [vmem:[%s14668_s2 + $0x444] sm:$0xf]  ;;  %v7341_v45 = vor.u32 %v9344_v35, %v7338_v36  ;;  %v9125_v29 = vld [vmem:[%s14668_s2 + $0x3a4] sm:$0xf0]  ;;  %v6961_v35 = vor.u32 %v9253_v25, %v6960_v24 }
  0x7a   :  { %2600 = vmatpush.bf16.msrb.mxu2 %v7405_v19  ;;  %2575 = vmatpush.bf16.msra.mxu1 %v6861_v21  ;;  %v6538_v40 = vld [vmem:[%s14668_s2 + $0x460] sm:$0xf0]  ;;  %v9061_v19 = vld [vmem:[%s14668_s2 + $0x1a4] sm:$0xf0]  ;;  %v6449_v36 = vor.u32 %v9125_v29, %v6448_v28 }
  0x7b   :  { %v9208_v41 = vld [vmem:[%s14668_s2 + $0x644] sm:$0xf]  ;;  %v6541_v49 = vor.u32 %v9144_v37, %v6538_v40  ;;  %2589 = vmatpush.bf16.msra.mxu3 %v7085_v38  ;;  %v9189_v21 = vld [vmem:[%s14668_s2 + $0x5a4] sm:$0xf0]  ;;  %v6193_v26 = vor.u32 %v9061_v19, %v6192_v17 }
  0x7c   :  { %v6794_v42 = vld [vmem:[%s14668_s2 + $0x660] sm:$0xf0]  ;;  %2563 = vmatpush.bf16.msra.mxu0 %v6573_v32  ;;  %v6705_v27 = vor.u32 %v9189_v21, %v6704_v20  ;;  %v6160_v30 = vld [vmem:[%s14668_s2 + $0x148] sm:$0xf] }
  0x7d   :  { %v9272_v43 = vld [vmem:[%s14668_s2 + $0x844] sm:$0xf]  ;;  %v6797_v50 = vor.u32 %v9208_v41, %v6794_v42  ;;  %v6672_v32 = vld [vmem:[%s14668_s2 + $0x548] sm:$0xf] }
  0x7e   :  { %v7050_v44 = vld [vmem:[%s14668_s2 + $0x860] sm:$0xf0]  ;;  %2601 = vmatpush.bf16.msrb.mxu2 %v7373_v31  ;;  %2576 = vmatpush.bf16.msra.mxu1 %v6829_v33  ;;  %v9053_v31 = vld [vmem:[%s14668_s2 + $0x164] sm:$0xf0] }
  0x7f   :  { %v9336_v46 = vld [vmem:[%s14668_s2 + $0xa44] sm:$0xf]  ;;  %v7053_v55 = vor.u32 %v9272_v43, %v7050_v44  ;;  %v9181_v33 = vld [vmem:[%s14668_s2 + $0x564] sm:$0xf0]  ;;  %v6161_v40 = vor.u32 %v9053_v31, %v6160_v30 }
  0x80   :  { %v7306_v47 = vld [vmem:[%s14668_s2 + $0xa60] sm:$0xf0]  ;;  %2564 = vmatpush.bf16.msra.mxu0 %v6541_v49  ;;  %v6928_v37 = vld [vmem:[%s14668_s2 + $0x748] sm:$0xf]  ;;  %v6673_v41 = vor.u32 %v9181_v33, %v6672_v32 }
  0x81   :  { %v9136_v51 = vld [vmem:[%s14668_s2 + $0x404] sm:$0xf]  ;;  %v7309_v0 = vor.u32 %v9336_v46, %v7306_v47  ;;  %2590 = vmatpush.bf16.msra.mxu3 %v7053_v55  ;;  %v9245_v38 = vld [vmem:[%s14668_s2 + $0x764] sm:$0xf0] }
  0x82   :  { %v6506_v52 = vld [vmem:[%s14668_s2 + $0x420] sm:$0xf0]  ;;  %2602 = vmatpush.bf16.msrb.mxu2 %v7341_v45  ;;  %2577 = vmatpush.bf16.msra.mxu1 %v6797_v50  ;;  %v6416_v42 = vld [vmem:[%s14668_s2 + $0x348] sm:$0xf]  ;;  %v6929_v49 = vor.u32 %v9245_v38, %v6928_v37 }
  0x83   :  { %v9200_v54 = vld [vmem:[%s14668_s2 + $0x604] sm:$0xf]  ;;  %v6509_v4 = vor.u32 %v9136_v51, %v6506_v52  ;;  %v9117_v43 = vld [vmem:[%s14668_s2 + $0x364] sm:$0xf0] }
  0x84   :  { %v6762_v56 = vld [vmem:[%s14668_s2 + $0x620] sm:$0xf0]  ;;  %v6128_v44 = vld [vmem:[%s14668_s2 + $0x108] sm:$0xf]  ;;  %v6417_v50 = vor.u32 %v9117_v43, %v6416_v42 }
  0x85   :  { %v9264_v58 = vld [vmem:[%s14668_s2 + $0x804] sm:$0xf]  ;;  %v6765_v5 = vor.u32 %v9200_v54, %v6762_v56  ;;  %2565 = vmatpush.bf16.msra.mxu0 %v6509_v4  ;;  %v9045_v45 = vld [vmem:[%s14668_s2 + $0x124] sm:$0xf0] }
  0x86   :  { %v7018_v59 = vld [vmem:[%s14668_s2 + $0x820] sm:$0xf0]  ;;  %2603 = vmatpush.bf16.msrb.mxu2 %v7309_v0  ;;  %v6640_v46 = vld [vmem:[%s14668_s2 + $0x508] sm:$0xf]  ;;  %v6129_v54 = vor.u32 %v9045_v45, %v6128_v44 }
  0x87   :  { %v9392_v2 = vld [vmem:[%s14668_s2 + $0xc04] sm:$0xf]  ;;  %v7021_v8 = vor.u32 %v9264_v58, %v7018_v59  ;;  %2578 = vmatpush.bf16.msra.mxu1 %v6765_v5  ;;  %v9173_v47 = vld [vmem:[%s14668_s2 + $0x524] sm:$0xf0]  ;;  %v6609_v5 = vor.u32 %v9165_v63, %v6608_v62  ;;  %v6482_v63 = vld [vmem:[%s14668_s2 + $0x3e8] sm:$0xf0] }
  0x88   :  { %v7530_v3 = vld [vmem:[%s14668_s2 + $0xc20] sm:$0xf0]  ;;  %2566 = vmatmul.bf16.vlgmr.msra.gmra.mxu0 %v10020_v53  ;;  %v6896_v51 = vld [vmem:[%s14668_s2 + $0x708] sm:$0xf]  ;;  %v6641_v55 = vor.u32 %v9173_v47, %v6640_v46 }
  0x89   :  { %v9328_v6 = vld [vmem:[%s14668_s2 + $0xa04] sm:$0xf]  ;;  %v7533_v14 = vor.u32 %v9392_v2, %v7530_v3  ;;  %2591 = vmatpush.bf16.msra.mxu3 %v7021_v8  ;;  %2649 = vmatpush.bf16.msrb.mxu0 %v6737_v13  ;;  %v9237_v52 = vld [vmem:[%s14668_s2 + $0x724] sm:$0xf0] }
  0x8a   :  { %v7274_v7 = vld [vmem:[%s14668_s2 + $0xa20] sm:$0xf0]  ;;  %2579 = vmatmul.bf16.vlgmr.msra.gmra.mxu1 %v10033_v60  ;;  %v6384_v56 = vld [vmem:[%s14668_s2 + $0x308] sm:$0xf]  ;;  %v6897_v0 = vor.u32 %v9237_v52, %v6896_v51 }
  0x8b   :  { %v7277_v18 = vor.u32 %v9328_v6, %v7274_v7  ;;  %2623 = vmatpush.bf16.msrb.mxu1 %v6225_v10  ;;  %v9109_v58 = vld [vmem:[%s14668_s2 + $0x324] sm:$0xf0] }
  0x8c   :  { %2592 = vmatmul.bf16.vlgmr.msra.gmra.mxu3 %v10228_v34  ;;  %v6096_v59 = vld [vmem:[%s14668_s2 + $0xc8] sm:$0xf]  ;;  %v6385_v1 = vor.u32 %v9109_v58, %v6384_v56  ;;  %v9065_v58 = vld [vmem:[%s14668_s2 + $0x1cc] sm:$0xf] }
  0x8d   :  { %2617 = vmatpush.bf16.msrb.mxu3 %v7533_v14  ;;  %2604 = vmatpush.bf16.msrb.mxu2 %v7277_v18  ;;  %v6864_v2 = vld [vmem:[%s14668_s2 + $0x6c8] sm:$0xf]  ;;  %v6097_v4 = vor.u32 %v9037_v61, %v6096_v59  ;;  %v6577_v18 = vor.u32 %v9157_v12, %v6576_v11  ;;  %v6226_v59 = vld [vmem:[%s14668_s2 + $0x1e8] sm:$0xf0] }
  0x8e   :  { %2650 = vmatpush.bf16.msrb.mxu0 %v6705_v27  ;;  %v9229_v3 = vld [vmem:[%s14668_s2 + $0x6e4] sm:$0xf0]  ;;  %v9129_v61 = vld [vmem:[%s14668_s2 + $0x3cc] sm:$0xf] }
  0x8f   :  { %2624 = vmatpush.bf16.msrb.mxu1 %v6193_v26  ;;  %v6352_v6 = vld [vmem:[%s14668_s2 + $0x2c8] sm:$0xf]  ;;  %v6865_v13 = vor.u32 %v9229_v3, %v6864_v2  ;;  %v6194_v11 = vld [vmem:[%s14668_s2 + $0x1a8] sm:$0xf0] }
  0x90   :  { %2605 = vmatmul.bf16.vlgmr.msrb.gmra.mxu2 %v10239_v39  ;;  %v9101_v7 = vld [vmem:[%s14668_s2 + $0x2e4] sm:$0xf0]  ;;  %v9121_v12 = vld [vmem:[%s14668_s2 + $0x38c] sm:$0xf] }
  0x91   :  { %2662 = vmatpush.bf16.msra.mxu2 %v6993_v22  ;;  %2636 = vmatpush.bf16.msra.mxu3 %v6481_v23  ;;  %v6064_v8 = vld [vmem:[%s14668_s2 + $0x88] sm:$0xf]  ;;  %v6353_v14 = vor.u32 %v9101_v7, %v6352_v6  ;;  %v6485_v7 = vor.u32 %v9129_v61, %v6482_v63 }
  0x92   :  { %2651 = vmatpush.bf16.msrb.mxu0 %v6673_v41  ;;  %v9029_v10 = vld [vmem:[%s14668_s2 + $0xa4] sm:$0xf0] }
  0x93   :  { %2625 = vmatpush.bf16.msrb.mxu1 %v6161_v40  ;;  %v6832_v15 = vld [vmem:[%s14668_s2 + $0x688] sm:$0xf]  ;;  %v6065_v17 = vor.u32 %v9029_v10, %v6064_v8  ;;  %v9057_v10 = vld [vmem:[%s14668_s2 + $0x18c] sm:$0xf] }
  0x94   :  { %v9221_v16 = vld [vmem:[%s14668_s2 + $0x6a4] sm:$0xf0] }
  0x95   :  { %2663 = vmatpush.bf16.msra.mxu2 %v6961_v35  ;;  %2637 = vmatpush.bf16.msra.mxu3 %v6449_v36  ;;  %v6320_v19 = vld [vmem:[%s14668_s2 + $0x288] sm:$0xf]  ;;  %v6833_v25 = vor.u32 %v9221_v16, %v6832_v15 }
  0x96   :  { %2652 = vmatpush.bf16.msrb.mxu0 %v6641_v55  ;;  %v9093_v20 = vld [vmem:[%s14668_s2 + $0x2a4] sm:$0xf0] }
  0x97   :  { %2626 = vmatpush.bf16.msrb.mxu1 %v6129_v54  ;;  %v6032_v21 = vld [vmem:[%s14668_s2 + $0x48] sm:$0xf]  ;;  %v6321_v26 = vor.u32 %v9093_v20, %v6320_v19 }
  0x98   :  { %v9021_v22 = vld [vmem:[%s14668_s2 + $0x64] sm:$0xf0] }
  0x99   :  { %2664 = vmatpush.bf16.msra.mxu2 %v6929_v49  ;;  %2638 = vmatpush.bf16.msra.mxu3 %v6417_v50  ;;  %v6544_v23 = vld [vmem:[%s14668_s2 + $0x448] sm:$0xf]  ;;  %v6033_v30 = vor.u32 %v9021_v22, %v6032_v21  ;;  %v9049_v22 = vld [vmem:[%s14668_s2 + $0x14c] sm:$0xf] }
  0x9a   :  { %2653 = vmatpush.bf16.msrb.mxu0 %v6609_v5  ;;  %v9149_v24 = vld [vmem:[%s14668_s2 + $0x464] sm:$0xf0] }
  0x9b   :  { %2627 = vmatpush.bf16.msrb.mxu1 %v6097_v4  ;;  %v6288_v27 = vld [vmem:[%s14668_s2 + $0x248] sm:$0xf]  ;;  %v6545_v31 = vor.u32 %v9149_v24, %v6544_v23  ;;  %v6229_v4 = vor.u32 %v9065_v58, %v6226_v59  ;;  %v6162_v23 = vld [vmem:[%s14668_s2 + $0x168] sm:$0xf0] }
  0x9c   :  { %7559 = vmatmul.msk.bf16.vlgmr.msrb.gmra.mxu3 %vm2437_vm0, %v10140_v48  ;;  %v6800_v28 = vld [vmem:[%s14668_s2 + $0x648] sm:$0xf]  ;;  %v9113_v24 = vld [vmem:[%s14668_s2 + $0x34c] sm:$0xf] }
  0x9d   :  { %2665 = vmatpush.bf16.msra.mxu2 %v6897_v0  ;;  %2639 = vmatpush.bf16.msra.mxu3 %v6385_v1  ;;  %v9213_v29 = vld [vmem:[%s14668_s2 + $0x664] sm:$0xf0] }
  0x9e   :  { %2654 = vmatpush.bf16.msrb.mxu0 %v6577_v18  ;;  %v9085_v32 = vld [vmem:[%s14668_s2 + $0x264] sm:$0xf0]  ;;  %v6801_v40 = vor.u32 %v9213_v29, %v6800_v28  ;;  %v6165_v29 = vor.u32 %v9049_v22, %v6162_v23 }
  0x9f   :  { %2628 = vmatpush.bf16.msrb.mxu1 %v6065_v17  ;;  %v6000_v33 = vld [vmem:[%s14668_s2 + $0x8] sm:$0xf]  ;;  %v6289_v44 = vor.u32 %v9085_v32, %v6288_v27  ;;  %v6197_v17 = vor.u32 %v9057_v10, %v6194_v11 }
  0xa0   :  { %v9013_v35 = vld [vmem:[%s14668_s2 + $0x24] sm:$0xf0] }
  0xa1   :  { %2666 = vmatpush.bf16.msra.mxu2 %v6865_v13  ;;  %2640 = vmatpush.bf16.msra.mxu3 %v6353_v14  ;;  %v6512_v36 = vld [vmem:[%s14668_s2 + $0x408] sm:$0xf]  ;;  %v6001_v49 = vor.u32 %v9013_v35, %v6000_v33  ;;  %v6450_v13 = vld [vmem:[%s14668_s2 + $0x3a8] sm:$0xf0] }
  0xa2   :  { %v9141_v37 = vld [vmem:[%s14668_s2 + $0x424] sm:$0xf0]  ;;  %2655 = vmatpush.bf16.msrb.mxu0 %v6545_v31  ;;  %v6453_v20 = vor.u32 %v9121_v12, %v6450_v13  ;;  %v9041_v35 = vld [vmem:[%s14668_s2 + $0x10c] sm:$0xf] }
  0xa3   :  { %v7248_v38 = vld [vmem:[%s14668_s2 + $0x9c8] sm:$0xf]  ;;  %2629 = vmatpush.bf16.msrb.mxu1 %v6033_v30  ;;  %v6513_v50 = vor.u32 %v9141_v37, %v6512_v36  ;;  %v6130_v36 = vld [vmem:[%s14668_s2 + $0x128] sm:$0xf0] }
  0xa4   :  { %v9325_v41 = vld [vmem:[%s14668_s2 + $0x9e4] sm:$0xf0]  ;;  %v9105_v37 = vld [vmem:[%s14668_s2 + $0x30c] sm:$0xf] }
  0xa5   :  { %2667 = vmatpush.bf16.msra.mxu2 %v6833_v25  ;;  %v7536_v42 = vld [vmem:[%s14668_s2 + $0xc08] sm:$0xf]  ;;  %2641 = vmatpush.bf16.msra.mxu3 %v6321_v26  ;;  %v7249_v55 = vor.u32 %v9325_v41, %v7248_v38  ;;  %v6418_v25 = vld [vmem:[%s14668_s2 + $0x368] sm:$0xf0] }
  0xa6   :  { %v9397_v43 = vld [vmem:[%s14668_s2 + $0xc24] sm:$0xf0]  ;;  %2656 = vmatpush.bf16.msrb.mxu0 %v6513_v50  ;;  %v6421_v32 = vor.u32 %v9113_v24, %v6418_v25  ;;  %v6386_v38 = vld [vmem:[%s14668_s2 + $0x328] sm:$0xf0] }
  0xa7   :  { %v6256_v45 = vld [vmem:[%s14668_s2 + $0x208] sm:$0xf]  ;;  %v7537_v56 = vor.u32 %v9397_v43, %v7536_v42  ;;  %2630 = vmatpush.bf16.msrb.mxu1 %v6001_v49  ;;  %v6133_v43 = vor.u32 %v9041_v35, %v6130_v36  ;;  %v9033_v49 = vld [vmem:[%s14668_s2 + $0xcc] sm:$0xf] }
  0xa8   :  { %v6768_v46 = vld [vmem:[%s14668_s2 + $0x608] sm:$0xf]  ;;  %v6098_v50 = vld [vmem:[%s14668_s2 + $0xe8] sm:$0xf0] }
  0xa9   :  { %v9205_v47 = vld [vmem:[%s14668_s2 + $0x624] sm:$0xf0]  ;;  %2668 = vmatpush.bf16.msra.mxu2 %v6801_v40  ;;  %2642 = vmatpush.bf16.msra.mxu3 %v6289_v44  ;;  %v6101_v58 = vor.u32 %v9033_v49, %v6098_v50  ;;  %v9017_v13 = vld [vmem:[%s14668_s2 + $0x4c] sm:$0xf] }
  0xaa   :  { %v9077_v51 = vld [vmem:[%s14668_s2 + $0x224] sm:$0xf0]  ;;  %v6769_v62 = vor.u32 %v9205_v47, %v6768_v46  ;;  %2708 = vmatpush.bf16.msra.mxu0 %v7537_v56  ;;  %2631 = vmatmul.bf16.vlgmr.msrb.gmra.mxu1 %v10031_v57  ;;  %v6389_v46 = vor.u32 %v9105_v37, %v6386_v38  ;;  %v9321_v35 = vld [vmem:[%s14668_s2 + $0x9cc] sm:$0xf] }
  0xab   :  { %v7504_v52 = vld [vmem:[%s14668_s2 + $0xbc8] sm:$0xf]  ;;  %v6257_v2 = vor.u32 %v9077_v51, %v6256_v45  ;;  %2675 = vmatpush.bf16.msra.mxu1 %v7249_v55  ;;  %2657 = vmatmul.bf16.vlgmr.msrb.gmra.mxu0 %v10020_v53  ;;  %v9097_v51 = vld [vmem:[%s14668_s2 + $0x2cc] sm:$0xf] }
  0xac   :  { %v9389_v54 = vld [vmem:[%s14668_s2 + $0xbe4] sm:$0xf0]  ;;  %v7250_v36 = vld [vmem:[%s14668_s2 + $0x9e8] sm:$0xf0] }
  0xad   :  { %v7216_v0 = vld [vmem:[%s14668_s2 + $0x988] sm:$0xf]  ;;  %v7505_v3 = vor.u32 %v9389_v54, %v7504_v52  ;;  %2669 = vmatpush.bf16.msra.mxu2 %v6769_v62  ;;  %2643 = vmatpush.bf16.msra.mxu3 %v6257_v2  ;;  %v6354_v52 = vld [vmem:[%s14668_s2 + $0x2e8] sm:$0xf0] }
  0xae   :  { %v9317_v1 = vld [vmem:[%s14668_s2 + $0x9a4] sm:$0xf0]  ;;  %2727 = vmatpush.bf16.msrb.mxu0 %v6485_v7  ;;  %v6357_v62 = vor.u32 %v9097_v51, %v6354_v52  ;;  %v9089_v2 = vld [vmem:[%s14668_s2 + $0x28c] sm:$0xf] }
  0xaf   :  { %v7472_v5 = vld [vmem:[%s14668_s2 + $0xb88] sm:$0xf]  ;;  %v7217_v8 = vor.u32 %v9317_v1, %v7216_v0  ;;  %v9025_v0 = vld [vmem:[%s14668_s2 + $0x8c] sm:$0xf] }
  0xb0   :  { %v9381_v6 = vld [vmem:[%s14668_s2 + $0xba4] sm:$0xf0]  ;;  %2644 = vmatmul.bf16.vlgmr.msra.gmra.mxu3 %v10061_v9  ;;  %2670 = vmatmul.bf16.vlgmr.msra.gmra.mxu2 %v10033_v60  ;;  %v6066_v1 = vld [vmem:[%s14668_s2 + $0xa8] sm:$0xf0] }
  0xb1   :  { %v7184_v14 = vld [vmem:[%s14668_s2 + $0x948] sm:$0xf]  ;;  %2688 = vmatpush.bf16.msrb.mxu3 %v7505_v3  ;;  %2714 = vmatpush.bf16.msrb.mxu2 %v6229_v4  ;;  %v7473_v16 = vor.u32 %v9381_v6, %v7472_v5  ;;  %v6322_v3 = vld [vmem:[%s14668_s2 + $0x2a8] sm:$0xf0]  ;;  %v6069_v7 = vor.u32 %v9025_v0, %v6066_v1 }
  0xb2   :  { %v9309_v15 = vld [vmem:[%s14668_s2 + $0x964] sm:$0xf0]  ;;  %2676 = vmatpush.bf16.msra.mxu1 %v7217_v8  ;;  %2728 = vmatpush.bf16.msrb.mxu0 %v6453_v20  ;;  %v6325_v11 = vor.u32 %v9089_v2, %v6322_v3  ;;  %v6738_v20 = vld [vmem:[%s14668_s2 + $0x5e8] sm:$0xf0] }
  0xb3   :  { %v7440_v18 = vld [vmem:[%s14668_s2 + $0xb48] sm:$0xf]  ;;  %v7185_v21 = vor.u32 %v9309_v15, %v7184_v14  ;;  %v6034_v14 = vld [vmem:[%s14668_s2 + $0x68] sm:$0xf0] }
  0xb4   :  { %v9373_v19 = vld [vmem:[%s14668_s2 + $0xb64] sm:$0xf0]  ;;  %v9081_v15 = vld [vmem:[%s14668_s2 + $0x24c] sm:$0xf]  ;;  %v6037_v22 = vor.u32 %v9017_v13, %v6034_v14 }
  0xb5   :  { %v7152_v26 = vld [vmem:[%s14668_s2 + $0x908] sm:$0xf]  ;;  %2689 = vmatpush.bf16.msrb.mxu3 %v7473_v16  ;;  %2715 = vmatpush.bf16.msrb.mxu2 %v6197_v17  ;;  %v7441_v28 = vor.u32 %v9373_v19, %v7440_v18  ;;  %v6290_v16 = vld [vmem:[%s14668_s2 + $0x268] sm:$0xf0] }
  0xb6   :  { %v9301_v27 = vld [vmem:[%s14668_s2 + $0x924] sm:$0xf0]  ;;  %2677 = vmatpush.bf16.msra.mxu1 %v7185_v21  ;;  %2729 = vmatpush.bf16.msrb.mxu0 %v6421_v32  ;;  %v9193_v19 = vld [vmem:[%s14668_s2 + $0x5cc] sm:$0xf]  ;;  %v6293_v25 = vor.u32 %v9081_v15, %v6290_v16 }
  0xb7   :  { %v7408_v30 = vld [vmem:[%s14668_s2 + $0xb08] sm:$0xf]  ;;  %v7153_v33 = vor.u32 %v9301_v27, %v7152_v26  ;;  %v9009_v27 = vld [vmem:[%s14668_s2 + $0xc] sm:$0xf] }
  0xb8   :  { %v9365_v31 = vld [vmem:[%s14668_s2 + $0xb24] sm:$0xf0]  ;;  %v9257_v32 = vld [vmem:[%s14668_s2 + $0x7cc] sm:$0xf] }
  0xb9   :  { %v7120_v40 = vld [vmem:[%s14668_s2 + $0x8c8] sm:$0xf]  ;;  %2690 = vmatpush.bf16.msrb.mxu3 %v7441_v28  ;;  %2716 = vmatpush.bf16.msrb.mxu2 %v6165_v29  ;;  %v7409_v42 = vor.u32 %v9365_v31, %v7408_v30  ;;  %v6002_v28 = vld [vmem:[%s14668_s2 + $0x28] sm:$0xf0]  ;;  %v6741_v30 = vor.u32 %v9193_v19, %v6738_v20 }
  0xba   :  { %v9293_v41 = vld [vmem:[%s14668_s2 + $0x8e4] sm:$0xf0]  ;;  %2678 = vmatpush.bf16.msra.mxu1 %v7153_v33  ;;  %2730 = vmatpush.bf16.msrb.mxu0 %v6389_v46  ;;  %v9073_v29 = vld [vmem:[%s14668_s2 + $0x20c] sm:$0xf]  ;;  %v7253_v46 = vor.u32 %v9321_v35, %v7250_v36 }
  0xbb   :  { %v7376_v44 = vld [vmem:[%s14668_s2 + $0xac8] sm:$0xf]  ;;  %v7121_v47 = vor.u32 %v9293_v41, %v7120_v40  ;;  %7560 = vmatmul.msk.bf16.vlgmr.msra.gmra.mxu0 %vm2437_vm0, %v10140_v48  ;;  %v6258_v31 = vld [vmem:[%s14668_s2 + $0x228] sm:$0xf0] }
  0xbc   :  { %v9357_v45 = vld [vmem:[%s14668_s2 + $0xae4] sm:$0xf0]  ;;  %v6994_v33 = vld [vmem:[%s14668_s2 + $0x7e8] sm:$0xf0] }
  0xbd   :  { %v7088_v54 = vld [vmem:[%s14668_s2 + $0x888] sm:$0xf]  ;;  %2691 = vmatpush.bf16.msrb.mxu3 %v7409_v42  ;;  %2717 = vmatpush.bf16.msrb.mxu2 %v6133_v43  ;;  %v7377_v56 = vor.u32 %v9357_v45, %v7376_v44  ;;  %v9385_v37 = vld [vmem:[%s14668_s2 + $0xbcc] sm:$0xf]  ;;  %v6005_v43 = vor.u32 %v9009_v27, %v6002_v28  ;;  %v6261_v44 = vor.u32 %v9073_v29, %v6258_v31 }
  0xbe   :  { %v9285_v55 = vld [vmem:[%s14668_s2 + $0x8a4] sm:$0xf0]  ;;  %2679 = vmatpush.bf16.msra.mxu1 %v7121_v47  ;;  %2731 = vmatpush.bf16.msrb.mxu0 %v6357_v62  ;;  %v7506_v40 = vld [vmem:[%s14668_s2 + $0xbe8] sm:$0xf0]  ;;  %v6997_v45 = vor.u32 %v9257_v32, %v6994_v33 }
  0xbf   :  { %v7344_v59 = vld [vmem:[%s14668_s2 + $0xa88] sm:$0xf]  ;;  %v7089_v63 = vor.u32 %v9285_v55, %v7088_v54  ;;  %v9185_v41 = vld [vmem:[%s14668_s2 + $0x58c] sm:$0xf]  ;;  %v7509_v50 = vor.u32 %v9385_v37, %v7506_v40 }
  0xc0   :  { %v9349_v61 = vld [vmem:[%s14668_s2 + $0xaa4] sm:$0xf0]  ;;  %v6706_v42 = vld [vmem:[%s14668_s2 + $0x5a8] sm:$0xf0] }
  0xc1   :  { %v7056_v4 = vld [vmem:[%s14668_s2 + $0x848] sm:$0xf]  ;;  %2692 = vmatpush.bf16.msrb.mxu3 %v7377_v56  ;;  %2718 = vmatpush.bf16.msrb.mxu2 %v6101_v58  ;;  %v7345_v6 = vor.u32 %v9349_v61, %v7344_v59  ;;  %v9249_v47 = vld [vmem:[%s14668_s2 + $0x78c] sm:$0xf]  ;;  %v6709_v51 = vor.u32 %v9185_v41, %v6706_v42  ;;  %v10867_v61 = vld [vmem:[%s14670_s3] sm:$0xff] }
  0xc2   :  { %v9277_v5 = vld [vmem:[%s14668_s2 + $0x864] sm:$0xf0]  ;;  %2680 = vmatpush.bf16.msra.mxu1 %v7089_v63  ;;  %2732 = vmatpush.bf16.msrb.mxu0 %v6325_v11  ;;  %v6962_v49 = vld [vmem:[%s14668_s2 + $0x7a8] sm:$0xf0]  ;;  %v437_v11 = vperm.slane %v10867_v61, 0 }
  0xc3   :  { %v7312_v8 = vld [vmem:[%s14668_s2 + $0xa48] sm:$0xf]  ;;  %v7057_v12 = vor.u32 %v9277_v5, %v7056_v4  ;;  %v9313_v52 = vld [vmem:[%s14668_s2 + $0x98c] sm:$0xf]  ;;  %v6965_v62 = vor.u32 %v9249_v47, %v6962_v49 }
  0xc4   :  { %v9341_v10 = vld [vmem:[%s14668_s2 + $0xa64] sm:$0xf0]  ;;  %v7218_v54 = vld [vmem:[%s14668_s2 + $0x9a8] sm:$0xf0] }
  0xc5   :  { %v7024_v17 = vld [vmem:[%s14668_s2 + $0x808] sm:$0xf]  ;;  %2693 = vmatpush.bf16.msrb.mxu3 %v7345_v6  ;;  %2719 = vmatpush.bf16.msrb.mxu2 %v6069_v7  ;;  %v7313_v21 = vor.u32 %v9341_v10, %v7312_v8  ;;  %v9377_v55 = vld [vmem:[%s14668_s2 + $0xb8c] sm:$0xf]  ;;  %v7221_v63 = vor.u32 %v9313_v52, %v7218_v54 }
  0xc6   :  { %v9269_v18 = vld [vmem:[%s14668_s2 + $0x824] sm:$0xf0]  ;;  %2681 = vmatpush.bf16.msra.mxu1 %v7057_v12  ;;  %2733 = vmatpush.bf16.msrb.mxu0 %v6293_v25  ;;  %v7474_v56 = vld [vmem:[%s14668_s2 + $0xba8] sm:$0xf0] }
  0xc7   :  { %v7280_v23 = vld [vmem:[%s14668_s2 + $0xa08] sm:$0xf]  ;;  %v7025_v26 = vor.u32 %v9269_v18, %v7024_v17  ;;  %v9177_v58 = vld [vmem:[%s14668_s2 + $0x54c] sm:$0xf]  ;;  %v7477_v3 = vor.u32 %v9377_v55, %v7474_v56  ;;  %v2476_v42 = vpop.f32.mrf.mxu2 }
  0xc8   :  { %v9333_v24 = vld [vmem:[%s14668_s2 + $0xa24] sm:$0xf0]  ;;  %v6674_v59 = vld [vmem:[%s14668_s2 + $0x568] sm:$0xf0]  ;;  %v2463_v32 = vpop.f32.mrf.mxu1 }
  0xc9   :  { %2694 = vmatpush.bf16.msrb.mxu3 %v7313_v21  ;;  %2720 = vmatpush.bf16.msrb.mxu2 %v6037_v22  ;;  %v7281_v38 = vor.u32 %v9333_v24, %v7280_v23  ;;  %v9241_v0 = vld [vmem:[%s14668_s2 + $0x74c] sm:$0xf]  ;;  %v6677_v4 = vor.u32 %v9177_v58, %v6674_v59  ;;  %v2450_v21 = vpop.f32.mrf.mxu0 }
  0xca   :  { %2682 = vmatpush.bf16.msra.mxu1 %v7025_v26  ;;  %2734 = vmatpush.bf16.msrb.mxu0 %v6261_v44  ;;  %v6930_v1 = vld [vmem:[%s14668_s2 + $0x768] sm:$0xf0]  ;;  %v2451_v25 = vadd.f32 %v2450_v21, %v437_v11 }
  0xcb   :  { %v9305_v2 = vld [vmem:[%s14668_s2 + $0x94c] sm:$0xf]  ;;  %v6933_v12 = vor.u32 %v9241_v0, %v6930_v1 }
  0xcc   :  { %v7186_v5 = vld [vmem:[%s14668_s2 + $0x968] sm:$0xf0]  ;;  %v2464_v37 = vadd.f32 %v2463_v32, %v2451_v25  ;;  %v9134_v32 = vld [vmem:[%s14668_s2 + $0x3ec] sm:$0xf0] }
  0xcd   :  { %2683 = vmatmul.bf16.vlgmr.msra.gmra.mxu1 %v10228_v34  ;;  %2695 = vmatpush.bf16.msrb.mxu3 %v7281_v38  ;;  %v9369_v6 = vld [vmem:[%s14668_s2 + $0xb4c] sm:$0xf]  ;;  %v7189_v13 = vor.u32 %v9305_v2, %v7186_v5 }
  0xce   :  { %2740 = vmatpush.bf16.msrb.mxu1 %v6741_v30  ;;  %2721 = vmatpush.bf16.msrb.mxu2 %v6005_v43  ;;  %v7442_v7 = vld [vmem:[%s14668_s2 + $0xb68] sm:$0xf0] }
  0xcf   :  { %2779 = vmatpush.bf16.msra.mxu0 %v7509_v50  ;;  %v9169_v8 = vld [vmem:[%s14668_s2 + $0x50c] sm:$0xf]  ;;  %v7445_v16 = vor.u32 %v9369_v6, %v7442_v7 }
  0xd0   :  { %2696 = vmatmul.bf16.vlgmr.msrb.gmra.mxu3 %v10239_v39  ;;  %v6642_v10 = vld [vmem:[%s14668_s2 + $0x528] sm:$0xf0]  ;;  %2735 = vmatmul.bf16.vlgmr.msrb.gmra.mxu0 %v10061_v9 }
  0xd1   :  { %2753 = vmatpush.bf16.msra.mxu3 %v6997_v45  ;;  %2722 = vmatmul.bf16.vlgmr.msrb.gmra.mxu2 %v10031_v57  ;;  %v9233_v14 = vld [vmem:[%s14668_s2 + $0x70c] sm:$0xf]  ;;  %v6645_v17 = vor.u32 %v9169_v8, %v6642_v10  ;;  %v2477_v45 = vadd.f32 %v2476_v42, %v2464_v37  ;;  %v2452_v56 = vpop.f32.mrf.mxu0  ;;  %v2465_v10 = vpop.f32.mrf.mxu1  ;;  %v7000_v37 = vld [vmem:[%s14668_s2 + $0x7d0] sm:$0xf] }
  0xd2   :  { %2766 = vmatpush.bf16.msra.mxu2 %v7253_v46  ;;  %2741 = vmatpush.bf16.msrb.mxu1 %v6709_v51  ;;  %v6898_v15 = vld [vmem:[%s14668_s2 + $0x728] sm:$0xf0]  ;;  %v2489_v46 = vpop.f32.mrf.mxu3  ;;  %v9254_v56 = vld [vmem:[%s14668_s2 + $0x7ac] sm:$0xf0] }
  0xd3   :  { %2780 = vmatpush.bf16.msra.mxu0 %v7477_v3  ;;  %v9297_v18 = vld [vmem:[%s14668_s2 + $0x90c] sm:$0xf]  ;;  %v6901_v26 = vor.u32 %v9233_v14, %v6898_v15  ;;  %v10960_v58 = vadd.f32 %v2489_v46, %v2477_v45  ;;  %v2478_v14 = vpop.f32.mrf.mxu2  ;;  %v9062_v45 = vld [vmem:[%s14668_s2 + $0x1ac] sm:$0xf0] }
  0xd4   :  { %v7154_v19 = vld [vmem:[%s14668_s2 + $0x928] sm:$0xf0]  ;;  %v9046_v14 = vld [vmem:[%s14668_s2 + $0x12c] sm:$0xf0] }
  0xd5   :  { %2754 = vmatpush.bf16.msra.mxu3 %v6965_v62  ;;  %v9361_v20 = vld [vmem:[%s14668_s2 + $0xb0c] sm:$0xf]  ;;  %v7157_v27 = vor.u32 %v9297_v18, %v7154_v19 }
  0xd6   :  { %2767 = vmatpush.bf16.msra.mxu2 %v7221_v63  ;;  %2742 = vmatpush.bf16.msrb.mxu1 %v6677_v4  ;;  %v7410_v22 = vld [vmem:[%s14668_s2 + $0xb28] sm:$0xf0] }
  0xd7   :  { %v9161_v23 = vld [vmem:[%s14668_s2 + $0x4cc] sm:$0xf]  ;;  %2781 = vmatpush.bf16.msra.mxu0 %v7445_v16  ;;  %v7413_v30 = vor.u32 %v9361_v20, %v7410_v22 }
  0xd8   :  { %v6610_v24 = vld [vmem:[%s14668_s2 + $0x4e8] sm:$0xf0] }
  0xd9   :  { %2755 = vmatpush.bf16.msra.mxu3 %v6933_v12  ;;  %v9225_v28 = vld [vmem:[%s14668_s2 + $0x6cc] sm:$0xf]  ;;  %v6613_v31 = vor.u32 %v9161_v23, %v6610_v24 }
  0xda   :  { %2768 = vmatpush.bf16.msra.mxu2 %v7189_v13  ;;  %v6866_v29 = vld [vmem:[%s14668_s2 + $0x6e8] sm:$0xf0]  ;;  %2743 = vmatpush.bf16.msrb.mxu1 %v6645_v17  ;;  %v2491_v21 = vpop.f32.mrf.mxu3 }
  0xdb   :  { %v9289_v33 = vld [vmem:[%s14668_s2 + $0x8cc] sm:$0xf]  ;;  %v6869_v43 = vor.u32 %v9225_v28, %v6866_v29  ;;  %2782 = vmatpush.bf16.msra.mxu0 %v7413_v30  ;;  %v6232_v29 = vld [vmem:[%s14668_s2 + $0x1d0] sm:$0xf] }
  0xdc   :  { %v7122_v35 = vld [vmem:[%s14668_s2 + $0x8e8] sm:$0xf0]  ;;  %v9070_v30 = vld [vmem:[%s14668_s2 + $0x1ec] sm:$0xf0] }
  0xdd   :  { %v9353_v36 = vld [vmem:[%s14668_s2 + $0xacc] sm:$0xf]  ;;  %2756 = vmatpush.bf16.msra.mxu3 %v6901_v26  ;;  %v7125_v44 = vor.u32 %v9289_v33, %v7122_v35  ;;  %v6744_v33 = vld [vmem:[%s14668_s2 + $0x5d0] sm:$0xf]  ;;  %v6233_v42 = vor.u32 %v9070_v30, %v6232_v29 }
  0xde   :  { %v7378_v38 = vld [vmem:[%s14668_s2 + $0xae8] sm:$0xf0]  ;;  %2769 = vmatpush.bf16.msra.mxu2 %v7157_v27  ;;  %2744 = vmatpush.bf16.msrb.mxu1 %v6613_v31  ;;  %v6488_v31 = vld [vmem:[%s14668_s2 + $0x3d0] sm:$0xf] }
  0xdf   :  { %v9153_v40 = vld [vmem:[%s14668_s2 + $0x48c] sm:$0xf]  ;;  %v7381_v50 = vor.u32 %v9353_v36, %v7378_v38  ;;  %v9198_v36 = vld [vmem:[%s14668_s2 + $0x5ec] sm:$0xf0] }
  0xe0   :  { %v6578_v41 = vld [vmem:[%s14668_s2 + $0x4a8] sm:$0xf0]  ;;  %v9262_v38 = vld [vmem:[%s14668_s2 + $0x7ec] sm:$0xf0]  ;;  %v6745_v46 = vor.u32 %v9198_v36, %v6744_v33 }
  0xe1   :  { %v9217_v47 = vld [vmem:[%s14668_s2 + $0x68c] sm:$0xf]  ;;  %v6581_v51 = vor.u32 %v9153_v40, %v6578_v41  ;;  %2757 = vmatpush.bf16.msra.mxu3 %v6869_v43  ;;  %2783 = vmatpush.bf16.msra.mxu0 %v7381_v50  ;;  %v6489_v43 = vor.u32 %v9134_v32, %v6488_v31  ;;  %v9126_v50 = vld [vmem:[%s14668_s2 + $0x3ac] sm:$0xf0] }
  0xe2   :  { %v6834_v49 = vld [vmem:[%s14668_s2 + $0x6a8] sm:$0xf0]  ;;  %2770 = vmatpush.bf16.msra.mxu2 %v7125_v44  ;;  %v6200_v44 = vld [vmem:[%s14668_s2 + $0x190] sm:$0xf] }
  0xe3   :  { %v9281_v52 = vld [vmem:[%s14668_s2 + $0x88c] sm:$0xf]  ;;  %v6837_v0 = vor.u32 %v9217_v47, %v6834_v49  ;;  %2745 = vmatpush.bf16.msrb.mxu1 %v6581_v51  ;;  %v7001_v47 = vor.u32 %v9262_v38, %v7000_v37  ;;  %v6456_v49 = vld [vmem:[%s14668_s2 + $0x390] sm:$0xf]  ;;  %v438_v37 = vperm.slane %v10867_v61, 1 }
  0xe4   :  { %v7090_v54 = vld [vmem:[%s14668_s2 + $0x8a8] sm:$0xf0]  ;;  %v6712_v51 = vld [vmem:[%s14668_s2 + $0x590] sm:$0xf]  ;;  %v2502_v10 = vpop.f32.mrf.mxu0 }
  0xe5   :  { %v9345_v55 = vld [vmem:[%s14668_s2 + $0xa8c] sm:$0xf]  ;;  %v7093_v1 = vor.u32 %v9281_v52, %v7090_v54  ;;  %2758 = vmatpush.bf16.msra.mxu3 %v6837_v0  ;;  %v2528_v52 = vpop.f32.mrf.mxu2  ;;  %v9190_v54 = vld [vmem:[%s14668_s2 + $0x5ac] sm:$0xf0] }
  0xe6   :  { %v7346_v59 = vld [vmem:[%s14668_s2 + $0xaa8] sm:$0xf0]  ;;  %v9054_v0 = vld [vmem:[%s14668_s2 + $0x16c] sm:$0xf0] }
  0xe7   :  { %v9145_v62 = vld [vmem:[%s14668_s2 + $0x44c] sm:$0xf]  ;;  %v7349_v4 = vor.u32 %v9345_v55, %v7346_v59  ;;  %2771 = vmatpush.bf16.msra.mxu2 %v7093_v1  ;;  %v6968_v55 = vld [vmem:[%s14668_s2 + $0x790] sm:$0xf]  ;;  %v6201_v59 = vor.u32 %v9062_v45, %v6200_v44  ;;  %v6713_v1 = vor.u32 %v9190_v54, %v6712_v51 }
  0xe8   :  { %v6546_v63 = vld [vmem:[%s14668_s2 + $0x468] sm:$0xf0]  ;;  %v6648_v21 = vld [vmem:[%s14668_s2 + $0x510] sm:$0xf] }
  0xe9   :  { %v9209_v2 = vld [vmem:[%s14668_s2 + $0x64c] sm:$0xf]  ;;  %v6549_v5 = vor.u32 %v9145_v62, %v6546_v63  ;;  %2784 = vmatpush.bf16.msra.mxu0 %v7349_v4  ;;  %v6457_v62 = vor.u32 %v9126_v50, %v6456_v49  ;;  %v6168_v63 = vld [vmem:[%s14668_s2 + $0x150] sm:$0xf] }
  0xea   :  { %v6802_v3 = vld [vmem:[%s14668_s2 + $0x668] sm:$0xf0]  ;;  %v9118_v4 = vld [vmem:[%s14668_s2 + $0x36c] sm:$0xf0] }
  0xeb   :  { %v9273_v6 = vld [vmem:[%s14668_s2 + $0x84c] sm:$0xf]  ;;  %v6805_v17 = vor.u32 %v9209_v2, %v6802_v3  ;;  %2746 = vmatpush.bf16.msrb.mxu1 %v6549_v5  ;;  %v6969_v2 = vor.u32 %v9254_v56, %v6968_v55  ;;  %v6424_v3 = vld [vmem:[%s14668_s2 + $0x350] sm:$0xf] }
  0xec   :  { %v7058_v7 = vld [vmem:[%s14668_s2 + $0x868] sm:$0xf0]  ;;  %v6680_v5 = vld [vmem:[%s14668_s2 + $0x550] sm:$0xf] }
  0xed   :  { %v9337_v8 = vld [vmem:[%s14668_s2 + $0xa4c] sm:$0xf]  ;;  %v7061_v18 = vor.u32 %v9273_v6, %v7058_v7  ;;  %2759 = vmatpush.bf16.msra.mxu3 %v6805_v17  ;;  %v9182_v6 = vld [vmem:[%s14668_s2 + $0x56c] sm:$0xf0] }
  0xee   :  { %v7314_v11 = vld [vmem:[%s14668_s2 + $0xa68] sm:$0xf0]  ;;  %v6936_v7 = vld [vmem:[%s14668_s2 + $0x750] sm:$0xf] }
  0xef   :  { %v9137_v12 = vld [vmem:[%s14668_s2 + $0x40c] sm:$0xf]  ;;  %v7317_v22 = vor.u32 %v9337_v8, %v7314_v11  ;;  %2772 = vmatpush.bf16.msra.mxu2 %v7061_v18  ;;  %v9246_v8 = vld [vmem:[%s14668_s2 + $0x76c] sm:$0xf0]  ;;  %v6169_v11 = vor.u32 %v9054_v0, %v6168_v63  ;;  %v2515_v18 = vpop.f32.mrf.mxu1 }
  0xf0   :  { %v6514_v13 = vld [vmem:[%s14668_s2 + $0x428] sm:$0xf0]  ;;  %v6937_v17 = vor.u32 %v9246_v8, %v6936_v7  ;;  %v9038_v29 = vld [vmem:[%s14668_s2 + $0xec] sm:$0xf0] }
  0xf1   :  { %v9393_v15 = vld [vmem:[%s14668_s2 + $0xc0c] sm:$0xf]  ;;  %v6517_v23 = vor.u32 %v9137_v12, %v6514_v13  ;;  %2785 = vmatpush.bf16.msra.mxu0 %v7317_v22  ;;  %v6425_v12 = vor.u32 %v9118_v4, %v6424_v3  ;;  %v6136_v13 = vld [vmem:[%s14668_s2 + $0x110] sm:$0xf]  ;;  %v2530_v22 = vpop.f32.mrf.mxu2 }
  0xf2   :  { %v7538_v16 = vld [vmem:[%s14668_s2 + $0xc28] sm:$0xf0]  ;;  %v6360_v30 = vld [vmem:[%s14668_s2 + $0x2d0] sm:$0xf] }
  0xf3   :  { %v9201_v19 = vld [vmem:[%s14668_s2 + $0x60c] sm:$0xf]  ;;  %v7541_v28 = vor.u32 %v9393_v15, %v7538_v16  ;;  %2747 = vmatpush.bf16.msrb.mxu1 %v6517_v23  ;;  %v2503_v15 = vadd.f32 %v2502_v10, %v10960_v58  ;;  %v6681_v16 = vor.u32 %v9182_v6, %v6680_v5  ;;  %v9174_v58 = vld [vmem:[%s14668_s2 + $0x52c] sm:$0xf0] }
  0xf4   :  { %v6770_v20 = vld [vmem:[%s14668_s2 + $0x628] sm:$0xf0]  ;;  %v6904_v23 = vld [vmem:[%s14668_s2 + $0x710] sm:$0xf]  ;;  %v6649_v32 = vor.u32 %v9174_v58, %v6648_v21 }
  0xf5   :  { %v9265_v24 = vld [vmem:[%s14668_s2 + $0x80c] sm:$0xf]  ;;  %v6773_v35 = vor.u32 %v9201_v19, %v6770_v20  ;;  %v6392_v19 = vld [vmem:[%s14668_s2 + $0x310] sm:$0xf] }
  0xf6   :  { %v7026_v25 = vld [vmem:[%s14668_s2 + $0x828] sm:$0xf0]  ;;  %2748 = vmatmul.bf16.vlgmr.msrb.gmra.mxu1 %v10020_v53  ;;  %v9110_v20 = vld [vmem:[%s14668_s2 + $0x32c] sm:$0xf0] }
  0xf7   :  { %v9329_v26 = vld [vmem:[%s14668_s2 + $0xa0c] sm:$0xf]  ;;  %v7029_v40 = vor.u32 %v9265_v24, %v7026_v25  ;;  %2799 = vmatpush.bf16.msra.mxu1 %v7541_v28  ;;  %2760 = vmatpush.bf16.msra.mxu3 %v6773_v35  ;;  %v9238_v24 = vld [vmem:[%s14668_s2 + $0x72c] sm:$0xf0]  ;;  %v2516_v25 = vadd.f32 %v2515_v18, %v2503_v15  ;;  %v2517_v56 = vpop.f32.mrf.mxu1 }
  0xf8   :  { %v7282_v27 = vld [vmem:[%s14668_s2 + $0xa28] sm:$0xf0]  ;;  %v6104_v28 = vld [vmem:[%s14668_s2 + $0xd0] sm:$0xf]  ;;  %v6905_v33 = vor.u32 %v9238_v24, %v6904_v23 }
  0xf9   :  { %v7285_v41 = vor.u32 %v9329_v26, %v7282_v27  ;;  %2773 = vmatpush.bf16.msra.mxu2 %v7029_v40  ;;  %v6137_v26 = vor.u32 %v9046_v14, %v6136_v13  ;;  %v6393_v27 = vor.u32 %v9110_v20, %v6392_v19  ;;  %v11129_v31 = vadd.f32 %v2528_v52, %v2516_v25  ;;  %v9102_v35 = vld [vmem:[%s14668_s2 + $0x2ec] sm:$0xf0]  ;;  %v2554_v0 = vpop.f32.mrf.mxu2 }
  0xfa   :  { %2761 = vmatmul.bf16.vlgmr.msra.gmra.mxu3 %v10033_v60  ;;  %v6616_v36 = vld [vmem:[%s14668_s2 + $0x4d0] sm:$0xf] }
  0xfb   :  { %2786 = vmatpush.bf16.msra.mxu0 %v7285_v41  ;;  %2805 = vmatpush.bf16.msrb.mxu3 %v6233_v42  ;;  %v9166_v38 = vld [vmem:[%s14668_s2 + $0x4ec] sm:$0xf0]  ;;  %v6105_v42 = vor.u32 %v9038_v29, %v6104_v28  ;;  %vm3169_vm1 = vcmp.ge.f32.partialorder %v11129_v31, 0.0 }
  0xfc   :  { %2818 = vmatpush.bf16.msrb.mxu1 %v6489_v43  ;;  %2774 = vmatmul.bf16.vlgmr.msra.gmra.mxu2 %v10228_v34  ;;  %v6872_v40 = vld [vmem:[%s14668_s2 + $0x6d0] sm:$0xf]  ;;  %v6361_v43 = vor.u32 %v9102_v35, %v6360_v30  ;;  %v6617_v49 = vor.u32 %v9166_v38, %v6616_v36  ;;  %v9066_v36 = vld [vmem:[%s14668_s2 + $0x1d4] sm:$0xf] }
  0xfd   :  { %2831 = vmatpush.bf16.msrb.mxu2 %v6745_v46  ;;  %v9230_v41 = vld [vmem:[%s14668_s2 + $0x6ec] sm:$0xf0]  ;;  %v2541_v46 = vpop.f32.mrf.mxu3 }
  0xfe   :  { %2787 = vmatmul.bf16.vlgmr.msra.gmra.mxu0 %v10239_v39  ;;  %v6072_v44 = vld [vmem:[%s14668_s2 + $0x90] sm:$0xf]  ;;  %v6873_v50 = vor.u32 %v9230_v41, %v6872_v40  ;;  %v2542_v55 = vadd.f32 %v2541_v46, %v438_v37  ;;  %v6234_v37 = vld [vmem:[%s14668_s2 + $0x1f0] sm:$0xf0] }
  0xff   :  { %2844 = vmatpush.bf16.msrb.mxu0 %v7001_v47  ;;  %2806 = vmatpush.bf16.msrb.mxu3 %v6201_v59  ;;  %v9030_v45 = vld [vmem:[%s14668_s2 + $0xac] sm:$0xf0]  ;;  %v2504_v47 = vpop.f32.mrf.mxu0  ;;  %v6490_v46 = vld [vmem:[%s14668_s2 + $0x3f0] sm:$0xf0] }
 0x100   :  { %2819 = vmatpush.bf16.msrb.mxu1 %v6457_v62  ;;  %v6328_v51 = vld [vmem:[%s14668_s2 + $0x290] sm:$0xf]  ;;  %v6237_v47 = vor.u32 %v9066_v36, %v6234_v37  ;;  %v9034_v37 = vld [vmem:[%s14668_s2 + $0xd4] sm:$0xf] }
 0x101   :  { %2832 = vmatpush.bf16.msrb.mxu2 %v6713_v1  ;;  %v9094_v52 = vld [vmem:[%s14668_s2 + $0x2ac] sm:$0xf0]  ;;  %v11173_v1 = vadd.f32 %v2554_v0, %v2542_v55  ;;  %v2556_v28 = vpop.f32.mrf.mxu2  ;;  %v6202_v55 = vld [vmem:[%s14668_s2 + $0x1b0] sm:$0xf0] }
 0x102   :  { %v6584_v54 = vld [vmem:[%s14668_s2 + $0x490] sm:$0xf]  ;;  %v6329_v3 = vor.u32 %v9094_v52, %v6328_v51  ;;  %v6458_v0 = vld [vmem:[%s14668_s2 + $0x3b0] sm:$0xf0] }
 0x103   :  { %2845 = vmatpush.bf16.msrb.mxu0 %v6969_v2  ;;  %2807 = vmatpush.bf16.msrb.mxu3 %v6169_v11  ;;  %v9158_v59 = vld [vmem:[%s14668_s2 + $0x4ac] sm:$0xf0]  ;;  %v6073_v2 = vor.u32 %v9030_v45, %v6072_v44  ;;  %v9130_v45 = vld [vmem:[%s14668_s2 + $0x3d4] sm:$0xf] }
 0x104   :  { %2820 = vmatpush.bf16.msrb.mxu1 %v6425_v12  ;;  %v6840_v62 = vld [vmem:[%s14668_s2 + $0x690] sm:$0xf]  ;;  %v6585_v6 = vor.u32 %v9158_v59, %v6584_v54  ;;  %v9058_v54 = vld [vmem:[%s14668_s2 + $0x194] sm:$0xf]  ;;  %v6493_v59 = vor.u32 %v9130_v45, %v6490_v46 }
 0x105   :  { %2833 = vmatpush.bf16.msrb.mxu2 %v6681_v16  ;;  %v9222_v63 = vld [vmem:[%s14668_s2 + $0x6ac] sm:$0xf0]  ;;  %v2543_v20 = vpop.f32.mrf.mxu3  ;;  %v6394_v28 = vld [vmem:[%s14668_s2 + $0x330] sm:$0xf0] }
 0x106   :  { %7561 = vmatmul.msk.bf16.vlgmr.msra.gmra.mxu1 %vm2437_vm0, %v10140_v48  ;;  %v6040_v4 = vld [vmem:[%s14668_s2 + $0x50] sm:$0xf]  ;;  %v6841_v7 = vor.u32 %v9222_v63, %v6840_v62  ;;  %v9122_v63 = vld [vmem:[%s14668_s2 + $0x394] sm:$0xf] }
 0x107   :  { %2846 = vmatpush.bf16.msrb.mxu0 %v6937_v17  ;;  %2808 = vmatpush.bf16.msrb.mxu3 %v6137_v26  ;;  %v9022_v5 = vld [vmem:[%s14668_s2 + $0x6c] sm:$0xf0]  ;;  %v6362_v45 = vld [vmem:[%s14668_s2 + $0x2f0] sm:$0xf0] }
 0x108   :  { %2821 = vmatpush.bf16.msrb.mxu1 %v6393_v27  ;;  %v6296_v8 = vld [vmem:[%s14668_s2 + $0x250] sm:$0xf]  ;;  %v6041_v15 = vor.u32 %v9022_v5, %v6040_v4 }
 0x109   :  { %2834 = vmatpush.bf16.msrb.mxu2 %v6649_v32  ;;  %v9086_v10 = vld [vmem:[%s14668_s2 + $0x26c] sm:$0xf0] }
 0x10a   :  { %v6552_v11 = vld [vmem:[%s14668_s2 + $0x450] sm:$0xf]  ;;  %v6297_v16 = vor.u32 %v9086_v10, %v6296_v8  ;;  %v9050_v8 = vld [vmem:[%s14668_s2 + $0x154] sm:$0xf] }
 0x10b   :  { %2847 = vmatpush.bf16.msrb.mxu0 %v6905_v33  ;;  %2809 = vmatpush.bf16.msrb.mxu3 %v6105_v42  ;;  %v9150_v12 = vld [vmem:[%s14668_s2 + $0x46c] sm:$0xf0]  ;;  %v6170_v10 = vld [vmem:[%s14668_s2 + $0x170] sm:$0xf0] }
 0x10c   :  { %2822 = vmatpush.bf16.msrb.mxu1 %v6361_v43  ;;  %v6808_v13 = vld [vmem:[%s14668_s2 + $0x650] sm:$0xf]  ;;  %v6553_v21 = vor.u32 %v9150_v12, %v6552_v11  ;;  %v6461_v11 = vor.u32 %v9122_v63, %v6458_v0  ;;  %v2567_v12 = vpop.f32.mrf.mxu0 }
 0x10d   :  { %2835 = vmatpush.bf16.msrb.mxu2 %v6617_v49  ;;  %v9214_v14 = vld [vmem:[%s14668_s2 + $0x66c] sm:$0xf0] }
 0x10e   :  { %v6008_v17 = vld [vmem:[%s14668_s2 + $0x10] sm:$0xf]  ;;  %v6809_v22 = vor.u32 %v9214_v14, %v6808_v13  ;;  %v9114_v14 = vld [vmem:[%s14668_s2 + $0x354] sm:$0xf] }
 0x10f   :  { %2848 = vmatpush.bf16.msrb.mxu0 %v6873_v50  ;;  %2810 = vmatpush.bf16.msrb.mxu3 %v6073_v2  ;;  %v9014_v18 = vld [vmem:[%s14668_s2 + $0x2c] sm:$0xf0] }
 0x110   :  { %2823 = vmatpush.bf16.msrb.mxu1 %v6329_v3  ;;  %v6264_v19 = vld [vmem:[%s14668_s2 + $0x210] sm:$0xf]  ;;  %v6009_v33 = vor.u32 %v9014_v18, %v6008_v17  ;;  %v6205_v3 = vor.u32 %v9058_v54, %v6202_v55  ;;  %v6173_v18 = vor.u32 %v9050_v8, %v6170_v10 }
 0x111   :  { %2836 = vmatpush.bf16.msrb.mxu2 %v6585_v6  ;;  %v9078_v58 = vld [vmem:[%s14668_s2 + $0x22c] sm:$0xf0] }
 0x112   :  { %v6520_v23 = vld [vmem:[%s14668_s2 + $0x410] sm:$0xf]  ;;  %v6265_v35 = vor.u32 %v9078_v58, %v6264_v19 }
 0x113   :  { %2849 = vmatpush.bf16.msrb.mxu0 %v6841_v7  ;;  %v9142_v24 = vld [vmem:[%s14668_s2 + $0x42c] sm:$0xf0]  ;;  %2811 = vmatpush.bf16.msrb.mxu3 %v6041_v15  ;;  %v6426_v15 = vld [vmem:[%s14668_s2 + $0x370] sm:$0xf0]  ;;  %v2606_v54 = vpop.f32.mrf.mxu2 }
 0x114   :  { %v6776_v25 = vld [vmem:[%s14668_s2 + $0x610] sm:$0xf]  ;;  %2824 = vmatpush.bf16.msrb.mxu1 %v6297_v16  ;;  %v6521_v38 = vor.u32 %v9142_v24, %v6520_v23  ;;  %v2568_v16 = vadd.f32 %v2567_v12, %v11173_v1  ;;  %v9042_v1 = vld [vmem:[%s14668_s2 + $0x114] sm:$0xf]  ;;  %v2569_v46 = vpop.f32.mrf.mxu0 }
 0x115   :  { %v9206_v26 = vld [vmem:[%s14668_s2 + $0x62c] sm:$0xf0]  ;;  %2837 = vmatpush.bf16.msrb.mxu2 %v6553_v21  ;;  %v6138_v23 = vld [vmem:[%s14668_s2 + $0x130] sm:$0xf0] }
 0x116   :  { %v7256_v27 = vld [vmem:[%s14668_s2 + $0x9d0] sm:$0xf]  ;;  %v6777_v40 = vor.u32 %v9206_v26, %v6776_v25  ;;  %v6429_v25 = vor.u32 %v9114_v14, %v6426_v15  ;;  %v9018_v12 = vld [vmem:[%s14668_s2 + $0x54] sm:$0xf] }
 0x117   :  { %v9326_v29 = vld [vmem:[%s14668_s2 + $0x9ec] sm:$0xf0]  ;;  %2850 = vmatpush.bf16.msrb.mxu0 %v6809_v22  ;;  %2812 = vmatpush.bf16.msrb.mxu3 %v6009_v33  ;;  %v2580_v22 = vpop.f32.mrf.mxu1 }
 0x118   :  { %v7512_v30 = vld [vmem:[%s14668_s2 + $0xbd0] sm:$0xf]  ;;  %v7257_v42 = vor.u32 %v9326_v29, %v7256_v27  ;;  %2825 = vmatpush.bf16.msrb.mxu1 %v6265_v35  ;;  %v2581_v24 = vadd.f32 %v2580_v22, %v2568_v16  ;;  %v9106_v27 = vld [vmem:[%s14668_s2 + $0x314] sm:$0xf] }
 0x119   :  { %v9390_v32 = vld [vmem:[%s14668_s2 + $0xbec] sm:$0xf0]  ;;  %2838 = vmatpush.bf16.msrb.mxu2 %v6521_v38  ;;  %v6106_v38 = vld [vmem:[%s14668_s2 + $0xf0] sm:$0xf0] }
 0x11a   :  { %v7544_v41 = vld [vmem:[%s14668_s2 + $0xc10] sm:$0xf]  ;;  %v7513_v43 = vor.u32 %v9390_v32, %v7512_v30  ;;  %2813 = vmatmul.bf16.vlgmr.msrb.gmra.mxu3 %v10031_v57  ;;  %v6141_v30 = vor.u32 %v9042_v1, %v6138_v23  ;;  %v9010_v23 = vld [vmem:[%s14668_s2 + $0x14] sm:$0xf] }
 0x11b   :  { %v9398_v44 = vld [vmem:[%s14668_s2 + $0xc2c] sm:$0xf0]  ;;  %2851 = vmatpush.bf16.msrb.mxu0 %v6777_v40  ;;  %2857 = vmatpush.bf16.msra.mxu3 %v7257_v42  ;;  %v2593_v40 = vpop.f32.mrf.mxu3  ;;  %v6397_v42 = vor.u32 %v9106_v27, %v6394_v28  ;;  %v6746_v27 = vld [vmem:[%s14668_s2 + $0x5f0] sm:$0xf0] }
 0x11c   :  { %v7224_v49 = vld [vmem:[%s14668_s2 + $0x990] sm:$0xf]  ;;  %v7545_v56 = vor.u32 %v9398_v44, %v7544_v41  ;;  %2870 = vmatpush.bf16.msra.mxu1 %v7513_v43  ;;  %2839 = vmatmul.bf16.vlgmr.msrb.gmra.mxu2 %v10020_v53  ;;  %v2594_v41 = vadd.f32 %v2593_v40, %v2581_v24  ;;  %v9098_v44 = vld [vmem:[%s14668_s2 + $0x2d4] sm:$0xf] }
 0x11d   :  { %v9318_v50 = vld [vmem:[%s14668_s2 + $0x9ac] sm:$0xf0]  ;;  %2826 = vmatmul.bf16.vlgmr.msrb.gmra.mxu1 %v10061_v9  ;;  %v6365_v0 = vor.u32 %v9098_v44, %v6362_v45  ;;  %v6010_v24 = vld [vmem:[%s14668_s2 + $0x30] sm:$0xf0] }
 0x11e   :  { %v7480_v51 = vld [vmem:[%s14668_s2 + $0xb90] sm:$0xf]  ;;  %v7225_v62 = vor.u32 %v9318_v50, %v7224_v49  ;;  %2890 = vmatpush.bf16.msra.mxu2 %v7545_v56  ;;  %2852 = vmatmul.bf16.vlgmr.msrb.gmra.mxu0 %v10033_v60  ;;  %v6109_v49 = vor.u32 %v9034_v37, %v6106_v38  ;;  %v9026_v56 = vld [vmem:[%s14668_s2 + $0x94] sm:$0xf]  ;;  %v11372_v63 = vadd.f32 %v2606_v54, %v2594_v41 }
 0x11f   :  { %v9382_v52 = vld [vmem:[%s14668_s2 + $0xbac] sm:$0xf0]  ;;  %2896 = vmatpush.bf16.msra.mxu0 %v6237_v47  ;;  %v9258_v28 = vld [vmem:[%s14668_s2 + $0x7d4] sm:$0xf]  ;;  %v6013_v37 = vor.u32 %v9010_v23, %v6010_v24  ;;  %v439_v23 = vperm.slane %v10867_v61, 2 }
 0x120   :  { %v7481_v2 = vor.u32 %v9382_v52, %v7480_v51  ;;  %v7192_v4 = vld [vmem:[%s14668_s2 + $0x950] sm:$0xf]  ;;  %2858 = vmatpush.bf16.msra.mxu3 %v7225_v62  ;;  %v2582_v62 = vpop.f32.mrf.mxu1  ;;  %v9074_v38 = vld [vmem:[%s14668_s2 + $0x214] sm:$0xf] }
 0x121   :  { %v9310_v5 = vld [vmem:[%s14668_s2 + $0x96c] sm:$0xf0]  ;;  %v6266_v40 = vld [vmem:[%s14668_s2 + $0x230] sm:$0xf0] }
 0x122   :  { %v7448_v6 = vld [vmem:[%s14668_s2 + $0xb50] sm:$0xf]  ;;  %2909 = vmatpush.bf16.msrb.mxu2 %v6493_v59  ;;  %v7193_v13 = vor.u32 %v9310_v5, %v7192_v4  ;;  %2871 = vmatpush.bf16.msra.mxu1 %v7481_v2  ;;  %v6074_v59 = vld [vmem:[%s14668_s2 + $0xb0] sm:$0xf0]  ;;  %v6269_v54 = vor.u32 %v9074_v38, %v6266_v40 }
 0x123   :  { %v9374_v7 = vld [vmem:[%s14668_s2 + $0xb6c] sm:$0xf0]  ;;  %2897 = vmatpush.bf16.msra.mxu0 %v6205_v3  ;;  %v9090_v3 = vld [vmem:[%s14668_s2 + $0x294] sm:$0xf]  ;;  %v2595_v14 = vpop.f32.mrf.mxu3 }
 0x124   :  { %v7449_v17 = vor.u32 %v9374_v7, %v7448_v6  ;;  %v7160_v19 = vld [vmem:[%s14668_s2 + $0x910] sm:$0xf]  ;;  %2859 = vmatpush.bf16.msra.mxu3 %v7193_v13  ;;  %v6330_v4 = vld [vmem:[%s14668_s2 + $0x2b0] sm:$0xf0]  ;;  %v6077_v6 = vor.u32 %v9026_v56, %v6074_v59 }
 0x125   :  { %v9302_v20 = vld [vmem:[%s14668_s2 + $0x92c] sm:$0xf0]  ;;  %v6042_v13 = vld [vmem:[%s14668_s2 + $0x70] sm:$0xf0]  ;;  %v6333_v15 = vor.u32 %v9090_v3, %v6330_v4 }
 0x126   :  { %v7416_v21 = vld [vmem:[%s14668_s2 + $0xb10] sm:$0xf]  ;;  %2910 = vmatpush.bf16.msrb.mxu2 %v6461_v11  ;;  %v7161_v26 = vor.u32 %v9302_v20, %v7160_v19  ;;  %2872 = vmatpush.bf16.msra.mxu1 %v7449_v17  ;;  %v9082_v17 = vld [vmem:[%s14668_s2 + $0x254] sm:$0xf] }
 0x127   :  { %v9366_v58 = vld [vmem:[%s14668_s2 + $0xb2c] sm:$0xf0]  ;;  %2898 = vmatpush.bf16.msra.mxu0 %v6173_v18  ;;  %v6298_v18 = vld [vmem:[%s14668_s2 + $0x270] sm:$0xf0] }
 0x128   :  { %v7417_v29 = vor.u32 %v9366_v58, %v7416_v21  ;;  %v7128_v32 = vld [vmem:[%s14668_s2 + $0x8d0] sm:$0xf]  ;;  %2860 = vmatpush.bf16.msra.mxu3 %v7161_v26  ;;  %v6045_v21 = vor.u32 %v9018_v12, %v6042_v13  ;;  %v2608_v26 = vpop.f32.mrf.mxu2  ;;  %v7514_v44 = vld [vmem:[%s14668_s2 + $0xbf0] sm:$0xf0] }
 0x129   :  { %v9294_v33 = vld [vmem:[%s14668_s2 + $0x8ec] sm:$0xf0]  ;;  %v9186_v45 = vld [vmem:[%s14668_s2 + $0x594] sm:$0xf] }
 0x12a   :  { %v7384_v35 = vld [vmem:[%s14668_s2 + $0xad0] sm:$0xf]  ;;  %2911 = vmatpush.bf16.msrb.mxu2 %v6429_v25  ;;  %v7129_v43 = vor.u32 %v9294_v33, %v7128_v32  ;;  %2873 = vmatpush.bf16.msra.mxu1 %v7417_v29  ;;  %v9194_v25 = vld [vmem:[%s14668_s2 + $0x5d4] sm:$0xf] }
 0x12b   :  { %v9358_v36 = vld [vmem:[%s14668_s2 + $0xaec] sm:$0xf0]  ;;  %2899 = vmatpush.bf16.msra.mxu0 %v6141_v30  ;;  %v7002_v29 = vld [vmem:[%s14668_s2 + $0x7f0] sm:$0xf0]  ;;  %v6301_v30 = vor.u32 %v9082_v17, %v6298_v18  ;;  %v6749_v41 = vor.u32 %v9194_v25, %v6746_v27  ;;  %v2632_v25 = vpop.f32.mrf.mxu1 }
 0x12c   :  { %v7385_v47 = vor.u32 %v9358_v36, %v7384_v35  ;;  %v7096_v50 = vld [vmem:[%s14668_s2 + $0x890] sm:$0xf]  ;;  %2861 = vmatpush.bf16.msra.mxu3 %v7129_v43  ;;  %7562 = vmatmul.msk.bf16.vlgmr.msra.gmra.mxu2 %vm2437_vm0, %v10140_v48  ;;  %v9322_v33 = vld [vmem:[%s14668_s2 + $0x9d4] sm:$0xf] }
 0x12d   :  { %v9286_v51 = vld [vmem:[%s14668_s2 + $0x8ac] sm:$0xf0]  ;;  %v7258_v35 = vld [vmem:[%s14668_s2 + $0x9f0] sm:$0xf0] }
 0x12e   :  { %v7352_v52 = vld [vmem:[%s14668_s2 + $0xa90] sm:$0xf]  ;;  %2912 = vmatpush.bf16.msrb.mxu2 %v6397_v42  ;;  %v7097_v2 = vor.u32 %v9286_v51, %v7096_v50  ;;  %2874 = vmatpush.bf16.msra.mxu1 %v7385_v47  ;;  %v7005_v42 = vor.u32 %v9258_v28, %v7002_v29  ;;  %v9386_v43 = vld [vmem:[%s14668_s2 + $0xbd4] sm:$0xf]  ;;  %v7261_v46 = vor.u32 %v9322_v33, %v7258_v35  ;;  %v2619_v47 = vpop.f32.mrf.mxu3 }
 0x12f   :  { %v9350_v55 = vld [vmem:[%s14668_s2 + $0xaac] sm:$0xf0]  ;;  %2900 = vmatpush.bf16.msra.mxu0 %v6109_v49  ;;  %v6714_v49 = vld [vmem:[%s14668_s2 + $0x5b0] sm:$0xf0]  ;;  %v7517_v59 = vor.u32 %v9386_v43, %v7514_v44 }
 0x130   :  { %v7353_v5 = vor.u32 %v9350_v55, %v7352_v52  ;;  %v7064_v7 = vld [vmem:[%s14668_s2 + $0x850] sm:$0xf]  ;;  %2862 = vmatpush.bf16.msra.mxu3 %v7097_v2  ;;  %v9250_v50 = vld [vmem:[%s14668_s2 + $0x794] sm:$0xf]  ;;  %v11467_v52 = vadd.f32 %v2619_v47, %v11372_v63  ;;  %v6717_v62 = vor.u32 %v9186_v45, %v6714_v49 }
 0x131   :  { %v9278_v8 = vld [vmem:[%s14668_s2 + $0x86c] sm:$0xf0]  ;;  %v6970_v51 = vld [vmem:[%s14668_s2 + $0x7b0] sm:$0xf0] }
 0x132   :  { %v7320_v10 = vld [vmem:[%s14668_s2 + $0xa50] sm:$0xf]  ;;  %2913 = vmatpush.bf16.msrb.mxu2 %v6365_v0  ;;  %v7065_v16 = vor.u32 %v9278_v8, %v7064_v7  ;;  %2875 = vmatpush.bf16.msra.mxu1 %v7353_v5  ;;  %v9314_v55 = vld [vmem:[%s14668_s2 + $0x994] sm:$0xf]  ;;  %v6973_v0 = vor.u32 %v9250_v50, %v6970_v51  ;;  %vm3170_vm2 = vcmp.ge.f32.partialorder %v11467_v52, 0.0 }
 0x133   :  { %v9342_v11 = vld [vmem:[%s14668_s2 + $0xa6c] sm:$0xf0]  ;;  %2901 = vmatpush.bf16.msra.mxu0 %v6077_v6  ;;  %v7226_v56 = vld [vmem:[%s14668_s2 + $0x9b0] sm:$0xf0] }
 0x134   :  { %v7032_v19 = vld [vmem:[%s14668_s2 + $0x810] sm:$0xf]  ;;  %v7321_v20 = vor.u32 %v9342_v11, %v7320_v10  ;;  %2863 = vmatpush.bf16.msra.mxu3 %v7065_v16  ;;  %v9378_v63 = vld [vmem:[%s14668_s2 + $0xb94] sm:$0xf]  ;;  %v7229_v4 = vor.u32 %v9314_v55, %v7226_v56  ;;  %v2658_v16 = vpop.f32.mrf.mxu0 }
 0x135   :  { %v9270_v22 = vld [vmem:[%s14668_s2 + $0x82c] sm:$0xf0]  ;;  %v7482_v2 = vld [vmem:[%s14668_s2 + $0xbb0] sm:$0xf0] }
 0x136   :  { %v7288_v58 = vld [vmem:[%s14668_s2 + $0xa10] sm:$0xf]  ;;  %2914 = vmatpush.bf16.msrb.mxu2 %v6333_v15  ;;  %v7033_v32 = vor.u32 %v9270_v22, %v7032_v19  ;;  %2876 = vmatpush.bf16.msra.mxu1 %v7321_v20  ;;  %v9178_v3 = vld [vmem:[%s14668_s2 + $0x554] sm:$0xf]  ;;  %v7485_v11 = vor.u32 %v9378_v63, %v7482_v2  ;;  %v2621_v19 = vpop.f32.mrf.mxu3  ;;  %v2634_v63 = vpop.f32.mrf.mxu1 }
 0x137   :  { %v9334_v1 = vld [vmem:[%s14668_s2 + $0xa2c] sm:$0xf0]  ;;  %2902 = vmatpush.bf16.msra.mxu0 %v6045_v21  ;;  %v6682_v5 = vld [vmem:[%s14668_s2 + $0x570] sm:$0xf0]  ;;  %v6464_v63 = vld [vmem:[%s14668_s2 + $0x398] sm:$0xf] }
 0x138   :  { %v7289_v36 = vor.u32 %v9334_v1, %v7288_v58  ;;  %2864 = vmatpush.bf16.msra.mxu3 %v7033_v32  ;;  %v9242_v6 = vld [vmem:[%s14668_s2 + $0x754] sm:$0xf]  ;;  %v6685_v12 = vor.u32 %v9178_v3, %v6682_v5 }
 0x139   :  { %v6938_v7 = vld [vmem:[%s14668_s2 + $0x770] sm:$0xf0] }
 0x13a   :  { %2915 = vmatpush.bf16.msrb.mxu2 %v6301_v30  ;;  %2877 = vmatpush.bf16.msra.mxu1 %v7289_v36  ;;  %v9306_v8 = vld [vmem:[%s14668_s2 + $0x954] sm:$0xf]  ;;  %v6941_v13 = vor.u32 %v9242_v6, %v6938_v7  ;;  %v2633_v36 = vadd.f32 %v2632_v25, %v439_v23 }
 0x13b   :  { %2903 = vmatpush.bf16.msra.mxu0 %v6013_v37  ;;  %2865 = vmatmul.bf16.vlgmr.msra.gmra.mxu3 %v10228_v34  ;;  %v7194_v10 = vld [vmem:[%s14668_s2 + $0x970] sm:$0xf0] }
 0x13c   :  { %2922 = vmatpush.bf16.msrb.mxu3 %v6749_v41  ;;  %v9370_v14 = vld [vmem:[%s14668_s2 + $0xb54] sm:$0xf]  ;;  %v7197_v18 = vor.u32 %v9306_v8, %v7194_v10  ;;  %v2660_v45 = vpop.f32.mrf.mxu0 }
 0x13d   :  { %2878 = vmatmul.bf16.vlgmr.msra.gmra.mxu1 %v10239_v39  ;;  %v7450_v15 = vld [vmem:[%s14668_s2 + $0xb70] sm:$0xf0]  ;;  %v9135_v45 = vld [vmem:[%s14668_s2 + $0x3f4] sm:$0xf0] }
 0x13e   :  { %2935 = vmatpush.bf16.msrb.mxu1 %v7005_v42  ;;  %2916 = vmatpush.bf16.msrb.mxu2 %v6269_v54  ;;  %v9170_v17 = vld [vmem:[%s14668_s2 + $0x514] sm:$0xf]  ;;  %v7453_v24 = vor.u32 %v9370_v14, %v7450_v15  ;;  %v2645_v49 = vpop.f32.mrf.mxu3 }
 0x13f   :  { %2948 = vmatpush.bf16.msrb.mxu0 %v7261_v46  ;;  %v6650_v20 = vld [vmem:[%s14668_s2 + $0x530] sm:$0xf0]  ;;  %v2646_v55 = vadd.f32 %v2645_v49, %v2633_v36 }
 0x140   :  { %2904 = vmatmul.bf16.vlgmr.msra.gmra.mxu0 %v10031_v57  ;;  %2923 = vmatpush.bf16.msrb.mxu3 %v6717_v62  ;;  %v9234_v21 = vld [vmem:[%s14668_s2 + $0x714] sm:$0xf]  ;;  %v6653_v26 = vor.u32 %v9170_v17, %v6650_v20  ;;  %v2671_v62 = vpop.f32.mrf.mxu2 }
 0x141   :  { %v6906_v22 = vld [vmem:[%s14668_s2 + $0x730] sm:$0xf0]  ;;  %2917 = vmatmul.bf16.vlgmr.msrb.gmra.mxu2 %v10061_v9 }
 0x142   :  { %2961 = vmatpush.bf16.msra.mxu2 %v7517_v59  ;;  %2936 = vmatpush.bf16.msrb.mxu1 %v6973_v0  ;;  %v9298_v58 = vld [vmem:[%s14668_s2 + $0x914] sm:$0xf]  ;;  %v6909_v27 = vor.u32 %v9234_v21, %v6906_v22 }
 0x143   :  { %2949 = vmatpush.bf16.msrb.mxu0 %v7229_v4  ;;  %v7162_v1 = vld [vmem:[%s14668_s2 + $0x930] sm:$0xf0]  ;;  %v2659_v4 = vadd.f32 %v2658_v16, %v2646_v55 }
 0x144   :  { %2924 = vmatpush.bf16.msrb.mxu3 %v6685_v12  ;;  %v9362_v28 = vld [vmem:[%s14668_s2 + $0xb14] sm:$0xf]  ;;  %v7165_v61 = vor.u32 %v9298_v58, %v7162_v1  ;;  %v11617_v1 = vpop.f32.mrf.mxu0 }
 0x145   :  { %v7418_v29 = vld [vmem:[%s14668_s2 + $0xb30] sm:$0xf0] }
 0x146   :  { %2962 = vmatpush.bf16.msra.mxu2 %v7485_v11  ;;  %2937 = vmatpush.bf16.msrb.mxu1 %v6941_v13  ;;  %v9162_v30 = vld [vmem:[%s14668_s2 + $0x4d4] sm:$0xf]  ;;  %v7421_v40 = vor.u32 %v9362_v28, %v7418_v29  ;;  %v11594_v13 = vadd.f32 %v2671_v62, %v2659_v4  ;;  %v6240_v28 = vld [vmem:[%s14668_s2 + $0x1d8] sm:$0xf] }
 0x147   :  { %2950 = vmatpush.bf16.msrb.mxu0 %v7197_v18  ;;  %v6618_v32 = vld [vmem:[%s14668_s2 + $0x4f0] sm:$0xf0]  ;;  %v9071_v29 = vld [vmem:[%s14668_s2 + $0x1f4] sm:$0xf0] }
 0x148   :  { %v9226_v33 = vld [vmem:[%s14668_s2 + $0x6d4] sm:$0xf]  ;;  %2925 = vmatpush.bf16.msrb.mxu3 %v6653_v26  ;;  %v6621_v41 = vor.u32 %v9162_v30, %v6618_v32  ;;  %v6752_v30 = vld [vmem:[%s14668_s2 + $0x5d8] sm:$0xf] }
 0x149   :  { %v6874_v35 = vld [vmem:[%s14668_s2 + $0x6f0] sm:$0xf0]  ;;  %v9127_v4 = vld [vmem:[%s14668_s2 + $0x3b4] sm:$0xf0] }
 0x14a   :  { %v9290_v37 = vld [vmem:[%s14668_s2 + $0x8d4] sm:$0xf]  ;;  %2963 = vmatpush.bf16.msra.mxu2 %v7453_v24  ;;  %2938 = vmatpush.bf16.msrb.mxu1 %v6909_v27  ;;  %v6877_v42 = vor.u32 %v9226_v33, %v6874_v35  ;;  %v2647_v27 = vpop.f32.mrf.mxu3  ;;  %v9199_v33 = vld [vmem:[%s14668_s2 + $0x5f4] sm:$0xf0] }
 0x14b   :  { %v7130_v38 = vld [vmem:[%s14668_s2 + $0x8f0] sm:$0xf0]  ;;  %2951 = vmatpush.bf16.msrb.mxu0 %v7165_v61  ;;  %v2673_v61 = vpop.f32.mrf.mxu2  ;;  %v6753_v49 = vor.u32 %v9199_v33, %v6752_v30  ;;  %v9111_v30 = vld [vmem:[%s14668_s2 + $0x334] sm:$0xf0] }
 0x14c   :  { %v9354_v43 = vld [vmem:[%s14668_s2 + $0xad4] sm:$0xf]  ;;  %v7133_v47 = vor.u32 %v9290_v37, %v7130_v38  ;;  %2926 = vmatpush.bf16.msrb.mxu3 %v6621_v41  ;;  %v6912_v61 = vld [vmem:[%s14668_s2 + $0x718] sm:$0xf] }
 0x14d   :  { %v7386_v44 = vld [vmem:[%s14668_s2 + $0xaf0] sm:$0xf0] }
 0x14e   :  { %v9154_v46 = vld [vmem:[%s14668_s2 + $0x494] sm:$0xf]  ;;  %2964 = vmatpush.bf16.msra.mxu2 %v7421_v40  ;;  %v7389_v0 = vor.u32 %v9354_v43, %v7386_v44  ;;  %2939 = vmatpush.bf16.msrb.mxu1 %v6877_v42  ;;  %v6496_v42 = vld [vmem:[%s14668_s2 + $0x3d8] sm:$0xf]  ;;  %v6241_v44 = vor.u32 %v9071_v29, %v6240_v28 }
 0x14f   :  { %v6586_v50 = vld [vmem:[%s14668_s2 + $0x4b0] sm:$0xf0]  ;;  %2952 = vmatpush.bf16.msrb.mxu0 %v7133_v47  ;;  %v9263_v47 = vld [vmem:[%s14668_s2 + $0x7f4] sm:$0xf0]  ;;  %v6497_v62 = vor.u32 %v9135_v45, %v6496_v42  ;;  %v11762_v45 = vld [vmem:[%s14670_s3] sm:$0xff] }
 0x150   :  { %v9218_v51 = vld [vmem:[%s14668_s2 + $0x694] sm:$0xf]  ;;  %v6589_v2 = vor.u32 %v9154_v46, %v6586_v50  ;;  %v7008_v46 = vld [vmem:[%s14668_s2 + $0x7d8] sm:$0xf] }
 0x151   :  { %v6842_v54 = vld [vmem:[%s14668_s2 + $0x6b0] sm:$0xf0]  ;;  %v6400_v28 = vld [vmem:[%s14668_s2 + $0x318] sm:$0xf] }
 0x152   :  { %v9282_v56 = vld [vmem:[%s14668_s2 + $0x894] sm:$0xf]  ;;  %v6845_v3 = vor.u32 %v9218_v51, %v6842_v54  ;;  %2965 = vmatpush.bf16.msra.mxu2 %v7389_v0  ;;  %2927 = vmatpush.bf16.msrb.mxu3 %v6589_v2  ;;  %v6208_v51 = vld [vmem:[%s14668_s2 + $0x198] sm:$0xf]  ;;  %v7009_v0 = vor.u32 %v9263_v47, %v7008_v46  ;;  %v2712_v2 = vpop.f32.mrf.mxu0  ;;  %v440_v46 = vperm.slane %v11762_v45, 3 }
 0x153   :  { %v7098_v59 = vld [vmem:[%s14668_s2 + $0x8b0] sm:$0xf0]  ;;  %v9063_v54 = vld [vmem:[%s14668_s2 + $0x1b4] sm:$0xf0] }
 0x154   :  { %v9346_v5 = vld [vmem:[%s14668_s2 + $0xa94] sm:$0xf]  ;;  %v7101_v8 = vor.u32 %v9282_v56, %v7098_v59  ;;  %2940 = vmatpush.bf16.msrb.mxu1 %v6845_v3  ;;  %v6720_v56 = vld [vmem:[%s14668_s2 + $0x598] sm:$0xf]  ;;  %v6209_v3 = vor.u32 %v9063_v54, %v6208_v51  ;;  %v2723_v2 = vpop.f32.mrf.mxu2 }
 0x155   :  { %v7354_v6 = vld [vmem:[%s14668_s2 + $0xab0] sm:$0xf0]  ;;  %v9191_v59 = vld [vmem:[%s14668_s2 + $0x5b4] sm:$0xf0] }
 0x156   :  { %v9146_v7 = vld [vmem:[%s14668_s2 + $0x454] sm:$0xf]  ;;  %v7357_v16 = vor.u32 %v9346_v5, %v7354_v6  ;;  %2953 = vmatpush.bf16.msrb.mxu0 %v7101_v8  ;;  %v6976_v5 = vld [vmem:[%s14668_s2 + $0x798] sm:$0xf] }
 0x157   :  { %v6554_v10 = vld [vmem:[%s14668_s2 + $0x470] sm:$0xf0]  ;;  %v9255_v6 = vld [vmem:[%s14668_s2 + $0x7b4] sm:$0xf0] }
 0x158   :  { %v9210_v11 = vld [vmem:[%s14668_s2 + $0x654] sm:$0xf]  ;;  %v6557_v19 = vor.u32 %v9146_v7, %v6554_v10  ;;  %2966 = vmatpush.bf16.msra.mxu2 %v7357_v16  ;;  %v6721_v7 = vor.u32 %v9191_v59, %v6720_v56  ;;  %v6176_v8 = vld [vmem:[%s14668_s2 + $0x158] sm:$0xf]  ;;  %v2697_v59 = vpop.f32.mrf.mxu3 }
 0x159   :  { %v6810_v12 = vld [vmem:[%s14668_s2 + $0x670] sm:$0xf0]  ;;  %v9055_v10 = vld [vmem:[%s14668_s2 + $0x174] sm:$0xf0] }
 0x15a   :  { %v9274_v14 = vld [vmem:[%s14668_s2 + $0x854] sm:$0xf]  ;;  %v6813_v20 = vor.u32 %v9210_v11, %v6810_v12  ;;  %2928 = vmatpush.bf16.msrb.mxu3 %v6557_v19  ;;  %v6688_v11 = vld [vmem:[%s14668_s2 + $0x558] sm:$0xf] }
 0x15b   :  { %v7066_v15 = vld [vmem:[%s14668_s2 + $0x870] sm:$0xf0]  ;;  %v9183_v12 = vld [vmem:[%s14668_s2 + $0x574] sm:$0xf0] }
 0x15c   :  { %v9338_v17 = vld [vmem:[%s14668_s2 + $0xa54] sm:$0xf]  ;;  %v7069_v23 = vor.u32 %v9274_v14, %v7066_v15  ;;  %2941 = vmatpush.bf16.msrb.mxu1 %v6813_v20  ;;  %v6465_v14 = vor.u32 %v9127_v4, %v6464_v63  ;;  %v6977_v15 = vor.u32 %v9255_v6, %v6976_v5  ;;  %v6432_v16 = vld [vmem:[%s14668_s2 + $0x358] sm:$0xf]  ;;  %v2724_v6 = vadd.f32 %v2723_v2, %v440_v46 }
 0x15d   :  { %v7322_v18 = vld [vmem:[%s14668_s2 + $0xa70] sm:$0xf0]  ;;  %v9119_v19 = vld [vmem:[%s14668_s2 + $0x374] sm:$0xf0] }
 0x15e   :  { %v9138_v21 = vld [vmem:[%s14668_s2 + $0x414] sm:$0xf]  ;;  %v7325_v32 = vor.u32 %v9338_v17, %v7322_v18  ;;  %2954 = vmatpush.bf16.msrb.mxu0 %v7069_v23  ;;  %v2684_v17 = vpop.f32.mrf.mxu1  ;;  %v6177_v18 = vor.u32 %v9055_v10, %v6176_v8  ;;  %v6944_v20 = vld [vmem:[%s14668_s2 + $0x758] sm:$0xf] }
 0x15f   :  { %v6522_v22 = vld [vmem:[%s14668_s2 + $0x430] sm:$0xf0]  ;;  %v6144_v23 = vld [vmem:[%s14668_s2 + $0x118] sm:$0xf] }
 0x160   :  { %v9202_v58 = vld [vmem:[%s14668_s2 + $0x614] sm:$0xf]  ;;  %v6525_v37 = vor.u32 %v9138_v21, %v6522_v22  ;;  %2967 = vmatpush.bf16.msra.mxu2 %v7325_v32  ;;  %v9247_v21 = vld [vmem:[%s14668_s2 + $0x774] sm:$0xf0]  ;;  %v2685_v22 = vadd.f32 %v2684_v17, %v11594_v13 }
 0x161   :  { %v6778_v24 = vld [vmem:[%s14668_s2 + $0x630] sm:$0xf0]  ;;  %v9175_v13 = vld [vmem:[%s14668_s2 + $0x534] sm:$0xf0]  ;;  %v6945_v27 = vor.u32 %v9247_v21, %v6944_v20 }
 0x162   :  { %v9266_v25 = vld [vmem:[%s14668_s2 + $0x814] sm:$0xf]  ;;  %v6781_v38 = vor.u32 %v9202_v58, %v6778_v24  ;;  %2929 = vmatpush.bf16.msrb.mxu3 %v6525_v37  ;;  %v6689_v58 = vor.u32 %v9183_v12, %v6688_v11  ;;  %v9047_v24 = vld [vmem:[%s14668_s2 + $0x134] sm:$0xf0]  ;;  %v2736_v37 = vpop.f32.mrf.mxu0 }
 0x163   :  { %v7034_v26 = vld [vmem:[%s14668_s2 + $0x830] sm:$0xf0]  ;;  %v6145_v29 = vor.u32 %v9047_v24, %v6144_v23  ;;  %v9239_v32 = vld [vmem:[%s14668_s2 + $0x734] sm:$0xf0]  ;;  %v11804_v17 = vadd.f32 %v2736_v37, %v2724_v6 }
 0x164   :  { %v9394_v35 = vld [vmem:[%s14668_s2 + $0xc14] sm:$0xf]  ;;  %v7037_v43 = vor.u32 %v9266_v25, %v7034_v26  ;;  %2942 = vmatpush.bf16.msrb.mxu1 %v6781_v38  ;;  %v6656_v25 = vld [vmem:[%s14668_s2 + $0x518] sm:$0xf]  ;;  %v6433_v26 = vor.u32 %v9119_v19, %v6432_v16  ;;  %v6913_v42 = vor.u32 %v9239_v32, %v6912_v61  ;;  %v2699_v32 = vpop.f32.mrf.mxu3 }
 0x165   :  { %v7546_v36 = vld [vmem:[%s14668_s2 + $0xc30] sm:$0xf0]  ;;  %2930 = vmatmul.bf16.vlgmr.msrb.gmra.mxu3 %v10020_v53  ;;  %v6657_v33 = vor.u32 %v9175_v13, %v6656_v25  ;;  %v6624_v38 = vld [vmem:[%s14668_s2 + $0x4d8] sm:$0xf] }
 0x166   :  { %v9330_v40 = vld [vmem:[%s14668_s2 + $0xa14] sm:$0xf]  ;;  %v7549_v50 = vor.u32 %v9394_v35, %v7546_v36  ;;  %2955 = vmatpush.bf16.msrb.mxu0 %v7037_v43  ;;  %v6112_v35 = vld [vmem:[%s14668_s2 + $0xd8] sm:$0xf]  ;;  %v2686_v51 = vpop.f32.mrf.mxu1 }
 0x167   :  { %v7290_v41 = vld [vmem:[%s14668_s2 + $0xa30] sm:$0xf0]  ;;  %2943 = vmatmul.bf16.vlgmr.msrb.gmra.mxu1 %v10033_v60  ;;  %v9039_v36 = vld [vmem:[%s14668_s2 + $0xf4] sm:$0xf0]  ;;  %v9067_v51 = vld [vmem:[%s14668_s2 + $0x1dc] sm:$0xf] }
 0x168   :  { %v7293_v55 = vor.u32 %v9330_v40, %v7290_v41  ;;  %2987 = vmatpush.bf16.msra.mxu1 %v6241_v44  ;;  %2981 = vmatpush.bf16.msra.mxu3 %v7549_v50  ;;  %v9167_v40 = vld [vmem:[%s14668_s2 + $0x4f4] sm:$0xf0]  ;;  %v6401_v41 = vor.u32 %v9111_v30, %v6400_v28  ;;  %v6113_v47 = vor.u32 %v9039_v36, %v6112_v35 }
 0x169   :  { %2956 = vmatmul.bf16.vlgmr.msrb.gmra.mxu0 %v10228_v34  ;;  %v6368_v43 = vld [vmem:[%s14668_s2 + $0x2d8] sm:$0xf]  ;;  %v6625_v54 = vor.u32 %v9167_v40, %v6624_v38 }
 0x16a   :  { %3013 = vmatpush.bf16.msra.mxu0 %v6753_v49  ;;  %2968 = vmatpush.bf16.msra.mxu2 %v7293_v55  ;;  %v9103_v44 = vld [vmem:[%s14668_s2 + $0x2f4] sm:$0xf0] }
 0x16b   :  { %v6880_v49 = vld [vmem:[%s14668_s2 + $0x6d8] sm:$0xf] }
 0x16c   :  { %3000 = vmatpush.bf16.msrb.mxu3 %v6497_v62  ;;  %2988 = vmatpush.bf16.msra.mxu1 %v6209_v3  ;;  %v9231_v50 = vld [vmem:[%s14668_s2 + $0x6f4] sm:$0xf0]  ;;  %v6369_v62 = vor.u32 %v9103_v44, %v6368_v43  ;;  %v2698_v3 = vadd.f32 %v2697_v59, %v2685_v22  ;;  %v6498_v59 = vld [vmem:[%s14668_s2 + $0x3f8] sm:$0xf0] }
 0x16d   :  { %2969 = vmatmul.bf16.vlgmr.msra.gmra.mxu2 %v10239_v39  ;;  %v6080_v55 = vld [vmem:[%s14668_s2 + $0x98] sm:$0xf]  ;;  %v6881_v4 = vor.u32 %v9231_v50, %v6880_v49 }
 0x16e   :  { %3026 = vmatpush.bf16.msrb.mxu2 %v7009_v0  ;;  %3014 = vmatpush.bf16.msra.mxu0 %v6721_v7  ;;  %v9031_v56 = vld [vmem:[%s14668_s2 + $0xb4] sm:$0xf0]  ;;  %v11796_v12 = vadd.f32 %v11617_v1, %v2698_v3 }
 0x16f   :  { %v6592_v0 = vld [vmem:[%s14668_s2 + $0x498] sm:$0xf]  ;;  %v6081_v7 = vor.u32 %v9031_v56, %v6080_v55  ;;  %v6242_v55 = vld [vmem:[%s14668_s2 + $0x1f8] sm:$0xf0] }
 0x170   :  { %3001 = vmatpush.bf16.msrb.mxu3 %v6465_v14  ;;  %2989 = vmatpush.bf16.msra.mxu1 %v6177_v18  ;;  %v9159_v63 = vld [vmem:[%s14668_s2 + $0x4b4] sm:$0xf0]  ;;  %v2738_v18 = vpop.f32.mrf.mxu0  ;;  %v9131_v56 = vld [vmem:[%s14668_s2 + $0x3dc] sm:$0xf]  ;;  %vm3171_vm3 = vcmp.ge.f32.partialorder %v11796_v12, 0.0 }
 0x171   :  { %v6336_v5 = vld [vmem:[%s14668_s2 + $0x298] sm:$0xf]  ;;  %v6593_v14 = vor.u32 %v9159_v63, %v6592_v0 }
 0x172   :  { %3027 = vmatpush.bf16.msrb.mxu2 %v6977_v15  ;;  %3015 = vmatpush.bf16.msra.mxu0 %v6689_v58  ;;  %v9095_v8 = vld [vmem:[%s14668_s2 + $0x2b4] sm:$0xf0] }
 0x173   :  { %v6848_v10 = vld [vmem:[%s14668_s2 + $0x698] sm:$0xf]  ;;  %v6337_v20 = vor.u32 %v9095_v8, %v6336_v5  ;;  %v6501_v5 = vor.u32 %v9131_v56, %v6498_v59  ;;  %v9059_v8 = vld [vmem:[%s14668_s2 + $0x19c] sm:$0xf] }
 0x174   :  { %3002 = vmatpush.bf16.msrb.mxu3 %v6433_v26  ;;  %2990 = vmatpush.bf16.msra.mxu1 %v6145_v29  ;;  %v9223_v11 = vld [vmem:[%s14668_s2 + $0x6b4] sm:$0xf0]  ;;  %v6114_v56 = vld [vmem:[%s14668_s2 + $0xf8] sm:$0xf0] }
 0x175   :  { %v6048_v15 = vld [vmem:[%s14668_s2 + $0x58] sm:$0xf]  ;;  %7563 = vmatmul.msk.bf16.vlgmr.msra.gmra.mxu3 %vm2437_vm0, %v10140_v48  ;;  %v6849_v21 = vor.u32 %v9223_v11, %v6848_v10  ;;  %v6210_v11 = vld [vmem:[%s14668_s2 + $0x1b8] sm:$0xf0] }
 0x176   :  { %3028 = vmatpush.bf16.msrb.mxu2 %v6945_v27  ;;  %3016 = vmatpush.bf16.msra.mxu0 %v6657_v33  ;;  %v9023_v16 = vld [vmem:[%s14668_s2 + $0x74] sm:$0xf0]  ;;  %v2725_v33 = vpop.f32.mrf.mxu2  ;;  %v9099_v59 = vld [vmem:[%s14668_s2 + $0x2dc] sm:$0xf] }
 0x177   :  { %v6560_v1 = vld [vmem:[%s14668_s2 + $0x458] sm:$0xf]  ;;  %v6049_v58 = vor.u32 %v9023_v16, %v6048_v15  ;;  %v6466_v15 = vld [vmem:[%s14668_s2 + $0x3b8] sm:$0xf0] }
 0x178   :  { %3003 = vmatpush.bf16.msrb.mxu3 %v6401_v41  ;;  %2991 = vmatpush.bf16.msra.mxu1 %v6113_v47  ;;  %v9151_v19 = vld [vmem:[%s14668_s2 + $0x474] sm:$0xf0] }
 0x179   :  { %v6304_v22 = vld [vmem:[%s14668_s2 + $0x258] sm:$0xf]  ;;  %v6561_v13 = vor.u32 %v9151_v19, %v6560_v1  ;;  %v6213_v19 = vor.u32 %v9059_v8, %v6210_v11  ;;  %v9027_v11 = vld [vmem:[%s14668_s2 + $0x9c] sm:$0xf] }
 0x17a   :  { %3029 = vmatpush.bf16.msrb.mxu2 %v6913_v42  ;;  %3017 = vmatpush.bf16.msra.mxu0 %v6625_v54  ;;  %v9087_v23 = vld [vmem:[%s14668_s2 + $0x274] sm:$0xf0] }
 0x17b   :  { %v6816_v24 = vld [vmem:[%s14668_s2 + $0x658] sm:$0xf]  ;;  %v6305_v35 = vor.u32 %v9087_v23, %v6304_v22  ;;  %v2749_v23 = vpop.f32.mrf.mxu1 }
 0x17c   :  { %3004 = vmatpush.bf16.msrb.mxu3 %v6369_v62  ;;  %2992 = vmatpush.bf16.msra.mxu1 %v6081_v7  ;;  %v9215_v25 = vld [vmem:[%s14668_s2 + $0x674] sm:$0xf0] }
 0x17d   :  { %v6016_v26 = vld [vmem:[%s14668_s2 + $0x18] sm:$0xf]  ;;  %v6817_v36 = vor.u32 %v9215_v25, %v6816_v24  ;;  %v6178_v25 = vld [vmem:[%s14668_s2 + $0x178] sm:$0xf0] }
 0x17e   :  { %3030 = vmatpush.bf16.msrb.mxu2 %v6881_v4  ;;  %3018 = vmatpush.bf16.msra.mxu0 %v6593_v14  ;;  %v9015_v27 = vld [vmem:[%s14668_s2 + $0x34] sm:$0xf0]  ;;  %v6245_v4 = vor.u32 %v9067_v51, %v6242_v55  ;;  %v9123_v14 = vld [vmem:[%s14668_s2 + $0x39c] sm:$0xf] }
 0x17f   :  { %v6528_v28 = vld [vmem:[%s14668_s2 + $0x418] sm:$0xf]  ;;  %v6017_v41 = vor.u32 %v9015_v27, %v6016_v26  ;;  %v6434_v26 = vld [vmem:[%s14668_s2 + $0x378] sm:$0xf0]  ;;  %v2750_v27 = vadd.f32 %v2749_v23, %v11804_v17 }
 0x180   :  { %v9143_v29 = vld [vmem:[%s14668_s2 + $0x434] sm:$0xf0]  ;;  %3005 = vmatpush.bf16.msrb.mxu3 %v6337_v20  ;;  %2993 = vmatpush.bf16.msra.mxu1 %v6049_v58  ;;  %v6469_v20 = vor.u32 %v9123_v14, %v6466_v15  ;;  %v9051_v58 = vld [vmem:[%s14668_s2 + $0x15c] sm:$0xf] }
 0x181   :  { %v7264_v30 = vld [vmem:[%s14668_s2 + $0x9d8] sm:$0xf]  ;;  %v6529_v46 = vor.u32 %v9143_v29, %v6528_v28  ;;  %v9035_v51 = vld [vmem:[%s14668_s2 + $0xdc] sm:$0xf] }
 0x182   :  { %v9327_v61 = vld [vmem:[%s14668_s2 + $0x9f4] sm:$0xf0]  ;;  %3031 = vmatpush.bf16.msrb.mxu2 %v6849_v21  ;;  %3019 = vmatpush.bf16.msra.mxu0 %v6561_v13  ;;  %v9115_v13 = vld [vmem:[%s14668_s2 + $0x35c] sm:$0xf] }
 0x183   :  { %v6272_v37 = vld [vmem:[%s14668_s2 + $0x218] sm:$0xf]  ;;  %v7265_v47 = vor.u32 %v9327_v61, %v7264_v30  ;;  %v6181_v61 = vor.u32 %v9051_v58, %v6178_v25  ;;  %v6437_v32 = vor.u32 %v9115_v13, %v6434_v26  ;;  %v6082_v15 = vld [vmem:[%s14668_s2 + $0xb8] sm:$0xf0] }
 0x184   :  { %v7552_v38 = vld [vmem:[%s14668_s2 + $0xc18] sm:$0xf]  ;;  %3006 = vmatpush.bf16.msrb.mxu3 %v6305_v35  ;;  %2994 = vmatpush.bf16.msra.mxu1 %v6017_v41  ;;  %v9043_v35 = vld [vmem:[%s14668_s2 + $0x11c] sm:$0xf]  ;;  %v6085_v23 = vor.u32 %v9027_v11, %v6082_v15 }
 0x185   :  { %v9399_v40 = vld [vmem:[%s14668_s2 + $0xc34] sm:$0xf0]  ;;  %v9019_v26 = vld [vmem:[%s14668_s2 + $0x5c] sm:$0xf] }
 0x186   :  { %v9079_v42 = vld [vmem:[%s14668_s2 + $0x234] sm:$0xf0]  ;;  %v7553_v54 = vor.u32 %v9399_v40, %v7552_v38  ;;  %3032 = vmatpush.bf16.msrb.mxu2 %v6817_v36  ;;  %3020 = vmatpush.bf16.msra.mxu0 %v6529_v46  ;;  %v9107_v38 = vld [vmem:[%s14668_s2 + $0x31c] sm:$0xf] }
 0x187   :  { %v6784_v43 = vld [vmem:[%s14668_s2 + $0x618] sm:$0xf]  ;;  %v6273_v62 = vor.u32 %v9079_v42, %v6272_v37  ;;  %2995 = vmatmul.bf16.vlgmr.msra.gmra.mxu1 %v10031_v57  ;;  %v6146_v37 = vld [vmem:[%s14668_s2 + $0x138] sm:$0xf0] }
 0x188   :  { %v9207_v44 = vld [vmem:[%s14668_s2 + $0x634] sm:$0xf0]  ;;  %3039 = vmatpush.bf16.msrb.mxu1 %v7265_v47  ;;  %v6402_v40 = vld [vmem:[%s14668_s2 + $0x338] sm:$0xf0]  ;;  %v6149_v46 = vor.u32 %v9043_v35, %v6146_v37 }
 0x189   :  { %v7520_v49 = vld [vmem:[%s14668_s2 + $0xbd8] sm:$0xf]  ;;  %v6785_v0 = vor.u32 %v9207_v44, %v6784_v43  ;;  %3007 = vmatpush.bf16.msrb.mxu3 %v6273_v62  ;;  %3021 = vmatmul.bf16.vlgmr.msra.gmra.mxu0 %v10020_v53  ;;  %v2788_v43 = vpop.f32.mrf.mxu0  ;;  %v6405_v47 = vor.u32 %v9107_v38, %v6402_v40  ;;  %v6370_v62 = vld [vmem:[%s14668_s2 + $0x2f8] sm:$0xf0] }
 0x18a   :  { %v9391_v50 = vld [vmem:[%s14668_s2 + $0xbf4] sm:$0xf0]  ;;  %3072 = vmatpush.bf16.msrb.mxu0 %v7553_v54  ;;  %v2751_v54 = vpop.f32.mrf.mxu1  ;;  %v6754_v37 = vld [vmem:[%s14668_s2 + $0x5f8] sm:$0xf0] }
 0x18b   :  { %v7232_v63 = vld [vmem:[%s14668_s2 + $0x998] sm:$0xf]  ;;  %v7521_v3 = vor.u32 %v9391_v50, %v7520_v49  ;;  %3033 = vmatpush.bf16.msrb.mxu2 %v6785_v0  ;;  %v9251_v15 = vld [vmem:[%s14668_s2 + $0x79c] sm:$0xf] }
 0x18c   :  { %v9319_v2 = vld [vmem:[%s14668_s2 + $0x9b4] sm:$0xf0]  ;;  %3008 = vmatmul.bf16.vlgmr.msrb.gmra.mxu3 %v10061_v9 }
 0x18d   :  { %v7488_v6 = vld [vmem:[%s14668_s2 + $0xb98] sm:$0xf]  ;;  %v7233_v10 = vor.u32 %v9319_v2, %v7232_v63  ;;  %3052 = vmatpush.bf16.msra.mxu3 %v7521_v3  ;;  %v2762_v2 = vpop.f32.mrf.mxu3  ;;  %v2775_v3 = vpop.f32.mrf.mxu2 }
 0x18e   :  { %v9383_v7 = vld [vmem:[%s14668_s2 + $0xbb4] sm:$0xf0]  ;;  %3091 = vmatpush.bf16.msra.mxu0 %v6501_v5  ;;  %3034 = vmatmul.bf16.vlgmr.msrb.gmra.mxu2 %v10033_v60  ;;  %v2763_v5 = vadd.f32 %v2762_v2, %v2750_v27  ;;  %v7522_v2 = vld [vmem:[%s14668_s2 + $0xbf8] sm:$0xf0] }
 0x18f   :  { %v7200_v16 = vld [vmem:[%s14668_s2 + $0x958] sm:$0xf]  ;;  %v7489_v1 = vor.u32 %v9383_v7, %v7488_v6  ;;  %3078 = vmatpush.bf16.msra.mxu2 %v6245_v4  ;;  %3040 = vmatpush.bf16.msrb.mxu1 %v7233_v10  ;;  %v6117_v6 = vor.u32 %v9035_v51, %v6114_v56  ;;  %v6373_v7 = vor.u32 %v9099_v59, %v6370_v62  ;;  %v6274_v51 = vld [vmem:[%s14668_s2 + $0x238] sm:$0xf0] }
 0x190   :  { %v9311_v18 = vld [vmem:[%s14668_s2 + $0x974] sm:$0xf0]  ;;  %v7010_v56 = vld [vmem:[%s14668_s2 + $0x7f8] sm:$0xf0] }
 0x191   :  { %v7456_v21 = vld [vmem:[%s14668_s2 + $0xb58] sm:$0xf]  ;;  %v7201_v24 = vor.u32 %v9311_v18, %v7200_v16  ;;  %3053 = vmatpush.bf16.msra.mxu3 %v7489_v1  ;;  %v9091_v16 = vld [vmem:[%s14668_s2 + $0x29c] sm:$0xf]  ;;  %v2776_v1 = vadd.f32 %v2775_v3, %v2763_v5 }
 0x192   :  { %v9375_v22 = vld [vmem:[%s14668_s2 + $0xb74] sm:$0xf0]  ;;  %3092 = vmatpush.bf16.msra.mxu0 %v6469_v20  ;;  %v6338_v18 = vld [vmem:[%s14668_s2 + $0x2b8] sm:$0xf0]  ;;  %v2801_v27 = vpop.f32.mrf.mxu1 }
 0x193   :  { %v7168_v28 = vld [vmem:[%s14668_s2 + $0x918] sm:$0xf]  ;;  %v7457_v30 = vor.u32 %v9375_v22, %v7456_v21  ;;  %3079 = vmatpush.bf16.msra.mxu2 %v6213_v19  ;;  %3041 = vmatpush.bf16.msrb.mxu1 %v7201_v24  ;;  %v2790_v21 = vpop.f32.mrf.mxu0  ;;  %v2789_v58 = vadd.f32 %v2788_v43, %v2776_v1  ;;  %v6341_v24 = vor.u32 %v9091_v16, %v6338_v18  ;;  %v9323_v59 = vld [vmem:[%s14668_s2 + $0x9dc] sm:$0xf] }
 0x194   :  { %v9303_v29 = vld [vmem:[%s14668_s2 + $0x934] sm:$0xf0]  ;;  %v6722_v5 = vld [vmem:[%s14668_s2 + $0x5b8] sm:$0xf0] }
 0x195   :  { %v7424_v17 = vld [vmem:[%s14668_s2 + $0xb18] sm:$0xf]  ;;  %v7169_v36 = vor.u32 %v9303_v29, %v7168_v28  ;;  %3054 = vmatpush.bf16.msra.mxu3 %v7457_v30  ;;  %v6050_v29 = vld [vmem:[%s14668_s2 + $0x78] sm:$0xf0]  ;;  %v2777_v38 = vpop.f32.mrf.mxu2  ;;  %v2764_v40 = vpop.f32.mrf.mxu3 }
 0x196   :  { %v9367_v33 = vld [vmem:[%s14668_s2 + $0xb34] sm:$0xf0]  ;;  %3093 = vmatpush.bf16.msra.mxu0 %v6437_v32  ;;  %v9083_v30 = vld [vmem:[%s14668_s2 + $0x25c] sm:$0xf]  ;;  %v12031_v32 = vadd.f32 %v2801_v27, %v2789_v58 }
 0x197   :  { %v7136_v41 = vld [vmem:[%s14668_s2 + $0x8d8] sm:$0xf]  ;;  %v7425_v44 = vor.u32 %v9367_v33, %v7424_v17  ;;  %3080 = vmatpush.bf16.msra.mxu2 %v6181_v61  ;;  %3042 = vmatpush.bf16.msrb.mxu1 %v7169_v36  ;;  %v6306_v61 = vld [vmem:[%s14668_s2 + $0x278] sm:$0xf0] }
 0x198   :  { %v9295_v42 = vld [vmem:[%s14668_s2 + $0x8f4] sm:$0xf0]  ;;  %v9195_v36 = vld [vmem:[%s14668_s2 + $0x5dc] sm:$0xf]  ;;  %vm3172_vm4 = vcmp.ge.f32.partialorder %v12031_v32, 0.0 }
 0x199   :  { %v7392_v49 = vld [vmem:[%s14668_s2 + $0xad8] sm:$0xf]  ;;  %v7137_v55 = vor.u32 %v9295_v42, %v7136_v41  ;;  %3055 = vmatpush.bf16.msra.mxu3 %v7425_v44  ;;  %7564 = vmatmul.msk.bf16.vlgmr.msrb.gmra.mxu0 %vm2437_vm0, %v10140_v48  ;;  %v6053_v41 = vor.u32 %v9019_v26, %v6050_v29  ;;  %v6309_v42 = vor.u32 %v9083_v30, %v6306_v61  ;;  %v6978_v16 = vld [vmem:[%s14668_s2 + $0x7b8] sm:$0xf0] }
 0x19a   :  { %v9359_v50 = vld [vmem:[%s14668_s2 + $0xaf4] sm:$0xf0]  ;;  %3094 = vmatpush.bf16.msra.mxu0 %v6405_v47  ;;  %v6757_v54 = vor.u32 %v9195_v36, %v6754_v37  ;;  %v9315_v18 = vld [vmem:[%s14668_s2 + $0x99c] sm:$0xf] }
 0x19b   :  { %v7104_v0 = vld [vmem:[%s14668_s2 + $0x898] sm:$0xf]  ;;  %v7393_v4 = vor.u32 %v9359_v50, %v7392_v49  ;;  %3081 = vmatpush.bf16.msra.mxu2 %v6149_v46  ;;  %3043 = vmatpush.bf16.msrb.mxu1 %v7137_v55  ;;  %v9011_v46 = vld [vmem:[%s14668_s2 + $0x1c] sm:$0xf] }
 0x19c   :  { %v9287_v63 = vld [vmem:[%s14668_s2 + $0x8b4] sm:$0xf0]  ;;  %v6018_v49 = vld [vmem:[%s14668_s2 + $0x38] sm:$0xf0] }
 0x19d   :  { %v7360_v8 = vld [vmem:[%s14668_s2 + $0xa98] sm:$0xf]  ;;  %v7105_v14 = vor.u32 %v9287_v63, %v7104_v0  ;;  %3056 = vmatpush.bf16.msra.mxu3 %v7393_v4  ;;  %v9075_v50 = vld [vmem:[%s14668_s2 + $0x21c] sm:$0xf]  ;;  %v6021_v3 = vor.u32 %v9011_v46, %v6018_v49 }
 0x19e   :  { %v9351_v10 = vld [vmem:[%s14668_s2 + $0xab4] sm:$0xf0]  ;;  %3095 = vmatpush.bf16.msra.mxu0 %v6373_v7  ;;  %v9259_v55 = vld [vmem:[%s14668_s2 + $0x7dc] sm:$0xf]  ;;  %v6277_v7 = vor.u32 %v9075_v50, %v6274_v51 }
 0x19f   :  { %v7072_v19 = vld [vmem:[%s14668_s2 + $0x858] sm:$0xf]  ;;  %v7361_v22 = vor.u32 %v9351_v10, %v7360_v8  ;;  %3082 = vmatpush.bf16.msra.mxu2 %v6117_v6  ;;  %3044 = vmatpush.bf16.msrb.mxu1 %v7105_v14  ;;  %v7266_v0 = vld [vmem:[%s14668_s2 + $0x9f8] sm:$0xf0]  ;;  %v3177_v6 = vmul.f32 0.2, %v11129_v31  ;;  %v7013_v8 = vor.u32 %v9259_v55, %v7010_v56  ;;  %v2803_v10 = vpop.f32.mrf.mxu1 }
 0x1a0   :  { %v9279_v20 = vld [vmem:[%s14668_s2 + $0x874] sm:$0xf0]  ;;  %v9387_v63 = vld [vmem:[%s14668_s2 + $0xbdc] sm:$0xf]  ;;  %v7269_v11 = vor.u32 %v9323_v59, %v7266_v0 }
 0x1a1   :  { %v7328_v25 = vld [vmem:[%s14668_s2 + $0xa58] sm:$0xf]  ;;  %v7073_v28 = vor.u32 %v9279_v20, %v7072_v19  ;;  %3057 = vmatpush.bf16.msra.mxu3 %v7361_v22  ;;  %v9187_v4 = vld [vmem:[%s14668_s2 + $0x59c] sm:$0xf]  ;;  %v7525_v14 = vor.u32 %v9387_v63, %v7522_v2  ;;  %v3178_v22 = vmul.f32 0.2, %v11467_v52  ;;  %v3185_v61 = vsel %vm3169_vm1, %v11129_v31, %v3177_v6  ;;  %v12189_v63 = vpop.f32.mrf.mxu0 }
 0x1a2   :  { %v9343_v13 = vld [vmem:[%s14668_s2 + $0xa74] sm:$0xf0]  ;;  %3096 = vmatpush.bf16.msra.mxu0 %v6341_v24  ;;  %v6725_v1 = vor.u32 %v9187_v4, %v6722_v5  ;;  %v7234_v19 = vld [vmem:[%s14668_s2 + $0x9b8] sm:$0xf0]  ;;  %v3193_v24 = vlaneseq  ;;  %v12202_v5 = vstv %s3215_s20 }
 0x1a3   :  { %v7040_v17 = vld [vmem:[%s14668_s2 + $0x818] sm:$0xf]  ;;  %v7329_v35 = vor.u32 %v9343_v13, %v7328_v25  ;;  %3083 = vmatpush.bf16.msra.mxu2 %v6085_v23  ;;  %3045 = vmatpush.bf16.msrb.mxu1 %v7073_v28  ;;  %v9379_v20 = vld [vmem:[%s14668_s2 + $0xb9c] sm:$0xf]  ;;  %v3179_v25 = vmul.f32 0.2, %v11796_v12  ;;  %v6981_v13 = vor.u32 %v9251_v15, %v6978_v16  ;;  %v7237_v26 = vor.u32 %v9315_v18, %v7234_v19 }
 0x1a4   :  { %v9271_v33 = vld [vmem:[%s14668_s2 + $0x834] sm:$0xf0]  ;;  %v7490_v21 = vld [vmem:[%s14668_s2 + $0xbb8] sm:$0xf0]  ;;  %v3186_v31 = vsel %vm3170_vm2, %v11467_v52, %v3178_v22  ;;  %v12153_v40 = vshrl.u32 %v3193_v24, 7 }
 0x1a5   :  { %v7296_v43 = vld [vmem:[%s14668_s2 + $0xa18] sm:$0xf]  ;;  %v7041_v47 = vor.u32 %v9271_v33, %v7040_v17  ;;  %3058 = vmatpush.bf16.msra.mxu3 %v7329_v35  ;;  %v9179_v58 = vld [vmem:[%s14668_s2 + $0x55c] sm:$0xf]  ;;  %v7493_v27 = vor.u32 %v9379_v20, %v7490_v21  ;;  %v12172_v49 = vmul.f32 1.4285715, %v3186_v31  ;;  %v3187_v56 = vsel %vm3171_vm3, %v11796_v12, %v3179_v25  ;;  %v2814_v21 = vpop.f32.mrf.mxu3  ;;  %v2840_v25 = vpop.f32.mrf.mxu2 }
 0x1a6   :  { %v9335_v44 = vld [vmem:[%s14668_s2 + $0xa34] sm:$0xf0]  ;;  %3097 = vmatpush.bf16.msra.mxu0 %v6309_v42  ;;  %v6690_v23 = vld [vmem:[%s14668_s2 + $0x578] sm:$0xf0]  ;;  %v12192_v2 = vmul.u32 1024, %v12153_v40  ;;  %v441_v12 = vperm.slane %v11762_v45, 4 }
 0x1a7   :  { %v7297_v62 = vor.u32 %v9335_v44, %v7296_v43  ;;  %3084 = vmatpush.bf16.msra.mxu2 %v6053_v41  ;;  %3046 = vmatpush.bf16.msrb.mxu1 %v7041_v47  ;;  %v9243_v28 = vld [vmem:[%s14668_s2 + $0x75c] sm:$0xf]  ;;  %v6693_v17 = vor.u32 %v9179_v58, %v6690_v23  ;;  %v12155_v41 = vand.u32 127, %v3193_v24  ;;  %v12164_v44 = vmul.f32 1.4285715, %v3185_v61  ;;  %v2827_v55 = vpop.f32.mrf.mxu1 }
 0x1a8   :  { %v6946_v29 = vld [vmem:[%s14668_s2 + $0x778] sm:$0xf0]  ;;  %v12231_v20 = vmul.f32 1.4285715, %v3187_v56  ;;  %v2815_v24 = vadd.f32 %v2814_v21, %v441_v12 }
 0x1a9   :  { %3059 = vmatpush.bf16.msra.mxu3 %v7297_v62  ;;  %v9307_v30 = vld [vmem:[%s14668_s2 + $0x95c] sm:$0xf]  ;;  %v6949_v52 = vor.u32 %v9243_v28, %v6946_v29  ;;  %v12205_v6 = vadd.s32 256, %v12155_v41 }
 0x1aa   :  { %3047 = vmatmul.bf16.vlgmr.msrb.gmra.mxu1 %v10228_v34  ;;  %3098 = vmatpush.bf16.msra.mxu0 %v6277_v7  ;;  %v7202_v33 = vld [vmem:[%s14668_s2 + $0x978] sm:$0xf0] }
 0x1ab   :  { %3104 = vmatpush.bf16.msra.mxu1 %v6757_v54  ;;  %3085 = vmatpush.bf16.msra.mxu2 %v6021_v3  ;;  %v9371_v35 = vld [vmem:[%s14668_s2 + $0xb5c] sm:$0xf]  ;;  %v12195_v3 = vadd.s32 128, %v12155_v41  ;;  %v3209_v19 = vadd.s32 %v12192_v2, %v12205_v6 }
 0x1ac   :  { %3060 = vmatmul.bf16.vlgmr.msra.gmra.mxu3 %v10239_v39  ;;  %v7458_v36 = vld [vmem:[%s14668_s2 + $0xb78] sm:$0xf0] }
 0x1ad   :  { %3117 = vmatpush.bf16.msrb.mxu3 %v7013_v8  ;;  %v9171_v37 = vld [vmem:[%s14668_s2 + $0x51c] sm:$0xf]  ;;  %3099 = vmatmul.bf16.vlgmr.msra.gmra.mxu0 %v10061_v9  ;;  %v7461_v9 = vor.u32 %v9371_v35, %v7458_v36  ;;  %v3219_v28 = vxor.u32 %v12202_v5, %v3209_v19  ;;  %v2828_v35 = vadd.f32 %v2827_v55, %v2815_v24 }
 0x1ae   :  { %3143 = vmatpush.bf16.msrb.mxu0 %v7525_v14  ;;  %v6658_v38 = vld [vmem:[%s14668_s2 + $0x538] sm:$0xf0]  ;;  %3086 = vmatmul.bf16.vlgmr.msra.gmra.mxu2 %v10031_v57  ;;  %v7205_v57 = vor.u32 %v9307_v30, %v7202_v33  ;;  %v3208_v14 = vadd.s32 %v12192_v2, %v12195_v3  ;;  %v12252_v33 = vadd.s32 384, %v12155_v41 }
 0x1af   :  { %3130 = vmatpush.bf16.msrb.mxu2 %v7269_v11  ;;  %3105 = vmatpush.bf16.msra.mxu1 %v6725_v1  ;;  %v9235_v42 = vld [vmem:[%s14668_s2 + $0x71c] sm:$0xf]  ;;  %v6661_v50 = vor.u32 %v9171_v37, %v6658_v38  ;;  %v3207_v11 = vadd.s32 %v12192_v2, %v12155_v41 }
 0x1b0   :  { %v6914_v43 = vld [vmem:[%s14668_s2 + $0x738] sm:$0xf0] }
 0x1b1   :  { %3118 = vmatpush.bf16.msrb.mxu3 %v6981_v13  ;;  %v9299_v46 = vld [vmem:[%s14668_s2 + $0x91c] sm:$0xf]  ;;  %v6917_v59 = vor.u32 %v9235_v42, %v6914_v43  ;;  %v3217_v23 = vxor.u32 %v12202_v5, %v3207_v11  ;;  %v2816_v11 = vpop.f32.mrf.mxu3 }
 0x1b2   :  { %3144 = vmatpush.bf16.msrb.mxu0 %v7493_v27  ;;  %v7170_v47 = vld [vmem:[%s14668_s2 + $0x938] sm:$0xf0]  ;;  %v3218_v27 = vxor.u32 %v12202_v5, %v3208_v14 }
 0x1b3   :  { %3131 = vmatpush.bf16.msrb.mxu2 %v7237_v26  ;;  %3106 = vmatpush.bf16.msra.mxu1 %v6693_v17  ;;  %v9363_v51 = vld [vmem:[%s14668_s2 + $0xb1c] sm:$0xf]  ;;  %v7173_v4 = vor.u32 %v9299_v46, %v7170_v47  ;;  %v2841_v46 = vadd.f32 %v2840_v25, %v2828_v35  ;;  %v9430_v35 = vld [vmem:[%s14672_s4 + $0xec] sm:$0xf0] }
 0x1b4   :  { %v7426_v54 = vld [vmem:[%s14668_s2 + $0xb38] sm:$0xf0] }
 0x1b5   :  { %v9163_v62 = vld [vmem:[%s14668_s2 + $0x4dc] sm:$0xf]  ;;  %3119 = vmatpush.bf16.msrb.mxu3 %v6949_v52  ;;  %v7429_v7 = vor.u32 %v9363_v51, %v7426_v54  ;;  %v2829_v52 = vpop.f32.mrf.mxu1  ;;  %v3227_v51 = vxor.u32 608135816, %v3219_v28 }
 0x1b6   :  { %v6626_v0 = vld [vmem:[%s14668_s2 + $0x4f8] sm:$0xf0]  ;;  %3145 = vmatpush.bf16.msrb.mxu0 %v7461_v9  ;;  %v3225_v9 = vxor.u32 608135816, %v3217_v23  ;;  %v7960_v52 = vld [vmem:[%s14672_s4 + $0x2e0] sm:$0xf] }
 0x1b7   :  { %3132 = vmatpush.bf16.msrb.mxu2 %v7205_v57  ;;  %v9227_v8 = vld [vmem:[%s14668_s2 + $0x6dc] sm:$0xf]  ;;  %3107 = vmatpush.bf16.msra.mxu1 %v6661_v50  ;;  %v6629_v15 = vor.u32 %v9163_v62, %v6626_v0  ;;  %v2855_v57 = vpop.f32.mrf.mxu0  ;;  %v3226_v50 = vxor.u32 608135816, %v3218_v27  ;;  %v3210_v0 = vadd.s32 %v12192_v2, %v12252_v33  ;;  %v7568_v21 = vshrl.u32 %v3227_v51, 16 }
 0x1b8   :  { %v6882_v45 = vld [vmem:[%s14668_s2 + $0x6f8] sm:$0xf0]  ;;  %v7566_v14 = vshrl.u32 %v3225_v9, 16 }
 0x1b9   :  { %v9291_v10 = vld [vmem:[%s14668_s2 + $0x8dc] sm:$0xf]  ;;  %3120 = vmatpush.bf16.msrb.mxu3 %v6917_v59  ;;  %v6885_v13 = vor.u32 %v9227_v8, %v6882_v45 }
 0x1ba   :  { %v7138_v16 = vld [vmem:[%s14668_s2 + $0x8f8] sm:$0xf0]  ;;  %3146 = vmatpush.bf16.msrb.mxu0 %v7429_v7 }
 0x1bb   :  { %v9355_v18 = vld [vmem:[%s14668_s2 + $0xadc] sm:$0xf]  ;;  %3133 = vmatpush.bf16.msrb.mxu2 %v7173_v4  ;;  %v7141_v29 = vor.u32 %v9291_v10, %v7138_v16  ;;  %3108 = vmatpush.bf16.msra.mxu1 %v6629_v15  ;;  %v12281_v4 = vadd.f32 %v12189_v63, %v2841_v46  ;;  %v7567_v15 = vshrl.u32 %v3226_v50, 16  ;;  %v2842_v16 = vpop.f32.mrf.mxu2  ;;  %v9526_v46 = vld [vmem:[%s14672_s4 + $0x3ec] sm:$0xf0] }
 0x1bc   :  { %v7394_v1 = vld [vmem:[%s14668_s2 + $0xaf8] sm:$0xf0] }
 0x1bd   :  { %v9155_v22 = vld [vmem:[%s14668_s2 + $0x49c] sm:$0xf]  ;;  %v7397_v30 = vor.u32 %v9355_v18, %v7394_v1  ;;  %3121 = vmatpush.bf16.msrb.mxu3 %v6885_v13  ;;  %v3220_v13 = vxor.u32 %v12202_v5, %v3210_v0  ;;  %v7816_v0 = vld [vmem:[%s14672_s4 + $0x1c0] sm:$0xf] }
 0x1be   :  { %v6594_v58 = vld [vmem:[%s14668_s2 + $0x4b8] sm:$0xf0] }
 0x1bf   :  { %v9219_v26 = vld [vmem:[%s14668_s2 + $0x69c] sm:$0xf]  ;;  %v6597_v36 = vor.u32 %v9155_v22, %v6594_v58  ;;  %3134 = vmatpush.bf16.msrb.mxu2 %v7141_v29  ;;  %3147 = vmatpush.bf16.msrb.mxu0 %v7397_v30  ;;  %v12323_v30 = vxor.u32 %v7566_v14, %v3225_v9  ;;  %v8088_v9 = vld [vmem:[%s14672_s4 + $0x3e0] sm:$0xf] }
 0x1c0   :  { %v6850_v61 = vld [vmem:[%s14668_s2 + $0x6b8] sm:$0xf0]  ;;  %v8072_v14 = vld [vmem:[%s14672_s4 + $0x3c0] sm:$0xf] }
 0x1c1   :  { %v9283_v17 = vld [vmem:[%s14668_s2 + $0x89c] sm:$0xf]  ;;  %v6853_v47 = vor.u32 %v9219_v26, %v6850_v61  ;;  %3109 = vmatpush.bf16.msra.mxu1 %v6597_v36  ;;  %v7832_v36 = vld [vmem:[%s14672_s4 + $0x1e0] sm:$0xf] }
 0x1c2   :  { %v7106_v31 = vld [vmem:[%s14668_s2 + $0x8b8] sm:$0xf0] }
 0x1c3   :  { %v9347_v37 = vld [vmem:[%s14668_s2 + $0xa9c] sm:$0xf]  ;;  %v7109_v54 = vor.u32 %v9283_v17, %v7106_v31  ;;  %3122 = vmatpush.bf16.msrb.mxu3 %v6853_v47  ;;  %v7704_v17 = vld [vmem:[%s14672_s4 + $0xe0] sm:$0xf]  ;;  %v12334_v31 = vxor.u32 %v7567_v15, %v3226_v50  ;;  %v3228_v47 = vxor.u32 608135816, %v3220_v13 }
 0x1c4   :  { %v7362_v38 = vld [vmem:[%s14668_s2 + $0xab8] sm:$0xf0]  ;;  %v9522_v15 = vld [vmem:[%s14672_s4 + $0x3cc] sm:$0xf0] }
 0x1c5   :  { %v9147_v42 = vld [vmem:[%s14668_s2 + $0x45c] sm:$0xf]  ;;  %v7365_v55 = vor.u32 %v9347_v37, %v7362_v38  ;;  %3135 = vmatpush.bf16.msrb.mxu2 %v7109_v54  ;;  %v9462_v38 = vld [vmem:[%s14672_s4 + $0x1ec] sm:$0xf0]  ;;  %v7705_v54 = vor.u32 %v9430_v35, %v7704_v17  ;;  %v7569_v16 = vshrl.u32 %v3228_v47, 16  ;;  %v8073_v13 = vor.u32 %v9522_v15, %v8072_v14 }
 0x1c6   :  { %v6562_v43 = vld [vmem:[%s14668_s2 + $0x478] sm:$0xf0]  ;;  %v7896_v15 = vld [vmem:[%s14672_s4 + $0x260] sm:$0xf] }
 0x1c7   :  { %v9211_v56 = vld [vmem:[%s14668_s2 + $0x65c] sm:$0xf]  ;;  %v6565_v12 = vor.u32 %v9147_v42, %v6562_v43  ;;  %3148 = vmatpush.bf16.msrb.mxu0 %v7365_v55  ;;  %v9494_v42 = vld [vmem:[%s14672_s4 + $0x2ec] sm:$0xf0]  ;;  %v12345_v43 = vxor.u32 %v7568_v21, %v3227_v51  ;;  %v7688_v51 = vld [vmem:[%s14672_s4 + $0xc0] sm:$0xf] }
 0x1c8   :  { %v6818_v59 = vld [vmem:[%s14668_s2 + $0x678] sm:$0xf0]  ;;  %v9426_v55 = vld [vmem:[%s14672_s4 + $0xcc] sm:$0xf0] }
 0x1c9   :  { %v9275_v62 = vld [vmem:[%s14668_s2 + $0x85c] sm:$0xf]  ;;  %v6821_v18 = vor.u32 %v9211_v56, %v6818_v59  ;;  %3110 = vmatpush.bf16.msra.mxu1 %v6565_v12  ;;  %v3257_v56 = vmul.u32 2246822507, %v12323_v30  ;;  %v7833_v59 = vor.u32 %v9462_v38, %v7832_v36  ;;  %v9458_v12 = vld [vmem:[%s14672_s4 + $0x1cc] sm:$0xf0] }
 0x1ca   :  { %v7074_v7 = vld [vmem:[%s14668_s2 + $0x878] sm:$0xf0]  ;;  %v3259_v11 = vmul.u32 2246822507, %v12345_v43  ;;  %v7817_v21 = vor.u32 %v9458_v12, %v7816_v0  ;;  %v9450_v38 = vld [vmem:[%s14672_s4 + $0x18c] sm:$0xf0]  ;;  %v12453_v0 = vpop.f32.mrf.mxu0 }
 0x1cb   :  { %v9339_v8 = vld [vmem:[%s14668_s2 + $0xa5c] sm:$0xf]  ;;  %v7077_v22 = vor.u32 %v9275_v62, %v7074_v7  ;;  %3123 = vmatpush.bf16.msrb.mxu3 %v6821_v18  ;;  %v7961_v62 = vor.u32 %v9494_v42, %v7960_v52  ;;  %v3258_v7 = vmul.u32 2246822507, %v12334_v31  ;;  %v7689_v18 = vor.u32 %v9426_v55, %v7688_v51  ;;  %v9514_v55 = vld [vmem:[%s14672_s4 + $0x38c] sm:$0xf0] }
 0x1cc   :  { %v7330_v45 = vld [vmem:[%s14668_s2 + $0xa78] sm:$0xf0]  ;;  %v3202_v43 = vadd.s32 512, %v12155_v41 }
 0x1cd   :  { %v9139_v10 = vld [vmem:[%s14668_s2 + $0x41c] sm:$0xf]  ;;  %v7333_v58 = vor.u32 %v9339_v8, %v7330_v45  ;;  %3136 = vmatpush.bf16.msrb.mxu2 %v7077_v22  ;;  %v8089_v8 = vor.u32 %v9526_v46, %v8088_v9  ;;  %v7944_v45 = vld [vmem:[%s14672_s4 + $0x2c0] sm:$0xf]  ;;  %v9482_v46 = vld [vmem:[%s14672_s4 + $0x28c] sm:$0xf0] }
 0x1ce   :  { %v6530_v63 = vld [vmem:[%s14668_s2 + $0x438] sm:$0xf0]  ;;  %v7912_v9 = vld [vmem:[%s14672_s4 + $0x280] sm:$0xf]  ;;  %v3211_v12 = vadd.s32 %v12192_v2, %v3202_v43 }
 0x1cf   :  { %v9395_v1 = vld [vmem:[%s14668_s2 + $0xc1c] sm:$0xf]  ;;  %v6533_v26 = vor.u32 %v9139_v10, %v6530_v63  ;;  %3149 = vmatpush.bf16.msrb.mxu0 %v7333_v58  ;;  %v9490_v10 = vld [vmem:[%s14672_s4 + $0x2cc] sm:$0xf0]  ;;  %v12373_v63 = vpop.f32.mrf.mxu2  ;;  %v7800_v58 = vld [vmem:[%s14672_s4 + $0x1a0] sm:$0xf]  ;;  %v7913_v14 = vor.u32 %v9482_v46, %v7912_v9 }
 0x1d0   :  { %v7554_v19 = vld [vmem:[%s14668_s2 + $0xc38] sm:$0xf0]  ;;  %v7945_v22 = vor.u32 %v9490_v10, %v7944_v45  ;;  %v9446_v45 = vld [vmem:[%s14672_s4 + $0x16c] sm:$0xf0] }
 0x1d1   :  { %v9203_v23 = vld [vmem:[%s14668_s2 + $0x61c] sm:$0xf]  ;;  %v7557_v61 = vor.u32 %v9395_v1, %v7554_v19  ;;  %3111 = vmatpush.bf16.msra.mxu1 %v6533_v26  ;;  %v7672_v1 = vld [vmem:[%s14672_s4 + $0xa0] sm:$0xf]  ;;  %v7574_v19 = vshrl.u32 %v3257_v56, 13 }
 0x1d2   :  { %v6786_v24 = vld [vmem:[%s14668_s2 + $0x638] sm:$0xf0]  ;;  %v7928_v26 = vld [vmem:[%s14672_s4 + $0x2a0] sm:$0xf]  ;;  %v2907_v43 = vpop.f32.mrf.mxu0 }
 0x1d3   :  { %v9267_v25 = vld [vmem:[%s14668_s2 + $0x81c] sm:$0xf]  ;;  %v6789_v37 = vor.u32 %v9203_v23, %v6786_v24  ;;  %v9454_v23 = vld [vmem:[%s14672_s4 + $0x1ac] sm:$0xf0]  ;;  %v7575_v24 = vshrl.u32 %v3258_v7, 13  ;;  %v12418_v36 = vxor.u32 %v7574_v19, %v3257_v56 }
 0x1d4   :  { %v7042_v27 = vld [vmem:[%s14668_s2 + $0x838] sm:$0xf0]  ;;  %3112 = vmatmul.bf16.vlgmr.msra.gmra.mxu1 %v10020_v53  ;;  %v9422_v53 = vld [vmem:[%s14672_s4 + $0xac] sm:$0xf0]  ;;  %v7801_v35 = vor.u32 %v9454_v23, %v7800_v58  ;;  %v7640_v56 = vld [vmem:[%s14672_s4 + $0x60] sm:$0xf] }
 0x1d5   :  { %v9331_v28 = vld [vmem:[%s14668_s2 + $0xa1c] sm:$0xf]  ;;  %v7045_v57 = vor.u32 %v9267_v25, %v7042_v27  ;;  %3163 = vmatpush.bf16.msrb.mxu1 %v7557_v61  ;;  %3124 = vmatpush.bf16.msrb.mxu3 %v6789_v37  ;;  %v3252_v25 = vxor.u32 %v7569_v16, %v3228_v47  ;;  %v9486_v27 = vld [vmem:[%s14672_s4 + $0x2ac] sm:$0xf0]  ;;  %v3180_v61 = vmul.f32 0.2, %v12031_v32  ;;  %v7673_v17 = vor.u32 %v9422_v53, %v7672_v1 }
 0x1d6   :  { %v7298_v29 = vld [vmem:[%s14668_s2 + $0xa38] sm:$0xf0]  ;;  %v7929_v31 = vor.u32 %v9486_v27, %v7928_v26  ;;  %v7784_v37 = vld [vmem:[%s14672_s4 + $0x180] sm:$0xf]  ;;  %v12426_v52 = vxor.u32 %v7575_v24, %v3258_v7  ;;  %v3289_v10 = vmul.u32 3266489909, %v12418_v36  ;;  %v3221_v24 = vxor.u32 %v12202_v5, %v3211_v12 }
 0x1d7   :  { %v7301_v50 = vor.u32 %v9331_v28, %v7298_v29  ;;  %3137 = vmatpush.bf16.msrb.mxu2 %v7045_v57  ;;  %v7576_v28 = vshrl.u32 %v3259_v11, 13  ;;  %v8056_v29 = vld [vmem:[%s14672_s4 + $0x3a0] sm:$0xf]  ;;  %v3260_v30 = vmul.u32 2246822507, %v3252_v25  ;;  %v3203_v25 = vadd.s32 640, %v12155_v41 }
 0x1d8   :  { %3125 = vmatmul.bf16.vlgmr.msrb.gmra.mxu3 %v10033_v60  ;;  %v9518_v60 = vld [vmem:[%s14672_s4 + $0x3ac] sm:$0xf0]  ;;  %v8040_v47 = vld [vmem:[%s14672_s4 + $0x380] sm:$0xf] }
 0x1d9   :  { %3150 = vmatpush.bf16.msrb.mxu0 %v7301_v50  ;;  %4907 = vmatpush.bf16.msra.mxu3 %v7705_v54  ;;  %v7577_v42 = vshrl.u32 %v3260_v30, 13  ;;  %v8057_v57 = vor.u32 %v9518_v60, %v8056_v29  ;;  %v12438_v50 = vpop.f32.mrf.mxu1  ;;  %v2894_v54 = vpop.f32.mrf.mxu2  ;;  %v12440_v51 = vxor.u32 %v7576_v28, %v3259_v11  ;;  %v7785_v11 = vor.u32 %v9450_v38, %v7784_v37  ;;  %v9478_v16 = vld [vmem:[%s14672_s4 + $0x26c] sm:$0xf0]  ;;  %v8024_v53 = vld [vmem:[%s14672_s4 + $0x360] sm:$0xf] }
 0x1da   :  { %4920 = vmatpush.bf16.msra.mxu1 %v7833_v59  ;;  %3138 = vmatmul.bf16.vlgmr.msrb.gmra.mxu2 %v10228_v34  ;;  %v7656_v34 = vld [vmem:[%s14672_s4 + $0x80] sm:$0xf]  ;;  %v9414_v59 = vld [vmem:[%s14672_s4 + $0x6c] sm:$0xf0]  ;;  %v8041_v1 = vor.u32 %v9514_v55, %v8040_v47  ;;  %v7582_v29 = vshrl.u32 %v3289_v10, 16 }
 0x1db   :  { %4933 = vmatpush.bf16.msra.mxu2 %v7961_v62  ;;  %v12451_v62 = vxor.u32 %v7577_v42, %v3260_v30  ;;  %v9510_v19 = vld [vmem:[%s14672_s4 + $0x36c] sm:$0xf0]  ;;  %v7624_v58 = vld [vmem:[%s14672_s4 + $0x40] sm:$0xf]  ;;  %v7641_v26 = vor.u32 %v9414_v59, %v7640_v56  ;;  %v7897_v30 = vor.u32 %v9478_v16, %v7896_v15 }
 0x1dc   :  { %3151 = vmatmul.bf16.vlgmr.msrb.gmra.mxu0 %v10239_v39  ;;  %v9418_v39 = vld [vmem:[%s14672_s4 + $0x8c] sm:$0xf0]  ;;  %v7752_v28 = vld [vmem:[%s14672_s4 + $0x140] sm:$0xf] }
 0x1dd   :  { %4946 = vmatpush.bf16.msra.mxu0 %v8089_v8  ;;  %4908 = vmatpush.bf16.msra.mxu3 %v7689_v18  ;;  %v7657_v7 = vor.u32 %v9418_v39, %v7656_v34  ;;  %v7768_v8 = vld [vmem:[%s14672_s4 + $0x160] sm:$0xf]  ;;  %v3290_v18 = vmul.u32 3266489909, %v12426_v52  ;;  %v3292_v23 = vmul.u32 3266489909, %v12451_v62  ;;  %v8025_v34 = vor.u32 %v9510_v19, %v8024_v53 }
 0x1de   :  { %4921 = vmatpush.bf16.msra.mxu1 %v7817_v21  ;;  %v3291_v21 = vmul.u32 3266489909, %v12440_v51  ;;  %v9410_v27 = vld [vmem:[%s14672_s4 + $0x4c] sm:$0xf0]  ;;  %v7769_v60 = vor.u32 %v9446_v45, %v7768_v8  ;;  %v8008_v36 = vld [vmem:[%s14672_s4 + $0x340] sm:$0xf]  ;;  %v3313_v51 = vxor.u32 %v7582_v29, %v3289_v10 }
 0x1df   :  { %4934 = vmatpush.bf16.msra.mxu2 %v7945_v22  ;;  %v12477_v22 = vpop.f32.mrf.mxu3  ;;  %v9474_v39 = vld [vmem:[%s14672_s4 + $0x24c] sm:$0xf0]  ;;  %v7585_v52 = vshrl.u32 %v3292_v23, 16  ;;  %v7625_v46 = vor.u32 %v9410_v27, %v7624_v58  ;;  %v7608_v54 = vld [vmem:[%s14672_s4 + $0x20] sm:$0xf] }
 0x1e0   :  { %v9506_v38 = vld [vmem:[%s14672_s4 + $0x34c] sm:$0xf0]  ;;  %v7736_v56 = vld [vmem:[%s14672_s4 + $0x120] sm:$0xf] }
 0x1e1   :  { %4947 = vmatpush.bf16.msra.mxu0 %v8073_v13  ;;  %4909 = vmatpush.bf16.msra.mxu3 %v7673_v17  ;;  %v3188_v13 = vsel %vm3172_vm4, %v12031_v32, %v3180_v61  ;;  %v9442_v17 = vld [vmem:[%s14672_s4 + $0x14c] sm:$0xf0]  ;;  %v7880_v32 = vld [vmem:[%s14672_s4 + $0x240] sm:$0xf]  ;;  %v7583_v61 = vshrl.u32 %v3290_v18, 16  ;;  %v2881_v37 = vpop.f32.mrf.mxu1  ;;  %v12512_v42 = vpop.f32.mrf.mxu2  ;;  %v8009_v8 = vor.u32 %v9506_v38, %v8008_v36 }
 0x1e2   :  { %4922 = vmatpush.bf16.msra.mxu1 %v7801_v35  ;;  %v3212_v35 = vadd.s32 %v12192_v2, %v3203_v25  ;;  %v12514_v9 = vmul.f32 1.4285715, %v3188_v13  ;;  %v7753_v47 = vor.u32 %v9442_v17, %v7752_v28  ;;  %v7881_v55 = vor.u32 %v9474_v39, %v7880_v32  ;;  %v9438_v59 = vld [vmem:[%s14672_s4 + $0x12c] sm:$0xf0]  ;;  %v7864_v62 = vld [vmem:[%s14672_s4 + $0x220] sm:$0xf] }
 0x1e3   :  { %4935 = vmatpush.bf16.msra.mxu2 %v7929_v31  ;;  %v7584_v31 = vshrl.u32 %v3291_v21, 16  ;;  %v3314_v12 = vxor.u32 %v7583_v61, %v3290_v18  ;;  %v9470_v45 = vld [vmem:[%s14672_s4 + $0x22c] sm:$0xf0]  ;;  %v7992_v10 = vld [vmem:[%s14672_s4 + $0x320] sm:$0xf]  ;;  %v7737_v13 = vor.u32 %v9438_v59, %v7736_v56 }
 0x1e4   :  { %7565 = vmatmul.msk.bf16.vlgmr.msrb.gmra.mxu1 %vm2437_vm0, %v10140_v48  ;;  %v9406_v48 = vld [vmem:[%s14672_s4 + $0x2c] sm:$0xf0]  ;;  %v7592_v15 = vld [vmem:[%s14672_s4] sm:$0xf]  ;;  %v3321_v25 = vand.u32 2147483647, %v3313_v51 }
 0x1e5   :  { %4948 = vmatpush.bf16.msra.mxu0 %v8057_v57  ;;  %4910 = vmatpush.bf16.msra.mxu3 %v7657_v7  ;;  %v3229_v57 = vxor.u32 608135816, %v3221_v24  ;;  %v3222_v7 = vxor.u32 %v12202_v5, %v3212_v35  ;;  %v9402_v16 = vld [vmem:[%s14672_s4 + $0xc] sm:$0xf0]  ;;  %v7609_v19 = vor.u32 %v9406_v48, %v7608_v54  ;;  %v7720_v58 = vld [vmem:[%s14672_s4 + $0x100] sm:$0xf] }
 0x1e6   :  { %4923 = vmatpush.bf16.msra.mxu1 %v7785_v11  ;;  %v9502_v11 = vld [vmem:[%s14672_s4 + $0x32c] sm:$0xf0]  ;;  %v7848_v24 = vld [vmem:[%s14672_s4 + $0x200] sm:$0xf]  ;;  %v3322_v27 = vand.u32 2147483647, %v3314_v12  ;;  %v7593_v36 = vor.u32 %v9402_v16, %v7592_v15  ;;  %v12620_v15 = vpack.c.bf16 %v12172_v49, %v12172_v49  ;;  %v12624_v16 = vpack.c.bf16 %v12231_v20, %v12231_v20 }
 0x1e7   :  { %4936 = vmatpush.bf16.msra.mxu2 %v7913_v14  ;;  %v3315_v14 = vxor.u32 %v7584_v31, %v3291_v21  ;;  %v2868_v18 = vpop.f32.mrf.mxu3  ;;  %v7570_v53 = vshrl.u32 %v3229_v57, 16  ;;  %v9434_v21 = vld [vmem:[%s14672_s4 + $0x10c] sm:$0xf0]  ;;  %v3230_v28 = vxor.u32 608135816, %v3222_v7  ;;  %v7993_v29 = vor.u32 %v9502_v11, %v7992_v10 }
 0x1e8   :  { %v8216_v32 = vld [vmem:[%s14672_s4 + $0x4e0] sm:$0xf]  ;;  %v9558_v61 = vld [vmem:[%s14672_s4 + $0x4ec] sm:$0xf0]  ;;  %vm3329_vm5 = vcmp.ge.s32.totalorder %v3321_v25, 644245094  ;;  %v7721_v38 = vor.u32 %v9434_v21, %v7720_v58  ;;  %v12641_v20 = vpack.c.bf16 %v12514_v9, %v12514_v9 }
 0x1e9   :  { %4949 = vmatpush.bf16.msra.mxu0 %v8041_v1  ;;  %4911 = vmatpush.bf16.msra.mxu3 %v7641_v26  ;;  %v3316_v1 = vxor.u32 %v7585_v52, %v3292_v23  ;;  %v7865_v23 = vor.u32 %v9470_v45, %v7864_v62  ;;  %v9466_v26 = vld [vmem:[%s14672_s4 + $0x20c] sm:$0xf0]  ;;  %v3323_v17 = vand.u32 2147483647, %v3315_v14  ;;  %v12571_v39 = vxor.u32 %v7570_v53, %v3229_v57  ;;  %v8344_v31 = vld [vmem:[%s14672_s4 + $0x5e0] sm:$0xf]  ;;  %vm12588_vm8 = vmpackc.low %vm3329_vm5, %vm3329_vm5 }
 0x1ea   :  { %4924 = vmatpush.bf16.msra.mxu1 %v7769_v60  ;;  %v7976_v60 = vld [vmem:[%s14672_s4 + $0x300] sm:$0xf]  ;;  %v9590_v37 = vld [vmem:[%s14672_s4 + $0x5ec] sm:$0xf0]  ;;  %v7849_v52 = vor.u32 %v9466_v26, %v7848_v24  ;;  %vm3330_vm6 = vcmp.ge.s32.totalorder %v3322_v27, 644245094  ;;  %v12612_v45 = vpack.c.bf16 %v12164_v44, %v12164_v44 }
 0x1eb   :  { %4937 = vmatpush.bf16.msra.mxu2 %v7897_v30  ;;  %v9498_v30 = vld [vmem:[%s14672_s4 + $0x30c] sm:$0xf0]  ;;  %v3324_v35 = vand.u32 2147483647, %v3316_v1  ;;  %v8200_v43 = vld [vmem:[%s14672_s4 + $0x4c0] sm:$0xf]  ;;  %v8345_v51 = vor.u32 %v9590_v37, %v8344_v31  ;;  %vm12600_vm10 = vmpackc.low %vm3330_vm6, %vm3330_vm6 }
 0x1ec   :  { %v7571_v57 = vshrl.u32 %v3230_v28, 16  ;;  %vm3331_vm7 = vcmp.ge.s32.totalorder %v3323_v17, 644245094  ;;  %v8472_v54 = vld [vmem:[%s14672_s4 + $0x6e0] sm:$0xf] }
 0x1ed   :  { %4950 = vmatpush.bf16.msra.mxu0 %v8025_v34  ;;  %4912 = vmatpush.bf16.msra.mxu3 %v7625_v46  ;;  %v2920_v34 = vpop.f32.mrf.mxu2  ;;  %v7977_v46 = vor.u32 %v9498_v30, %v7976_v60  ;;  %v9622_v48 = vld [vmem:[%s14672_s4 + $0x6ec] sm:$0xf0]  ;;  %vm12592_vm9 = vcmp.ge.s32.totalorder %v3324_v35, 644245094  ;;  %v3261_v62 = vmul.u32 2246822507, %v12571_v39  ;;  %vm12614_vm11 = vmpackc.low %vm3331_vm7, %vm3331_vm7  ;;  %v2867_v60 = vadd.f32 %v12477_v22, %v12281_v4  ;;  %v12694_v22 = vpop.f32.mrf.mxu0 }
 0x1ee   :  { %4925 = vmatpush.bf16.msra.mxu1 %v7753_v47  ;;  %v8217_v47 = vor.u32 %v9558_v61, %v8216_v32  ;;  %v9554_v59 = vld [vmem:[%s14672_s4 + $0x4cc] sm:$0xf0]  ;;  %v8328_v7 = vld [vmem:[%s14672_s4 + $0x5c0] sm:$0xf]  ;;  %v8473_v11 = vor.u32 %v9622_v48, %v8472_v54  ;;  %v3254_v14 = vxor.u32 %v7571_v57, %v3230_v28  ;;  %vm12629_vm12 = vmpackc.low %vm12592_vm9, %vm12592_vm9 }
 0x1ef   :  { %4938 = vmatpush.bf16.msra.mxu2 %v7881_v55  ;;  %v8201_v18 = vor.u32 %v9554_v59, %v8200_v43  ;;  %v8456_v1 = vld [vmem:[%s14672_s4 + $0x6c0] sm:$0xf]  ;;  %v9618_v49 = vld [vmem:[%s14672_s4 + $0x6cc] sm:$0xf0]  ;;  %v7578_v21 = vshrl.u32 %v3261_v62, 13 }
 0x1f0   :  { %v9550_v58 = vld [vmem:[%s14672_s4 + $0x4ac] sm:$0xf0]  ;;  %v12661_v9 = vld [vmem:[%s14670_s3] sm:$0xff]  ;;  %v3262_v26 = vmul.u32 2246822507, %v3254_v14 }
 0x1f1   :  { %4951 = vmatpush.bf16.msra.mxu0 %v8009_v8  ;;  %4913 = vmatpush.bf16.msra.mxu3 %v7609_v19  ;;  %v9586_v8 = vld [vmem:[%s14672_s4 + $0x5cc] sm:$0xf0]  ;;  %v8184_v19 = vld [vmem:[%s14672_s4 + $0x4a0] sm:$0xf]  ;;  %v442_v24 = vperm.slane %v12661_v9, 5  ;;  %v3285_v61 = vxor.u32 %v7578_v21, %v3261_v62 }
 0x1f2   :  { %4926 = vmatpush.bf16.msra.mxu1 %v7737_v13  ;;  %v8329_v53 = vor.u32 %v9586_v8, %v8328_v7  ;;  %v8312_v25 = vld [vmem:[%s14672_s4 + $0x5a0] sm:$0xf]  ;;  %v9582_v13 = vld [vmem:[%s14672_s4 + $0x5ac] sm:$0xf0]  ;;  %v8185_v27 = vor.u32 %v9550_v58, %v8184_v19  ;;  %v9481_v12 = vld [vmem:[%s14672_s4 + $0x28c] sm:$0xf] }
 0x1f3   :  { %4939 = vmatpush.bf16.msra.mxu2 %v7865_v23  ;;  %v8457_v23 = vor.u32 %v9618_v49, %v8456_v1  ;;  %v8440_v28 = vld [vmem:[%s14672_s4 + $0x6a0] sm:$0xf]  ;;  %v8313_v30 = vor.u32 %v9582_v13, %v8312_v25  ;;  %v9546_v32 = vld [vmem:[%s14672_s4 + $0x48c] sm:$0xf0]  ;;  %v2906_v35 = vadd.f32 %v12453_v0, %v442_v24  ;;  %v8838_v44 = vld [vmem:[%s14674_s6 + $0xe8] sm:$0xf0] }
 0x1f4   :  { %v8168_v17 = vld [vmem:[%s14672_s4 + $0x480] sm:$0xf]  ;;  %v9578_v4 = vld [vmem:[%s14672_s4 + $0x58c] sm:$0xf0] }
 0x1f5   :  { %4952 = vmatpush.bf16.msra.mxu0 %v7993_v29  ;;  %4914 = vmatpush.bf16.msra.mxu3 %v7593_v36  ;;  %v9614_v29 = vld [vmem:[%s14672_s4 + $0x6ac] sm:$0xf0]  ;;  %v8296_v34 = vld [vmem:[%s14672_s4 + $0x580] sm:$0xf]  ;;  %v7579_v36 = vshrl.u32 %v3262_v26, 13  ;;  %v8169_v31 = vor.u32 %v9546_v32, %v8168_v17  ;;  %v2919_v54 = vadd.f32 %v12512_v42, %v2906_v35  ;;  %v2970_v19 = vpop.f32.mrf.mxu2  ;;  %v2959_v58 = vpop.f32.mrf.mxu0 }
 0x1f6   :  { %4927 = vmatpush.bf16.msra.mxu1 %v7721_v38  ;;  %v8441_v39 = vor.u32 %v9614_v29, %v8440_v28  ;;  %v8424_v37 = vld [vmem:[%s14672_s4 + $0x680] sm:$0xf]  ;;  %v9610_v0 = vld [vmem:[%s14672_s4 + $0x68c] sm:$0xf0]  ;;  %v2880_v38 = vadd.f32 %v12438_v50, %v2867_v60  ;;  %v7690_v58 = vld [vmem:[%s14672_s4 + $0xd0] sm:$0xf0] }
 0x1f7   :  { %4940 = vmatpush.bf16.msra.mxu2 %v7849_v52  ;;  %v8297_v52 = vor.u32 %v9578_v4, %v8296_v34  ;;  %v8152_v43 = vld [vmem:[%s14672_s4 + $0x460] sm:$0xf]  ;;  %v9542_v57 = vld [vmem:[%s14672_s4 + $0x46c] sm:$0xf0]  ;;  %v3286_v56 = vxor.u32 %v7579_v36, %v3262_v26  ;;  %v8425_v59 = vor.u32 %v9610_v0, %v8424_v37 }
 0x1f8   :  { %8616 = vmatmul.msk.bf16.vlgmr.msra.gmra.mxu3 %vm12588_vm8, %v12612_v45  ;;  %v8280_v48 = vld [vmem:[%s14672_s4 + $0x560] sm:$0xf]  ;;  %v9574_v50 = vld [vmem:[%s14672_s4 + $0x56c] sm:$0xf0]  ;;  %v8153_v62 = vor.u32 %v9542_v57, %v8152_v43  ;;  %v2893_v8 = vadd.f32 %v12373_v63, %v2880_v38 }
 0x1f9   :  { %4953 = vmatpush.bf16.msra.mxu0 %v7977_v46  ;;  %4959 = vmatpush.bf16.msrb.mxu3 %v8217_v47  ;;  %v2944_v46 = vpop.f32.mrf.mxu1  ;;  %v3293_v47 = vmul.u32 3266489909, %v3285_v61  ;;  %v8408_v7 = vld [vmem:[%s14672_s4 + $0x660] sm:$0xf]  ;;  %v9606_v42 = vld [vmem:[%s14672_s4 + $0x66c] sm:$0xf0] }
 0x1fa   :  { %4972 = vmatpush.bf16.msrb.mxu1 %v8345_v51  ;;  %8622 = vmatmul.msk.bf16.vlgmr.msra.gmra.mxu2 %vm12614_vm11, %v12624_v16  ;;  %v2931_v51 = vpop.f32.mrf.mxu3  ;;  %v8136_v14 = vld [vmem:[%s14672_s4 + $0x440] sm:$0xf]  ;;  %v9570_v63 = vld [vmem:[%s14672_s4 + $0x54c] sm:$0xf0]  ;;  %v3294_v21 = vmul.u32 3266489909, %v3286_v56  ;;  %v8409_v24 = vor.u32 %v9606_v42, %v8408_v7 }
 0x1fb   :  { %8619 = vmatmul.msk.bf16.vlgmr.msra.gmra.mxu1 %vm12600_vm10, %v12620_v15  ;;  %4985 = vmatpush.bf16.msrb.mxu2 %v8473_v11  ;;  %v8281_v11 = vor.u32 %v9574_v50, %v8280_v48  ;;  %v7586_v1 = vshrl.u32 %v3293_v47, 16  ;;  %v2932_v49 = vadd.f32 %v2931_v51, %v2919_v54  ;;  %v8392_v13 = vld [vmem:[%s14672_s4 + $0x640] sm:$0xf]  ;;  %v3181_v26 = vmul.f32 0.2, %v2893_v8 }
 0x1fc   :  { %8625 = vmatmul.msk.bf16.vlgmr.msra.gmra.mxu0 %vm12629_vm12, %v12641_v20  ;;  %v8120_v28 = vld [vmem:[%s14672_s4 + $0x420] sm:$0xf]  ;;  %v9534_v29 = vld [vmem:[%s14672_s4 + $0x42c] sm:$0xf0]  ;;  %vm3173_vm13 = vcmp.ge.f32.partialorder %v2893_v8, 0.0  ;;  %v7587_v34 = vshrl.u32 %v3294_v21, 16 }
 0x1fd   :  { %4960 = vmatpush.bf16.msrb.mxu3 %v8201_v18  ;;  %v9538_v18 = vld [vmem:[%s14672_s4 + $0x44c] sm:$0xf0]  ;;  %v3317_v60 = vxor.u32 %v7586_v1, %v3293_v47  ;;  %v2945_v17 = vadd.f32 %v2944_v46, %v2932_v49  ;;  %v8248_v32 = vld [vmem:[%s14672_s4 + $0x520] sm:$0xf]  ;;  %v3189_v0 = vsel %vm3173_vm13, %v2893_v8, %v3181_v26  ;;  %v9428_v54 = vld [vmem:[%s14672_s4 + $0xe4] sm:$0xf]  ;;  %v2972_v50 = vpop.f32.mrf.mxu2 }
 0x1fe   :  { %4973 = vmatpush.bf16.msrb.mxu1 %v8329_v53  ;;  %v8264_v53 = vld [vmem:[%s14672_s4 + $0x540] sm:$0xf]  ;;  %v8137_v25 = vor.u32 %v9538_v18, %v8136_v14  ;;  %v9566_v61 = vld [vmem:[%s14672_s4 + $0x52c] sm:$0xf0]  ;;  %v7706_v48 = vld [vmem:[%s14672_s4 + $0xf0] sm:$0xf0]  ;;  %v3318_v56 = vxor.u32 %v7587_v34, %v3294_v21 }
 0x1ff   :  { %4986 = vmatpush.bf16.msrb.mxu2 %v8457_v23  ;;  %v9602_v23 = vld [vmem:[%s14672_s4 + $0x64c] sm:$0xf0]  ;;  %v8104_v36 = vld [vmem:[%s14672_s4 + $0x400] sm:$0xf]  ;;  %v8249_v38 = vor.u32 %v9566_v61, %v8248_v32  ;;  %v3325_v57 = vand.u32 2147483647, %v3317_v60  ;;  %v2958_v46 = vadd.f32 %v12694_v22, %v2945_v17  ;;  %v7709_v14 = vor.u32 %v9428_v54, %v7706_v48 }
 0x200   :  { %v8393_v4 = vor.u32 %v9602_v23, %v8392_v13  ;;  %v9598_v37 = vld [vmem:[%s14672_s4 + $0x62c] sm:$0xf0]  ;;  %v8232_v43 = vld [vmem:[%s14672_s4 + $0x500] sm:$0xf]  ;;  %v9460_v51 = vld [vmem:[%s14672_s4 + $0x1e4] sm:$0xf] }
 0x201   :  { %4961 = vmatpush.bf16.msrb.mxu3 %v8185_v27  ;;  %v8265_v27 = vor.u32 %v9570_v63, %v8264_v53  ;;  %v9562_v47 = vld [vmem:[%s14672_s4 + $0x50c] sm:$0xf0]  ;;  %v7834_v22 = vld [vmem:[%s14672_s4 + $0x1f0] sm:$0xf0]  ;;  %v8360_v42 = vld [vmem:[%s14672_s4 + $0x600] sm:$0xf]  ;;  %v2971_v49 = vadd.f32 %v2970_v19, %v2958_v46 }
 0x202   :  { %4974 = vmatpush.bf16.msrb.mxu1 %v8313_v30  ;;  %v2946_v30 = vpop.f32.mrf.mxu1  ;;  %v2933_v35 = vpop.f32.mrf.mxu3  ;;  %v9594_v8 = vld [vmem:[%s14672_s4 + $0x60c] sm:$0xf0]  ;;  %vm3333_vm14 = vcmp.ge.s32.totalorder %v3325_v57, 644245094  ;;  %v9492_v18 = vld [vmem:[%s14672_s4 + $0x2e4] sm:$0xf]  ;;  %v7837_v53 = vor.u32 %v9460_v51, %v7834_v22 }
 0x203   :  { %4987 = vmatpush.bf16.msrb.mxu2 %v8441_v39  ;;  %v8121_v39 = vor.u32 %v9534_v29, %v8120_v28  ;;  %v7962_v1 = vld [vmem:[%s14672_s4 + $0x2f0] sm:$0xf0]  ;;  %v9424_v63 = vld [vmem:[%s14672_s4 + $0xc4] sm:$0xf]  ;;  %v3326_v13 = vand.u32 2147483647, %v3318_v56  ;;  %v8361_v19 = vor.u32 %v9594_v8, %v8360_v42  ;;  %vm12808_vm15 = vmpackc.low %vm3333_vm14, %vm3333_vm14 }
 0x204   :  { %v7674_v28 = vld [vmem:[%s14672_s4 + $0xb0] sm:$0xf0]  ;;  %v7965_v29 = vor.u32 %v9492_v18, %v7962_v1  ;;  %v7693_v30 = vor.u32 %v9424_v63, %v7690_v58  ;;  %v9452_v17 = vld [vmem:[%s14672_s4 + $0x1a4] sm:$0xf]  ;;  %v8584_v56 = vld [vmem:[%s14672_s4 + $0x7c0] sm:$0xf] }
 0x205   :  { %4962 = vmatpush.bf16.msrb.mxu3 %v8169_v31  ;;  %v8376_v31 = vld [vmem:[%s14672_s4 + $0x620] sm:$0xf]  ;;  %v7802_v32 = vld [vmem:[%s14672_s4 + $0x1b0] sm:$0xf0]  ;;  %v9488_v61 = vld [vmem:[%s14672_s4 + $0x2c4] sm:$0xf] }
 0x206   :  { %4975 = vmatpush.bf16.msrb.mxu1 %v8297_v52  ;;  %v9530_v52 = vld [vmem:[%s14672_s4 + $0x40c] sm:$0xf0]  ;;  %v7946_v35 = vld [vmem:[%s14672_s4 + $0x2d0] sm:$0xf0]  ;;  %vm12838_vm1 = vcmp.ge.s32.totalorder %v3326_v13, 644245094  ;;  %v7805_v51 = vor.u32 %v9452_v17, %v7802_v32  ;;  %v12874_v42 = vpop.f32.mrf.mxu0 }
 0x207   :  { %4988 = vmatpush.bf16.msrb.mxu2 %v8425_v59  ;;  %v8377_v59 = vor.u32 %v9598_v37, %v8376_v31  ;;  %v8105_v7 = vor.u32 %v9530_v52, %v8104_v36  ;;  %v9654_v31 = vld [vmem:[%s14672_s4 + $0x7ec] sm:$0xf0]  ;;  %v3204_v37 = vadd.s32 768, %v12155_v41  ;;  %v7658_v52 = vld [vmem:[%s14672_s4 + $0x90] sm:$0xf0]  ;;  %vm12862_vm2 = vmpackc.low %vm12838_vm1, %vm12838_vm1 }
 0x208   :  { %v9484_v54 = vld [vmem:[%s14672_s4 + $0x2a4] sm:$0xf]  ;;  %v7930_v48 = vld [vmem:[%s14672_s4 + $0x2b0] sm:$0xf0]  ;;  %v8568_v58 = vld [vmem:[%s14672_s4 + $0x7a0] sm:$0xf] }
 0x209   :  { %4963 = vmatpush.bf16.msrb.mxu3 %v8153_v62  ;;  %v3341_v62 = vmul.f32 1.4285715, %v3189_v0  ;;  %v3213_v50 = vadd.s32 %v12192_v2, %v3204_v37  ;;  %v9448_v8 = vld [vmem:[%s14672_s4 + $0x184] sm:$0xf]  ;;  %v7933_v1 = vor.u32 %v9484_v54, %v7930_v48  ;;  %v7914_v63 = vld [vmem:[%s14672_s4 + $0x290] sm:$0xf0] }
 0x20a   :  { %4976 = vmatpush.bf16.msrb.mxu1 %v8281_v11  ;;  %v8233_v11 = vor.u32 %v9562_v47, %v8232_v43  ;;  %v2983_v21 = vpop.f32.mrf.mxu3  ;;  %v7949_v43 = vor.u32 %v9488_v61, %v7946_v35  ;;  %v9412_v13 = vld [vmem:[%s14672_s4 + $0x64] sm:$0xf]  ;;  %v7898_v61 = vld [vmem:[%s14672_s4 + $0x270] sm:$0xf0]  ;;  %v8552_v35 = vld [vmem:[%s14672_s4 + $0x780] sm:$0xf] }
 0x20b   :  { %4989 = vmatpush.bf16.msrb.mxu2 %v8409_v24  ;;  %v9456_v24 = vld [vmem:[%s14672_s4 + $0x1c4] sm:$0xf]  ;;  %v2984_v23 = vadd.f32 %v2983_v21, %v2971_v49  ;;  %v12818_v60 = vpack.c.bf16 %v3341_v62, %v3341_v62  ;;  %v3223_v18 = vxor.u32 %v12202_v5, %v3213_v50  ;;  %v9646_v21 = vld [vmem:[%s14672_s4 + $0x7ac] sm:$0xf0]  ;;  %v7626_v36 = vld [vmem:[%s14672_s4 + $0x50] sm:$0xf0] }
 0x20c   :  { %v9480_v49 = vld [vmem:[%s14672_s4 + $0x284] sm:$0xf]  ;;  %v7882_v50 = vld [vmem:[%s14672_s4 + $0x250] sm:$0xf0]  ;;  %v8764_v10 = vld [vmem:[%s14674_s6 + $0x50] sm:$0xf] }
 0x20d   :  { %4964 = vmatpush.bf16.msrb.mxu3 %v8137_v25  ;;  %v7818_v25 = vld [vmem:[%s14672_s4 + $0x1d0] sm:$0xf0]  ;;  %vm3174_vm0 = vcmp.ge.f32.partialorder %v2984_v23, 0.0  ;;  %v3182_v34 = vmul.f32 0.2, %v2984_v23 }
 0x20e   :  { %4977 = vmatpush.bf16.msrb.mxu1 %v8265_v27  ;;  %v9420_v27 = vld [vmem:[%s14672_s4 + $0xa4] sm:$0xf]  ;;  %v9609_v26 = vld [vmem:[%s14672_s4 + $0x68c] sm:$0xf] }
 0x20f   :  { %4990 = vmatpush.bf16.msrb.mxu2 %v8393_v4  ;;  %v7821_v4 = vor.u32 %v9456_v24, %v7818_v25  ;;  %v3190_v0 = vsel %vm3174_vm0, %v2984_v23, %v3182_v34  ;;  %v7677_v47 = vor.u32 %v9420_v27, %v7674_v28  ;;  %v12898_v25 = vpop.f32.mrf.mxu1  ;;  %v8569_v23 = vor.u32 %v9646_v21, %v8568_v58  ;;  %v9444_v27 = vld [vmem:[%s14672_s4 + $0x164] sm:$0xf]  ;;  %v7770_v28 = vld [vmem:[%s14672_s4 + $0x170] sm:$0xf0]  ;;  %v9642_v34 = vld [vmem:[%s14672_s4 + $0x78c] sm:$0xf0] }
 0x210   :  { %v3342_v46 = vmul.f32 1.4285715, %v3190_v0  ;;  %v9476_v17 = vld [vmem:[%s14672_s4 + $0x264] sm:$0xf]  ;;  %v3024_v0 = vpop.f32.mrf.mxu0 }
 0x211   :  { %4965 = vmatpush.bf16.msrb.mxu3 %v8121_v39  ;;  %v8600_v39 = vld [vmem:[%s14672_s4 + $0x7e0] sm:$0xf]  ;;  %v9404_v54 = vld [vmem:[%s14672_s4 + $0x24] sm:$0xf] }
 0x212   :  { %4978 = vmatpush.bf16.msrb.mxu1 %v8249_v38  ;;  %v9416_v38 = vld [vmem:[%s14672_s4 + $0x84] sm:$0xf]  ;;  %v8601_v57 = vor.u32 %v9654_v31, %v8600_v39  ;;  %v12872_v62 = vpack.c.bf16 %v3342_v46, %v3342_v46  ;;  %v8553_v31 = vor.u32 %v9642_v34, %v8552_v35  ;;  %v7901_v46 = vor.u32 %v9476_v17, %v7898_v61 }
 0x213   :  { %4991 = vmatpush.bf16.msrb.mxu2 %v8377_v59  ;;  %v9650_v59 = vld [vmem:[%s14672_s4 + $0x7cc] sm:$0xf0]  ;;  %v9408_v39 = vld [vmem:[%s14672_s4 + $0x44] sm:$0xf] }
 0x214   :  { %4998 = vmatpush.bf16.msrb.mxu0 %v8601_v57  ;;  %v12938_v57 = vpop.f32.mrf.mxu2  ;;  %v9472_v48 = vld [vmem:[%s14672_s4 + $0x244] sm:$0xf] }
 0x215   :  { %4966 = vmatpush.bf16.msrb.mxu3 %v8105_v7  ;;  %v2985_v7 = vpop.f32.mrf.mxu3  ;;  %v9432_v21 = vld [vmem:[%s14672_s4 + $0x104] sm:$0xf] }
 0x216   :  { %4979 = vmatpush.bf16.msrb.mxu1 %v8233_v11  ;;  %v7786_v11 = vld [vmem:[%s14672_s4 + $0x190] sm:$0xf0]  ;;  %v8536_v7 = vld [vmem:[%s14672_s4 + $0x760] sm:$0xf]  ;;  %v9588_v34 = vld [vmem:[%s14672_s4 + $0x5e4] sm:$0xf] }
 0x217   :  { %4992 = vmatpush.bf16.msrb.mxu2 %v8361_v19  ;;  %v7789_v24 = vor.u32 %v9448_v8, %v7786_v11  ;;  %v7642_v19 = vld [vmem:[%s14672_s4 + $0x70] sm:$0xf0]  ;;  %v9638_v8 = vld [vmem:[%s14672_s4 + $0x76c] sm:$0xf0]  ;;  %v9436_v11 = vld [vmem:[%s14672_s4 + $0x124] sm:$0xf] }
 0x218   :  { %8628 = vmatmul.msk.bf16.vlgmr.msrb.gmra.mxu3 %vm12808_vm15, %v12818_v60  ;;  %v7645_v32 = vor.u32 %v9412_v13, %v7642_v19  ;;  %v7866_v13 = vld [vmem:[%s14672_s4 + $0x230] sm:$0xf0] }
 0x219   :  { %5011 = vmatpush.bf16.msra.mxu3 %v7709_v14  ;;  %v8585_v14 = vor.u32 %v9650_v59, %v8584_v56  ;;  %8631 = vmatmul.msk.bf16.vlgmr.msrb.gmra.mxu1 %vm12862_vm2, %v12872_v62  ;;  %v7610_v56 = vld [vmem:[%s14672_s4 + $0x30] sm:$0xf0]  ;;  %v2998_v59 = vpop.f32.mrf.mxu1 }
 0x21a   :  { %5024 = vmatpush.bf16.msra.mxu1 %v7837_v53  ;;  %v7661_v53 = vor.u32 %v9416_v38, %v7658_v52  ;;  %v9440_v38 = vld [vmem:[%s14672_s4 + $0x144] sm:$0xf]  ;;  %v7754_v52 = vld [vmem:[%s14672_s4 + $0x150] sm:$0xf0]  ;;  %v7613_v58 = vor.u32 %v9404_v54, %v7610_v56 }
 0x21b   :  { %5037 = vmatpush.bf16.msra.mxu2 %v7965_v29  ;;  %4999 = vmatpush.bf16.msrb.mxu0 %v8585_v14  ;;  %v3231_v29 = vxor.u32 608135816, %v3223_v18  ;;  %v7738_v14 = vld [vmem:[%s14672_s4 + $0x130] sm:$0xf0]  ;;  %v8537_v18 = vor.u32 %v9638_v8, %v8536_v7  ;;  %v9584_v7 = vld [vmem:[%s14672_s4 + $0x5c4] sm:$0xf] }
 0x21c   :  { %v7741_v19 = vor.u32 %v9436_v11, %v7738_v14  ;;  %v8330_v8 = vld [vmem:[%s14672_s4 + $0x5d0] sm:$0xf0]  ;;  %v8488_v14 = vld [vmem:[%s14672_s4 + $0x700] sm:$0xf] }
 0x21d   :  { %5012 = vmatpush.bf16.msra.mxu3 %v7693_v30  ;;  %v7917_v30 = vor.u32 %v9480_v49, %v7914_v63  ;;  %v12930_v37 = vpop.f32.mrf.mxu3  ;;  %v9400_v49 = vld [vmem:[%s14672_s4 + $0x4] sm:$0xf]  ;;  %v7885_v63 = vor.u32 %v9472_v48, %v7882_v50 }
 0x21e   :  { %5025 = vmatpush.bf16.msra.mxu1 %v7821_v4  ;;  %v7773_v4 = vor.u32 %v9444_v27, %v7770_v28  ;;  %v8520_v27 = vld [vmem:[%s14672_s4 + $0x740] sm:$0xf]  ;;  %v9634_v28 = vld [vmem:[%s14672_s4 + $0x74c] sm:$0xf0]  ;;  %v9552_v50 = vld [vmem:[%s14672_s4 + $0x4c4] sm:$0xf] }
 0x21f   :  { %5038 = vmatpush.bf16.msra.mxu2 %v7949_v43  ;;  %5000 = vmatpush.bf16.msrb.mxu0 %v8569_v23  ;;  %v7572_v43 = vshrl.u32 %v3231_v29, 16  ;;  %v7722_v23 = vld [vmem:[%s14672_s4 + $0x110] sm:$0xf0]  ;;  %v8521_v61 = vor.u32 %v9634_v28, %v8520_v27 }
 0x220   :  { %v8090_v27 = vld [vmem:[%s14672_s4 + $0x3f0] sm:$0xf0] }
 0x221   :  { %5013 = vmatpush.bf16.msra.mxu3 %v7677_v47  ;;  %v7629_v47 = vor.u32 %v9408_v39, %v7626_v36  ;;  %v3037_v39 = vpop.f32.mrf.mxu2 }
 0x222   :  { %5026 = vmatpush.bf16.msra.mxu1 %v7805_v51  ;;  %v7757_v51 = vor.u32 %v9440_v38, %v7754_v52  ;;  %v7850_v38 = vld [vmem:[%s14672_s4 + $0x210] sm:$0xf0]  ;;  %v8504_v52 = vld [vmem:[%s14672_s4 + $0x720] sm:$0xf] }
 0x223   :  { %5039 = vmatpush.bf16.msra.mxu2 %v7933_v1  ;;  %5001 = vmatpush.bf16.msrb.mxu0 %v8553_v31  ;;  %v3255_v1 = vxor.u32 %v7572_v43, %v3231_v29  ;;  %v9556_v29 = vld [vmem:[%s14672_s4 + $0x4e4] sm:$0xf]  ;;  %v9630_v43 = vld [vmem:[%s14672_s4 + $0x72c] sm:$0xf0] }
 0x224   :  { %v9464_v31 = vld [vmem:[%s14672_s4 + $0x204] sm:$0xf]  ;;  %v8505_v59 = vor.u32 %v9630_v43, %v8504_v52 }
 0x225   :  { %5014 = vmatpush.bf16.msra.mxu3 %v7661_v53  ;;  %v7594_v53 = vld [vmem:[%s14672_s4 + $0x10] sm:$0xf0]  ;;  %v3011_v17 = vpop.f32.mrf.mxu3  ;;  %v3263_v35 = vmul.u32 2246822507, %v3255_v1  ;;  %v7853_v11 = vor.u32 %v9464_v31, %v7850_v38 }
 0x226   :  { %5027 = vmatpush.bf16.msra.mxu1 %v7789_v24  ;;  %v9468_v24 = vld [vmem:[%s14672_s4 + $0x224] sm:$0xf]  ;;  %v7597_v0 = vor.u32 %v9400_v49, %v7594_v53  ;;  %v8333_v53 = vor.u32 %v9584_v7, %v8330_v8  ;;  %v8298_v31 = vld [vmem:[%s14672_s4 + $0x590] sm:$0xf0] }
 0x227   :  { %5040 = vmatpush.bf16.msra.mxu2 %v7917_v30  ;;  %5002 = vmatpush.bf16.msrb.mxu0 %v8537_v18  ;;  %v8218_v30 = vld [vmem:[%s14672_s4 + $0x4f0] sm:$0xf0]  ;;  %v7869_v36 = vor.u32 %v9468_v24, %v7866_v13  ;;  %v7580_v56 = vshrl.u32 %v3263_v35, 13  ;;  %v9626_v18 = vld [vmem:[%s14672_s4 + $0x70c] sm:$0xf0]  ;;  %v3048_v39 = vpop.f32.mrf.mxu1 }
 0x228   :  { %v8221_v54 = vor.u32 %v9556_v29, %v8218_v30  ;;  %v8489_v13 = vor.u32 %v9626_v18, %v8488_v14  ;;  %v9544_v17 = vld [vmem:[%s14672_s4 + $0x484] sm:$0xf] }
 0x229   :  { %5015 = vmatpush.bf16.msra.mxu3 %v7645_v32  ;;  %v12994_v32 = vpop.f32.mrf.mxu0  ;;  %v3287_v24 = vxor.u32 %v7580_v56, %v3263_v35  ;;  %v9572_v56 = vld [vmem:[%s14672_s4 + $0x564] sm:$0xf] }
 0x22a   :  { %5028 = vmatpush.bf16.msra.mxu1 %v7773_v4  ;;  %v8346_v4 = vld [vmem:[%s14672_s4 + $0x5f0] sm:$0xf0]  ;;  %v9536_v14 = vld [vmem:[%s14672_s4 + $0x444] sm:$0xf] }
 0x22b   :  { %5041 = vmatpush.bf16.msra.mxu2 %v7901_v46  ;;  %v443_v46 = vperm.slane %v12661_v9, 6  ;;  %5003 = vmatpush.bf16.msrb.mxu0 %v8521_v61  ;;  %v8349_v48 = vor.u32 %v9588_v34, %v8346_v4  ;;  %v8170_v61 = vld [vmem:[%s14672_s4 + $0x490] sm:$0xf0]  ;;  %v3295_v34 = vmul.u32 3266489909, %v3287_v24 }
 0x22c   :  { %v9520_v4 = vld [vmem:[%s14672_s4 + $0x3c4] sm:$0xf]  ;;  %v8173_v43 = vor.u32 %v9544_v17, %v8170_v61  ;;  %v8266_v24 = vld [vmem:[%s14672_s4 + $0x550] sm:$0xf0] }
 0x22d   :  { %5016 = vmatpush.bf16.msra.mxu3 %v7629_v47  ;;  %v7725_v47 = vor.u32 %v9432_v21, %v7722_v23  ;;  %v2997_v1 = vadd.f32 %v12898_v25, %v443_v46  ;;  %v9524_v25 = vld [vmem:[%s14672_s4 + $0x3e4] sm:$0xf]  ;;  %v8314_v23 = vld [vmem:[%s14672_s4 + $0x5b0] sm:$0xf0] }
 0x22e   :  { %5029 = vmatpush.bf16.msra.mxu1 %v7757_v51  ;;  %v8202_v51 = vld [vmem:[%s14672_s4 + $0x4d0] sm:$0xf0]  ;;  %v8093_v28 = vor.u32 %v9524_v25, %v8090_v27  ;;  %v9516_v46 = vld [vmem:[%s14672_s4 + $0x3a4] sm:$0xf] }
 0x22f   :  { %5042 = vmatpush.bf16.msra.mxu2 %v7885_v63  ;;  %v8205_v49 = vor.u32 %v9552_v50, %v8202_v51  ;;  %v9548_v63 = vld [vmem:[%s14672_s4 + $0x4a4] sm:$0xf]  ;;  %5004 = vmatpush.bf16.msrb.mxu0 %v8505_v59  ;;  %v3010_v29 = vadd.f32 %v12930_v37, %v2997_v1  ;;  %v3205_v37 = vadd.s32 896, %v12155_v41  ;;  %v7588_v51 = vshrl.u32 %v3295_v34, 16  ;;  %v8282_v59 = vld [vmem:[%s14672_s4 + $0x570] sm:$0xf0] }
 0x230   :  { %v9540_v50 = vld [vmem:[%s14672_s4 + $0x464] sm:$0xf]  ;;  %v8285_v1 = vor.u32 %v9572_v56, %v8282_v59  ;;  %v7712_v59 = vld [vmem:[%s14672_s4 + $0xe8] sm:$0xf] }
 0x231   :  { %5017 = vmatpush.bf16.msra.mxu3 %v7613_v58  ;;  %v8186_v58 = vld [vmem:[%s14672_s4 + $0x4b0] sm:$0xf0]  ;;  %v3076_v21 = vpop.f32.mrf.mxu0  ;;  %v3023_v52 = vadd.f32 %v12874_v42, %v3010_v29 }
 0x232   :  { %5030 = vmatpush.bf16.msra.mxu1 %v7741_v19  ;;  %v9580_v19 = vld [vmem:[%s14672_s4 + $0x5a4] sm:$0xf]  ;;  %v8189_v30 = vor.u32 %v9548_v63, %v8186_v58  ;;  %v8154_v42 = vld [vmem:[%s14672_s4 + $0x470] sm:$0xf0] }
 0x233   :  { %5043 = vmatpush.bf16.msra.mxu2 %v7869_v36  ;;  %v8317_v35 = vor.u32 %v9580_v19, %v8314_v23  ;;  %5005 = vmatpush.bf16.msrb.mxu0 %v8489_v13  ;;  %v9576_v36 = vld [vmem:[%s14672_s4 + $0x584] sm:$0xf]  ;;  %v3036_v8 = vadd.f32 %v12938_v57, %v3023_v52  ;;  %v8042_v57 = vld [vmem:[%s14672_s4 + $0x390] sm:$0xf0]  ;;  %v3050_v13 = vpop.f32.mrf.mxu1  ;;  %v3061_v19 = vpop.f32.mrf.mxu3 }
 0x234   :  { %v9512_v63 = vld [vmem:[%s14672_s4 + $0x384] sm:$0xf]  ;;  %v8122_v29 = vld [vmem:[%s14672_s4 + $0x430] sm:$0xf0] }
 0x235   :  { %5018 = vmatpush.bf16.msra.mxu3 %v7597_v0  ;;  %v8074_v0 = vld [vmem:[%s14672_s4 + $0x3d0] sm:$0xf0]  ;;  %v3049_v58 = vadd.f32 %v3048_v39, %v3036_v8  ;;  %v9568_v21 = vld [vmem:[%s14672_s4 + $0x544] sm:$0xf]  ;;  %v8045_v25 = vor.u32 %v9512_v63, %v8042_v57  ;;  %v8766_v63 = vld [vmem:[%s14674_s6 + $0x58] sm:$0xf0] }
 0x236   :  { %5031 = vmatpush.bf16.msra.mxu1 %v7725_v47  ;;  %v8077_v38 = vor.u32 %v9520_v4, %v8074_v0  ;;  %v8058_v47 = vld [vmem:[%s14672_s4 + $0x3b0] sm:$0xf0]  ;;  %v8269_v61 = vor.u32 %v9568_v21, %v8266_v24  ;;  %v9564_v39 = vld [vmem:[%s14672_s4 + $0x524] sm:$0xf] }
 0x237   :  { %5044 = vmatpush.bf16.msra.mxu2 %v7853_v11  ;;  %5050 = vmatpush.bf16.msra.mxu0 %v8093_v28  ;;  %v8061_v7 = vor.u32 %v9516_v46, %v8058_v47  ;;  %v8157_v11 = vor.u32 %v9540_v50, %v8154_v42  ;;  %v3062_v23 = vadd.f32 %v3061_v19, %v3049_v58  ;;  %v9532_v28 = vld [vmem:[%s14672_s4 + $0x424] sm:$0xf]  ;;  %v8026_v4 = vld [vmem:[%s14672_s4 + $0x370] sm:$0xf0] }
 0x238   :  { %8640 = vmatmul.msk.bf16.vlgmr.msra.gmra.mxu3 %vm12588_vm8, %v12612_v45  ;;  %v8106_v52 = vld [vmem:[%s14672_s4 + $0x410] sm:$0xf0]  ;;  %v9560_v46 = vld [vmem:[%s14672_s4 + $0x504] sm:$0xf] }
 0x239   :  { %5063 = vmatpush.bf16.msrb.mxu3 %v8221_v54  ;;  %8643 = vmatmul.msk.bf16.vlgmr.msra.gmra.mxu1 %vm12600_vm10, %v12620_v15  ;;  %v3214_v54 = vadd.s32 %v12192_v2, %v3205_v37  ;;  %v13098_v2 = vpop.f32.mrf.mxu0  ;;  %v3075_v37 = vadd.f32 %v12994_v32, %v3062_v23  ;;  %v8234_v47 = vld [vmem:[%s14672_s4 + $0x510] sm:$0xf0]  ;;  %v9616_v21 = vld [vmem:[%s14672_s4 + $0x6c4] sm:$0xf] }
 0x23a   :  { %5076 = vmatpush.bf16.msrb.mxu1 %v8349_v48  ;;  %v8301_v48 = vor.u32 %v9576_v36, %v8298_v31  ;;  %v8250_v36 = vld [vmem:[%s14672_s4 + $0x530] sm:$0xf0] }
 0x23b   :  { %5051 = vmatpush.bf16.msra.mxu0 %v8077_v38  ;;  %v3224_v18 = vxor.u32 %v12202_v5, %v3214_v54  ;;  %v9528_v38 = vld [vmem:[%s14672_s4 + $0x404] sm:$0xf]  ;;  %vm3175_vm3 = vcmp.ge.f32.partialorder %v3075_v37, 0.0  ;;  %v3183_v32 = vmul.f32 0.2, %v3075_v37  ;;  %v8253_v50 = vor.u32 %v9564_v39, %v8250_v36 }
 0x23c   :  { %v9620_v54 = vld [vmem:[%s14672_s4 + $0x6e4] sm:$0xf]  ;;  %v8474_v42 = vld [vmem:[%s14672_s4 + $0x6f0] sm:$0xf0] }
 0x23d   :  { %5064 = vmatpush.bf16.msrb.mxu3 %v8205_v49  ;;  %v8138_v49 = vld [vmem:[%s14672_s4 + $0x450] sm:$0xf0]  ;;  %v3232_v17 = vxor.u32 608135816, %v3224_v18  ;;  %v3191_v56 = vsel %vm3175_vm3, %v3075_v37, %v3183_v32  ;;  %v9463_v18 = vld [vmem:[%s14672_s4 + $0x1f4] sm:$0xf0]  ;;  %v8477_v57 = vor.u32 %v9620_v54, %v8474_v42 }
 0x23e   :  { %5077 = vmatpush.bf16.msrb.mxu1 %v8333_v53  ;;  %v3319_v53 = vxor.u32 %v7588_v51, %v3295_v34  ;;  %v8141_v27 = vor.u32 %v9536_v14, %v8138_v49  ;;  %v9508_v34 = vld [vmem:[%s14672_s4 + $0x364] sm:$0xf]  ;;  %v8010_v8 = vld [vmem:[%s14672_s4 + $0x350] sm:$0xf0]  ;;  %v7840_v14 = vld [vmem:[%s14672_s4 + $0x1e8] sm:$0xf] }
 0x23f   :  { %5052 = vmatpush.bf16.msra.mxu0 %v8061_v7  ;;  %v8029_v0 = vor.u32 %v9508_v34, %v8026_v4  ;;  %v9504_v51 = vld [vmem:[%s14672_s4 + $0x344] sm:$0xf]  ;;  %v9431_v7 = vld [vmem:[%s14672_s4 + $0xf4] sm:$0xf0]  ;;  %v8458_v23 = vld [vmem:[%s14672_s4 + $0x6d0] sm:$0xf0] }
 0x240   :  { %v8013_v49 = vor.u32 %v9504_v51, %v8010_v8  ;;  %v7713_v19 = vor.u32 %v9431_v7, %v7712_v59  ;;  %v7824_v34 = vld [vmem:[%s14672_s4 + $0x1c8] sm:$0xf]  ;;  %v9459_v4 = vld [vmem:[%s14672_s4 + $0x1d4] sm:$0xf0]  ;;  %v8461_v37 = vor.u32 %v9616_v21, %v8458_v23  ;;  %v9496_v39 = vld [vmem:[%s14672_s4 + $0x304] sm:$0xf] }
 0x241   :  { %5065 = vmatpush.bf16.msrb.mxu3 %v8189_v30  ;;  %v13126_v30 = vpop.f32.mrf.mxu2  ;;  %v3102_v31 = vpop.f32.mrf.mxu0  ;;  %v7978_v36 = vld [vmem:[%s14672_s4 + $0x310] sm:$0xf0]  ;;  %v7825_v32 = vor.u32 %v9459_v4, %v7824_v34  ;;  %v7808_v54 = vld [vmem:[%s14672_s4 + $0x1a8] sm:$0xf]  ;;  %v9608_v59 = vld [vmem:[%s14672_s4 + $0x684] sm:$0xf] }
 0x242   :  { %5078 = vmatpush.bf16.msrb.mxu1 %v8317_v35  ;;  %v3327_v35 = vand.u32 2147483647, %v3319_v53  ;;  %v8109_v53 = vor.u32 %v9528_v38, %v8106_v52  ;;  %v9612_v38 = vld [vmem:[%s14672_s4 + $0x6a4] sm:$0xf]  ;;  %v8442_v52 = vld [vmem:[%s14672_s4 + $0x6b0] sm:$0xf0] }
 0x243   :  { %5053 = vmatpush.bf16.msra.mxu0 %v8045_v25  ;;  %v8237_v25 = vor.u32 %v9560_v46, %v8234_v47  ;;  %v9423_v46 = vld [vmem:[%s14672_s4 + $0xb4] sm:$0xf0]  ;;  %v7981_v47 = vor.u32 %v9496_v39, %v7978_v36  ;;  %v8445_v42 = vor.u32 %v9612_v38, %v8442_v52  ;;  %v8426_v7 = vld [vmem:[%s14672_s4 + $0x690] sm:$0xf0]  ;;  %v9604_v21 = vld [vmem:[%s14672_s4 + $0x664] sm:$0xf] }
 0x244   :  { %vm3335_vm4 = vcmp.ge.s32.totalorder %v3327_v35, 644245094  ;;  %v7776_v23 = vld [vmem:[%s14672_s4 + $0x168] sm:$0xf]  ;;  %v9600_v34 = vld [vmem:[%s14672_s4 + $0x644] sm:$0xf] }
 0x245   :  { %5066 = vmatpush.bf16.msrb.mxu3 %v8173_v43  ;;  %v8125_v43 = vor.u32 %v9532_v28, %v8122_v29  ;;  %vm13177_vm5 = vmpackc.low %vm3335_vm4, %vm3335_vm4  ;;  %v7994_v28 = vld [vmem:[%s14672_s4 + $0x330] sm:$0xf0]  ;;  %v7841_v29 = vor.u32 %v9463_v18, %v7840_v14  ;;  %v7792_v14 = vld [vmem:[%s14672_s4 + $0x188] sm:$0xf] }
 0x246   :  { %5079 = vmatpush.bf16.msrb.mxu1 %v8301_v48  ;;  %v7573_v48 = vshrl.u32 %v3232_v17, 16  ;;  %v9451_v18 = vld [vmem:[%s14672_s4 + $0x194] sm:$0xf0]  ;;  %v8394_v4 = vld [vmem:[%s14672_s4 + $0x650] sm:$0xf0] }
 0x247   :  { %5054 = vmatpush.bf16.msra.mxu0 %v8029_v0  ;;  %v9411_v39 = vld [vmem:[%s14672_s4 + $0x54] sm:$0xf0]  ;;  %v7760_v36 = vld [vmem:[%s14672_s4 + $0x148] sm:$0xf]  ;;  %v8397_v52 = vor.u32 %v9600_v34, %v8394_v4 }
 0x248   :  { %v3256_v24 = vxor.u32 %v7573_v48, %v3232_v17  ;;  %v7696_v17 = vld [vmem:[%s14672_s4 + $0xc8] sm:$0xf]  ;;  %v9455_v48 = vld [vmem:[%s14672_s4 + $0x1b4] sm:$0xf0] }
 0x249   :  { %5067 = vmatpush.bf16.msrb.mxu3 %v8157_v11  ;;  %v3343_v11 = vmul.f32 1.4285715, %v3191_v56  ;;  %v3089_v58 = vpop.f32.mrf.mxu2  ;;  %v7809_v8 = vor.u32 %v9455_v48, %v7808_v54  ;;  %v8378_v54 = vld [vmem:[%s14672_s4 + $0x630] sm:$0xf0] }
 0x24a   :  { %5080 = vmatpush.bf16.msrb.mxu1 %v8285_v1  ;;  %v3063_v1 = vpop.f32.mrf.mxu3  ;;  %v3264_v31 = vmul.u32 2246822507, %v3256_v24  ;;  %v8410_v24 = vld [vmem:[%s14672_s4 + $0x670] sm:$0xf0] }
 0x24b   :  { %v13184_v13 = vpack.c.bf16 %v3343_v11, %v3343_v11  ;;  %5055 = vmatpush.bf16.msra.mxu0 %v8013_v49  ;;  %v9419_v11 = vld [vmem:[%s14672_s4 + $0x94] sm:$0xf0] }
 0x24c   :  { %v7581_v51 = vshrl.u32 %v3264_v31, 13 }
 0x24d   :  { %5068 = vmatpush.bf16.msrb.mxu3 %v8141_v27  ;;  %v9500_v27 = vld [vmem:[%s14672_s4 + $0x324] sm:$0xf]  ;;  %8634 = vmatmul.msk.bf16.vlgmr.msrb.gmra.mxu2 %vm13177_vm5, %v13184_v13 }
 0x24e   :  { %5081 = vmatpush.bf16.msrb.mxu1 %v8269_v61  ;;  %v9427_v61 = vld [vmem:[%s14672_s4 + $0xd4] sm:$0xf0]  ;;  %v7997_v35 = vor.u32 %v9500_v27, %v7994_v28  ;;  %5089 = vmatpush.bf16.msrb.mxu2 %v8477_v57  ;;  %v3288_v57 = vxor.u32 %v7581_v51, %v3264_v31  ;;  %v7616_v51 = vld [vmem:[%s14672_s4 + $0x28] sm:$0xf] }
 0x24f   :  { %v7697_v0 = vor.u32 %v9427_v61, %v7696_v17  ;;  %v9447_v27 = vld [vmem:[%s14672_s4 + $0x174] sm:$0xf0]  ;;  %v8413_v17 = vor.u32 %v9604_v21, %v8410_v24  ;;  %v7728_v24 = vld [vmem:[%s14672_s4 + $0x108] sm:$0xf] }
 0x250   :  { %5056 = vmatpush.bf16.msra.mxu0 %v7997_v35  ;;  %v3296_v61 = vmul.u32 3266489909, %v3288_v57  ;;  %v9443_v31 = vld [vmem:[%s14672_s4 + $0x154] sm:$0xf0] }
 0x251   :  { %5069 = vmatpush.bf16.msrb.mxu3 %v8125_v43  ;;  %v7680_v43 = vld [vmem:[%s14672_s4 + $0xa8] sm:$0xf]  ;;  %v3113_v49 = vpop.f32.mrf.mxu1  ;;  %v9403_v57 = vld [vmem:[%s14672_s4 + $0x14] sm:$0xf0] }
 0x252   :  { %5082 = vmatpush.bf16.msrb.mxu1 %v8253_v50  ;;  %v444_v50 = vperm.slane %v12661_v9, 7  ;;  %5090 = vmatpush.bf16.msrb.mxu2 %v8461_v37  ;;  %v7681_v56 = vor.u32 %v9423_v46, %v7680_v43  ;;  %v7664_v9 = vld [vmem:[%s14672_s4 + $0x88] sm:$0xf]  ;;  %v7777_v37 = vor.u32 %v9447_v27, %v7776_v23  ;;  %v9559_v27 = vld [vmem:[%s14672_s4 + $0x4f4] sm:$0xf0] }
 0x253   :  { %v7665_v58 = vor.u32 %v9419_v11, %v7664_v9  ;;  %v8224_v23 = vld [vmem:[%s14672_s4 + $0x4e8] sm:$0xf] }
 0x254   :  { %5057 = vmatpush.bf16.msra.mxu0 %v7981_v47  ;;  %v3088_v1 = vadd.f32 %v13126_v30, %v444_v50  ;;  %v7648_v30 = vld [vmem:[%s14672_s4 + $0x68] sm:$0xf]  ;;  %v9596_v47 = vld [vmem:[%s14672_s4 + $0x624] sm:$0xf] }
 0x255   :  { %5070 = vmatpush.bf16.msrb.mxu3 %v8109_v53  ;;  %v8429_v53 = vor.u32 %v9608_v59, %v8426_v7  ;;  %v7744_v59 = vld [vmem:[%s14672_s4 + $0x128] sm:$0xf]  ;;  %v9439_v7 = vld [vmem:[%s14672_s4 + $0x134] sm:$0xf0]  ;;  %v8381_v11 = vor.u32 %v9596_v47, %v8378_v54 }
 0x256   :  { %5083 = vmatpush.bf16.msrb.mxu1 %v8237_v25  ;;  %5091 = vmatpush.bf16.msrb.mxu2 %v8445_v42  ;;  %v7793_v25 = vor.u32 %v9451_v18, %v7792_v14  ;;  %v3101_v28 = vadd.f32 %v13098_v2, %v3088_v1  ;;  %v7632_v2 = vld [vmem:[%s14672_s4 + $0x48] sm:$0xf]  ;;  %v7761_v42 = vor.u32 %v9443_v31, %v7760_v36  ;;  %v9592_v14 = vld [vmem:[%s14672_s4 + $0x604] sm:$0xf]  ;;  %v9491_v36 = vld [vmem:[%s14672_s4 + $0x2d4] sm:$0xf0] }
 0x257   :  { %v7633_v46 = vor.u32 %v9411_v39, %v7632_v2  ;;  %v7745_v21 = vor.u32 %v9439_v7, %v7744_v59  ;;  %v7952_v39 = vld [vmem:[%s14672_s4 + $0x2c8] sm:$0xf]  ;;  %v9587_v54 = vld [vmem:[%s14672_s4 + $0x5d4] sm:$0xf0] }
 0x258   :  { %8652 = vmatmul.msk.bf16.vlgmr.msrb.gmra.mxu3 %vm12808_vm15, %v12818_v60  ;;  %v7936_v59 = vld [vmem:[%s14672_s4 + $0x2a8] sm:$0xf] }
 0x259   :  { %5115 = vmatpush.bf16.msra.mxu3 %v7713_v19  ;;  %8655 = vmatmul.msk.bf16.vlgmr.msrb.gmra.mxu1 %vm12862_vm2, %v12872_v62  ;;  %v9415_v19 = vld [vmem:[%s14672_s4 + $0x74] sm:$0xf0]  ;;  %v3115_v38 = vpop.f32.mrf.mxu1 }
 0x25a   :  { %5128 = vmatpush.bf16.msra.mxu1 %v7841_v29  ;;  %5092 = vmatpush.bf16.msrb.mxu2 %v8429_v53  ;;  %v3152_v29 = vpop.f32.mrf.mxu0  ;;  %v7649_v35 = vor.u32 %v9415_v19, %v7648_v30  ;;  %v7600_v53 = vld [vmem:[%s14672_s4 + $0x8] sm:$0xf]  ;;  %v9495_v30 = vld [vmem:[%s14672_s4 + $0x2f4] sm:$0xf0]  ;;  %v8225_v38 = vor.u32 %v9559_v27, %v8224_v23 }
 0x25b   :  { %v3126_v43 = vpop.f32.mrf.mxu3  ;;  %v9435_v19 = vld [vmem:[%s14672_s4 + $0x114] sm:$0xf0]  ;;  %v7920_v23 = vld [vmem:[%s14672_s4 + $0x288] sm:$0xf] }
 0x25c   :  { %v9483_v27 = vld [vmem:[%s14672_s4 + $0x294] sm:$0xf0] }
 0x25d   :  { %5116 = vmatpush.bf16.msra.mxu3 %v7697_v0  ;;  %8646 = vmatmul.msk.bf16.vlgmr.msra.gmra.mxu2 %vm12614_vm11, %v12624_v16  ;;  %v3114_v0 = vadd.f32 %v3113_v49, %v3101_v28  ;;  %v3139_v50 = vpop.f32.mrf.mxu2  ;;  %v8362_v49 = vld [vmem:[%s14672_s4 + $0x610] sm:$0xf0] }
 0x25e   :  { %5129 = vmatpush.bf16.msra.mxu1 %v7825_v32  ;;  %5093 = vmatpush.bf16.msrb.mxu2 %v8413_v17  ;;  %v7589_v32 = vshrl.u32 %v3296_v61, 16  ;;  %v8352_v17 = vld [vmem:[%s14672_s4 + $0x5e8] sm:$0xf] }
 0x25f   :  { %v3127_v48 = vadd.f32 %v3126_v43, %v3114_v0  ;;  %v7729_v0 = vor.u32 %v9435_v19, %v7728_v24  ;;  %v8336_v43 = vld [vmem:[%s14672_s4 + $0x5c8] sm:$0xf]  ;;  %v9648_v24 = vld [vmem:[%s14672_s4 + $0x7c4] sm:$0xf] }
 0x260   :  { %v3320_v18 = vxor.u32 %v7589_v32, %v3296_v61  ;;  %v9591_v61 = vld [vmem:[%s14672_s4 + $0x5f4] sm:$0xf0] }
 0x261   :  { %5117 = vmatpush.bf16.msra.mxu3 %v7681_v56  ;;  %v9407_v56 = vld [vmem:[%s14672_s4 + $0x34] sm:$0xf0]  ;;  %v3165_v28 = vpop.f32.mrf.mxu1  ;;  %v8353_v47 = vor.u32 %v9591_v61, %v8352_v17  ;;  %v8176_v17 = vld [vmem:[%s14672_s4 + $0x488] sm:$0xf] }
 0x262   :  { %5130 = vmatpush.bf16.msra.mxu1 %v7809_v8  ;;  %v3140_v8 = vadd.f32 %v3139_v50, %v3127_v48  ;;  %5094 = vmatpush.bf16.msrb.mxu2 %v8397_v52  ;;  %v3154_v9 = vpop.f32.mrf.mxu0  ;;  %v7617_v1 = vor.u32 %v9407_v56, %v7616_v51  ;;  %v8208_v52 = vld [vmem:[%s14672_s4 + $0x4c8] sm:$0xf]  ;;  %v9555_v32 = vld [vmem:[%s14672_s4 + $0x4d4] sm:$0xf0]  ;;  %v9652_v50 = vld [vmem:[%s14672_s4 + $0x7e4] sm:$0xf]  ;;  %v7953_v56 = vor.u32 %v9491_v36, %v7952_v39 }
 0x263   :  { %v3128_v4 = vpop.f32.mrf.mxu3  ;;  %v9487_v9 = vld [vmem:[%s14672_s4 + $0x2b4] sm:$0xf0]  ;;  %v7904_v36 = vld [vmem:[%s14672_s4 + $0x268] sm:$0xf]  ;;  %v8554_v48 = vld [vmem:[%s14672_s4 + $0x790] sm:$0xf0] }
 0x264   :  { %v9547_v61 = vld [vmem:[%s14672_s4 + $0x494] sm:$0xf0]  ;;  %v9644_v4 = vld [vmem:[%s14672_s4 + $0x7a4] sm:$0xf] }
 0x265   :  { %5118 = vmatpush.bf16.msra.mxu3 %v7665_v58  ;;  %v3153_v58 = vadd.f32 %v3152_v29, %v3140_v8  ;;  %v8365_v29 = vor.u32 %v9592_v14, %v8362_v49  ;;  %v3141_v31 = vpop.f32.mrf.mxu2  ;;  %v8209_v8 = vor.u32 %v9555_v32, %v8208_v52  ;;  %v8337_v14 = vor.u32 %v9587_v54, %v8336_v43  ;;  %v9551_v49 = vld [vmem:[%s14672_s4 + $0x4b4] sm:$0xf0]  ;;  %v8288_v43 = vld [vmem:[%s14672_s4 + $0x568] sm:$0xf]  ;;  %v9640_v54 = vld [vmem:[%s14672_s4 + $0x784] sm:$0xf] }
 0x266   :  { %5131 = vmatpush.bf16.msra.mxu1 %v7793_v25  ;;  %v7968_v25 = vld [vmem:[%s14672_s4 + $0x2e8] sm:$0xf]  ;;  %5095 = vmatpush.bf16.msrb.mxu2 %v8381_v11  ;;  %v8177_v39 = vor.u32 %v9547_v61, %v8176_v17  ;;  %v9479_v31 = vld [vmem:[%s14672_s4 + $0x274] sm:$0xf0] }
 0x267   :  { %v3166_v34 = vadd.f32 %v3165_v28, %v3153_v58  ;;  %v7969_v2 = vor.u32 %v9495_v30, %v7968_v25  ;;  %v8192_v11 = vld [vmem:[%s14672_s4 + $0x4a8] sm:$0xf]  ;;  %v8586_v25 = vld [vmem:[%s14672_s4 + $0x7d0] sm:$0xf0]  ;;  %v7937_v30 = vor.u32 %v9487_v9, %v7936_v59  ;;  %v9543_v32 = vld [vmem:[%s14672_s4 + $0x474] sm:$0xf0] }
 0x268   :  { %v8193_v19 = vor.u32 %v9551_v49, %v8192_v11  ;;  %v8557_v11 = vor.u32 %v9640_v54, %v8554_v48  ;;  %v8272_v49 = vld [vmem:[%s14672_s4 + $0x548] sm:$0xf] }
 0x269   :  { %5119 = vmatpush.bf16.msra.mxu3 %v7649_v35  ;;  %v3328_v35 = vand.u32 2147483647, %v3320_v18  ;;  %vm3176_vm6 = vcmp.ge.f32.partialorder %v3166_v34, 0.0  ;;  %v3167_v58 = vpop.f32.mrf.mxu1  ;;  %v8128_v61 = vld [vmem:[%s14672_s4 + $0x428] sm:$0xf] }
 0x26a   :  { %5132 = vmatpush.bf16.msra.mxu1 %v7777_v37  ;;  %v7601_v37 = vor.u32 %v9403_v57, %v7600_v53  ;;  %5096 = vmatpush.bf16.msrb.mxu2 %v8365_v29  ;;  %v8320_v53 = vld [vmem:[%s14672_s4 + $0x5a8] sm:$0xf]  ;;  %v8589_v29 = vor.u32 %v9648_v24, %v8586_v25  ;;  %v9636_v58 = vld [vmem:[%s14672_s4 + $0x764] sm:$0xf]  ;;  %v8900_v18 = vld [vmem:[%s14674_s6 + $0x160] sm:$0xf] }
 0x26b   :  { %vm13372_vm7 = vcmp.ge.s32.totalorder %v3328_v35, 644245094  ;;  %v8304_v35 = vld [vmem:[%s14672_s4 + $0x588] sm:$0xf] }
 0x26c   :  { %vm13397_vm9 = vmpackc.low %vm13372_vm7, %vm13372_vm7  ;;  %v8240_v54 = vld [vmem:[%s14672_s4 + $0x508] sm:$0xf] }
 0x26d   :  { %5120 = vmatpush.bf16.msra.mxu3 %v7633_v46  ;;  %v3184_v46 = vmul.f32 0.2, %v3166_v34  ;;  %8658 = vmatmul.msk.bf16.vlgmr.msrb.gmra.mxu2 %vm13177_vm5, %v13184_v13 }
 0x26e   :  { %5133 = vmatpush.bf16.msra.mxu1 %v7761_v42  ;;  %v8602_v42 = vld [vmem:[%s14672_s4 + $0x7f0] sm:$0xf0]  ;;  %5141 = vmatpush.bf16.msra.mxu2 %v7969_v2  ;;  %v7921_v2 = vor.u32 %v9483_v27, %v7920_v23  ;;  %v9471_v23 = vld [vmem:[%s14672_s4 + $0x234] sm:$0xf0] }
 0x26f   :  { %v3192_v51 = vsel %vm3176_vm6, %v3166_v34, %v3184_v46  ;;  %v9579_v34 = vld [vmem:[%s14672_s4 + $0x594] sm:$0xf0]  ;;  %v13469_v46 = vld [vmem:[%s14673_s5] sm:$0xf] }
 0x270   :  { %v3344_v7 = vmul.f32 1.4285715, %v3192_v51  ;;  %v3619_v59 = vperm.slane %v13469_v46, 0 }
 0x271   :  { %5121 = vmatpush.bf16.msra.mxu3 %v7617_v1  ;;  %v8605_v1 = vor.u32 %v9652_v50, %v8602_v42  ;;  %v7905_v42 = vor.u32 %v9479_v31, %v7904_v36 }
 0x272   :  { %5134 = vmatpush.bf16.msra.mxu1 %v7745_v21  ;;  %v13407_v57 = vpack.c.bf16 %v3344_v7, %v3344_v7  ;;  %v9583_v21 = vld [vmem:[%s14672_s4 + $0x5b4] sm:$0xf0]  ;;  %5142 = vmatpush.bf16.msra.mxu2 %v7953_v56  ;;  %v7888_v7 = vld [vmem:[%s14672_s4 + $0x248] sm:$0xf] }
 0x273   :  { %v8321_v28 = vor.u32 %v9583_v21, %v8320_v53  ;;  %v9571_v53 = vld [vmem:[%s14672_s4 + $0x554] sm:$0xf0]  ;;  %v8538_v21 = vld [vmem:[%s14672_s4 + $0x770] sm:$0xf0] }
 0x274   :  { %8637 = vmatmul.msk.bf16.vlgmr.msrb.gmra.mxu0 %vm13397_vm9, %v13407_v57  ;;  %v8541_v17 = vor.u32 %v9636_v58, %v8538_v21 }
 0x275   :  { %5122 = vmatpush.bf16.msra.mxu3 %v7601_v37  ;;  %5102 = vmatpush.bf16.msrb.mxu0 %v8605_v1  ;;  %v8570_v37 = vld [vmem:[%s14672_s4 + $0x7b0] sm:$0xf0]  ;;  %v9539_v1 = vld [vmem:[%s14672_s4 + $0x454] sm:$0xf0] }
 0x276   :  { %5135 = vmatpush.bf16.msra.mxu1 %v7729_v0  ;;  %5143 = vmatpush.bf16.msra.mxu2 %v7937_v30  ;;  %v8160_v0 = vld [vmem:[%s14672_s4 + $0x468] sm:$0xf]  ;;  %v8573_v52 = vor.u32 %v9644_v4, %v8570_v37  ;;  %v9567_v4 = vld [vmem:[%s14672_s4 + $0x534] sm:$0xf0]  ;;  %v9632_v37 = vld [vmem:[%s14672_s4 + $0x744] sm:$0xf] }
 0x277   :  { %v8161_v56 = vor.u32 %v9543_v32, %v8160_v0  ;;  %v7856_v0 = vld [vmem:[%s14672_s4 + $0x208] sm:$0xf] }
 0x278   :  { %8664 = vmatmul.msk.bf16.vlgmr.msra.gmra.mxu3 %vm12588_vm8, %v12612_v45  ;;  %v4929_v50 = vpop.f32.mrf.mxu1 }
 0x279   :  { %5167 = vmatpush.bf16.msrb.mxu3 %v8225_v38  ;;  %8667 = vmatmul.msk.bf16.vlgmr.msra.gmra.mxu1 %vm12600_vm10, %v12620_v15  ;;  %v8305_v38 = vor.u32 %v9579_v34, %v8304_v35  ;;  %v13480_v51 = vpop.f32.mrf.mxu0  ;;  %v9535_v35 = vld [vmem:[%s14672_s4 + $0x434] sm:$0xf0]  ;;  %v8256_v34 = vld [vmem:[%s14672_s4 + $0x528] sm:$0xf] }
 0x27a   :  { %5180 = vmatpush.bf16.msrb.mxu1 %v8353_v47  ;;  %5103 = vmatpush.bf16.msrb.mxu0 %v8589_v29  ;;  %v9575_v47 = vld [vmem:[%s14672_s4 + $0x574] sm:$0xf0]  ;;  %v8273_v29 = vor.u32 %v9571_v53, %v8272_v49  ;;  %v8129_v32 = vor.u32 %v9535_v35, %v8128_v61  ;;  %v9461_v49 = vld [vmem:[%s14672_s4 + $0x1ec] sm:$0xf]  ;;  %v7842_v53 = vld [vmem:[%s14672_s4 + $0x1f8] sm:$0xf0] }
 0x27b   :  { %5144 = vmatpush.bf16.msra.mxu2 %v7921_v2  ;;  %v8289_v9 = vor.u32 %v9575_v47, %v8288_v43  ;;  %v4916_v25 = vpop.f32.mrf.mxu3  ;;  %v8522_v2 = vld [vmem:[%s14672_s4 + $0x750] sm:$0xf0]  ;;  %v8112_v43 = vld [vmem:[%s14672_s4 + $0x408] sm:$0xf]  ;;  %v9531_v47 = vld [vmem:[%s14672_s4 + $0x414] sm:$0xf0] }
 0x27c   :  { %v4917_v27 = vadd.f32 %v4916_v25, %v3619_v59  ;;  %v8480_v59 = vld [vmem:[%s14672_s4 + $0x6e8] sm:$0xf]  ;;  %v8490_v61 = vld [vmem:[%s14672_s4 + $0x710] sm:$0xf0]  ;;  %v9425_v35 = vld [vmem:[%s14672_s4 + $0xcc] sm:$0xf] }
 0x27d   :  { %5168 = vmatpush.bf16.msrb.mxu3 %v8209_v8  ;;  %v9475_v8 = vld [vmem:[%s14672_s4 + $0x254] sm:$0xf0] }
 0x27e   :  { %5181 = vmatpush.bf16.msrb.mxu1 %v8337_v14  ;;  %5104 = vmatpush.bf16.msrb.mxu0 %v8573_v52  ;;  %v8144_v14 = vld [vmem:[%s14672_s4 + $0x448] sm:$0xf]  ;;  %v7889_v24 = vor.u32 %v9475_v8, %v7888_v7  ;;  %v9623_v7 = vld [vmem:[%s14672_s4 + $0x6f4] sm:$0xf0]  ;;  %v9628_v8 = vld [vmem:[%s14672_s4 + $0x724] sm:$0xf] }
 0x27f   :  { %5145 = vmatpush.bf16.msra.mxu2 %v7905_v42  ;;  %v8145_v30 = vor.u32 %v9539_v1, %v8144_v14  ;;  %v8525_v42 = vor.u32 %v9632_v37, %v8522_v2  ;;  %v7714_v1 = vld [vmem:[%s14672_s4 + $0xf8] sm:$0xf0]  ;;  %v8481_v25 = vor.u32 %v9623_v7, %v8480_v59  ;;  %v9523_v59 = vld [vmem:[%s14672_s4 + $0x3d4] sm:$0xf0]  ;;  %v8432_v7 = vld [vmem:[%s14672_s4 + $0x688] sm:$0xf] }
 0x280   :  { %v4931_v36 = vpop.f32.mrf.mxu1  ;;  %v7826_v37 = vld [vmem:[%s14672_s4 + $0x1d8] sm:$0xf0] }
 0x281   :  { %5169 = vmatpush.bf16.msrb.mxu3 %v8193_v19  ;;  %v7872_v19 = vld [vmem:[%s14672_s4 + $0x228] sm:$0xf]  ;;  %v4957_v52 = vpop.f32.mrf.mxu0  ;;  %v9527_v36 = vld [vmem:[%s14672_s4 + $0x3f4] sm:$0xf0] }
 0x282   :  { %5182 = vmatpush.bf16.msrb.mxu1 %v8321_v28  ;;  %v4942_v28 = vpop.f32.mrf.mxu2  ;;  %5105 = vmatpush.bf16.msrb.mxu0 %v8557_v11  ;;  %v7873_v31 = vor.u32 %v9471_v23, %v7872_v19  ;;  %v9429_v11 = vld [vmem:[%s14672_s4 + $0xec] sm:$0xf] }
 0x283   :  { %5146 = vmatpush.bf16.msra.mxu2 %v7889_v24  ;;  %v4918_v21 = vpop.f32.mrf.mxu3  ;;  %v8113_v24 = vor.u32 %v9531_v47, %v8112_v43  ;;  %v9421_v43 = vld [vmem:[%s14672_s4 + $0xac] sm:$0xf] }
 0x284   :  { %8649 = vmatmul.msk.bf16.vlgmr.msra.gmra.mxu0 %vm12629_vm12, %v12641_v20  ;;  %v7794_v21 = vld [vmem:[%s14672_s4 + $0x198] sm:$0xf0] }
 0x285   :  { %5170 = vmatpush.bf16.msrb.mxu3 %v8177_v39  ;;  %v4930_v39 = vadd.f32 %v4929_v50, %v4917_v27  ;;  %v8257_v50 = vor.u32 %v9567_v4, %v8256_v34  ;;  %v8464_v27 = vld [vmem:[%s14672_s4 + $0x6c8] sm:$0xf]  ;;  %v7698_v34 = vld [vmem:[%s14672_s4 + $0xd8] sm:$0xf0]  ;;  %v9457_v4 = vld [vmem:[%s14672_s4 + $0x1cc] sm:$0xf] }
 0x286   :  { %5183 = vmatpush.bf16.msrb.mxu1 %v8305_v38  ;;  %v9467_v38 = vld [vmem:[%s14672_s4 + $0x214] sm:$0xf0]  ;;  %5106 = vmatpush.bf16.msrb.mxu0 %v8541_v17  ;;  %v9624_v17 = vld [vmem:[%s14672_s4 + $0x704] sm:$0xf]  ;;  %v7701_v52 = vor.u32 %v9425_v35, %v7698_v34  ;;  %v7778_v35 = vld [vmem:[%s14672_s4 + $0x178] sm:$0xf0] }
 0x287   :  { %v4943_v48 = vadd.f32 %v4942_v28, %v4930_v39  ;;  %5147 = vmatpush.bf16.msra.mxu2 %v7873_v31  ;;  %v7857_v14 = vor.u32 %v9467_v38, %v7856_v0  ;;  %v9619_v28 = vld [vmem:[%s14672_s4 + $0x6d4] sm:$0xf0]  ;;  %v8096_v39 = vld [vmem:[%s14672_s4 + $0x3e8] sm:$0xf]  ;;  %v8493_v31 = vor.u32 %v9624_v17, %v8490_v61  ;;  %v7650_v17 = vld [vmem:[%s14672_s4 + $0x78] sm:$0xf0] }
 0x288   :  { %v8465_v2 = vor.u32 %v9619_v28, %v8464_v27  ;;  %v8448_v0 = vld [vmem:[%s14672_s4 + $0x6a8] sm:$0xf]  ;;  %v9615_v38 = vld [vmem:[%s14672_s4 + $0x6b4] sm:$0xf0]  ;;  %v8097_v47 = vor.u32 %v9527_v36, %v8096_v39  ;;  %v9445_v61 = vld [vmem:[%s14672_s4 + $0x16c] sm:$0xf] }
 0x289   :  { %5171 = vmatpush.bf16.msrb.mxu3 %v8161_v56  ;;  %v9563_v56 = vld [vmem:[%s14672_s4 + $0x514] sm:$0xf0]  ;;  %v13577_v58 = vadd.f32 %v13480_v51, %v4943_v48  ;;  %v7845_v51 = vor.u32 %v9461_v49, %v7842_v53  ;;  %v9453_v48 = vld [vmem:[%s14672_s4 + $0x1ac] sm:$0xf]  ;;  %v7666_v49 = vld [vmem:[%s14672_s4 + $0x98] sm:$0xf0] }
 0x28a   :  { %5184 = vmatpush.bf16.msrb.mxu1 %v8289_v9  ;;  %v8506_v9 = vld [vmem:[%s14672_s4 + $0x730] sm:$0xf0]  ;;  %5107 = vmatpush.bf16.msrb.mxu0 %v8525_v42  ;;  %v8241_v19 = vor.u32 %v9563_v56, %v8240_v54  ;;  %v7682_v54 = vld [vmem:[%s14672_s4 + $0xb8] sm:$0xf0]  ;;  %v8449_v42 = vor.u32 %v9615_v38, %v8448_v0  ;;  %v8080_v56 = vld [vmem:[%s14672_s4 + $0x3c8] sm:$0xf] }
 0x28b   :  { %v8509_v23 = vor.u32 %v9628_v8, %v8506_v9  ;;  %5148 = vmatpush.bf16.msra.mxu2 %v7857_v14  ;;  %v9611_v8 = vld [vmem:[%s14672_s4 + $0x694] sm:$0xf0]  ;;  %v7685_v9 = vor.u32 %v9421_v43, %v7682_v54  ;;  %v9417_v14 = vld [vmem:[%s14672_s4 + $0x8c] sm:$0xf]  ;;  %v7762_v43 = vld [vmem:[%s14672_s4 + $0x158] sm:$0xf0] }
 0x28c   :  { %v9449_v53 = vld [vmem:[%s14672_s4 + $0x18c] sm:$0xf]  ;;  %v7669_v27 = vor.u32 %v9417_v14, %v7666_v49  ;;  %v9603_v39 = vld [vmem:[%s14672_s4 + $0x654] sm:$0xf0]  ;;  %v8032_v54 = vld [vmem:[%s14672_s4 + $0x368] sm:$0xf] }
 0x28d   :  { %5172 = vmatpush.bf16.msrb.mxu3 %v8145_v30  ;;  %v4944_v30 = vpop.f32.mrf.mxu2  ;;  %v7797_v28 = vor.u32 %v9449_v53, %v7794_v21  ;;  %v9409_v0 = vld [vmem:[%s14672_s4 + $0x4c] sm:$0xf]  ;;  %v7746_v53 = vld [vmem:[%s14672_s4 + $0x138] sm:$0xf0] }
 0x28e   :  { %5185 = vmatpush.bf16.msrb.mxu1 %v8273_v29  ;;  %v7717_v29 = vor.u32 %v9429_v11, %v7714_v1  ;;  %5108 = vmatpush.bf16.msrb.mxu0 %v8509_v23  ;;  %v8081_v1 = vor.u32 %v9523_v59, %v8080_v56  ;;  %v9519_v30 = vld [vmem:[%s14672_s4 + $0x3b4] sm:$0xf0]  ;;  %v9437_v49 = vld [vmem:[%s14672_s4 + $0x12c] sm:$0xf] }
 0x28f   :  { %5193 = vmatpush.bf16.msrb.mxu2 %v8481_v25  ;;  %v8064_v25 = vld [vmem:[%s14672_s4 + $0x3a8] sm:$0xf]  ;;  %v9607_v23 = vld [vmem:[%s14672_s4 + $0x674] sm:$0xf0] }
 0x290   :  { %8670 = vmatmul.msk.bf16.vlgmr.msra.gmra.mxu2 %vm12614_vm11, %v12624_v16 }
 0x291   :  { %5173 = vmatpush.bf16.msrb.mxu3 %v8129_v32  ;;  %v7829_v32 = vor.u32 %v9457_v4, %v7826_v37  ;;  %v8048_v4 = vld [vmem:[%s14672_s4 + $0x388] sm:$0xf]  ;;  %v9515_v37 = vld [vmem:[%s14672_s4 + $0x394] sm:$0xf0] }
 0x292   :  { %5186 = vmatpush.bf16.msrb.mxu1 %v8257_v50  ;;  %v7810_v50 = vld [vmem:[%s14672_s4 + $0x1b8] sm:$0xf0]  ;;  %5109 = vmatpush.bf16.msrb.mxu0 %v8493_v31  ;;  %v7781_v31 = vor.u32 %v9445_v61, %v7778_v35  ;;  %v8049_v38 = vor.u32 %v9515_v37, %v8048_v4  ;;  %v9433_v35 = vld [vmem:[%s14672_s4 + $0x10c] sm:$0xf]  ;;  %v8000_v4 = vld [vmem:[%s14672_s4 + $0x328] sm:$0xf] }
 0x293   :  { %5194 = vmatpush.bf16.msrb.mxu2 %v8465_v2  ;;  %v7813_v11 = vor.u32 %v9453_v48, %v7810_v50  ;;  %v8400_v2 = vld [vmem:[%s14672_s4 + $0x648] sm:$0xf]  ;;  %v9511_v48 = vld [vmem:[%s14672_s4 + $0x374] sm:$0xf0] }
 0x294   :  { %v8384_v50 = vld [vmem:[%s14672_s4 + $0x628] sm:$0xf]  ;;  %v8033_v14 = vor.u32 %v9511_v48, %v8032_v54 }
 0x295   :  { %5174 = vmatpush.bf16.msrb.mxu3 %v8113_v24  ;;  %8661 = vmatmul.msk.bf16.vlgmr.msrb.gmra.mxu0 %vm13397_vm9, %v13407_v57  ;;  %v8433_v24 = vor.u32 %v9611_v8, %v8432_v7  ;;  %v7984_v54 = vld [vmem:[%s14672_s4 + $0x308] sm:$0xf] }
 0x296   :  { %5187 = vmatpush.bf16.msrb.mxu1 %v8241_v19  ;;  %5154 = vmatpush.bf16.msra.mxu0 %v8097_v47  ;;  %v8416_v19 = vld [vmem:[%s14672_s4 + $0x668] sm:$0xf]  ;;  %v8401_v47 = vor.u32 %v9603_v39, %v8400_v2  ;;  %v4981_v59 = vpop.f32.mrf.mxu1  ;;  %v9503_v2 = vld [vmem:[%s14672_s4 + $0x334] sm:$0xf0]  ;;  %v9557_v39 = vld [vmem:[%s14672_s4 + $0x4ec] sm:$0xf] }
 0x297   :  { %5195 = vmatpush.bf16.msrb.mxu2 %v8449_v42  ;;  %v8417_v34 = vor.u32 %v9607_v23, %v8416_v19  ;;  %v9599_v42 = vld [vmem:[%s14672_s4 + $0x634] sm:$0xf0]  ;;  %v9401_v23 = vld [vmem:[%s14672_s4 + $0xc] sm:$0xf]  ;;  %v8001_v48 = vor.u32 %v9503_v2, %v8000_v4 }
 0x298   :  { %8676 = vmatmul.msk.bf16.vlgmr.msrb.gmra.mxu3 %vm12808_vm15, %v12818_v60  ;;  %v8385_v21 = vor.u32 %v9599_v42, %v8384_v50  ;;  %v9595_v19 = vld [vmem:[%s14672_s4 + $0x614] sm:$0xf0]  ;;  %v9545_v4 = vld [vmem:[%s14672_s4 + $0x48c] sm:$0xf] }
 0x299   :  { %5219 = vmatpush.bf16.msra.mxu3 %v7717_v29  ;;  %8679 = vmatmul.msk.bf16.vlgmr.msrb.gmra.mxu1 %vm12862_vm2, %v12872_v62  ;;  %v9413_v29 = vld [vmem:[%s14672_s4 + $0x6c] sm:$0xf]  ;;  %v9499_v42 = vld [vmem:[%s14672_s4 + $0x314] sm:$0xf0] }
 0x29a   :  { %5232 = vmatpush.bf16.msra.mxu1 %v7845_v51  ;;  %5155 = vmatpush.bf16.msra.mxu0 %v8081_v1  ;;  %v8065_v51 = vor.u32 %v9519_v30, %v8064_v25  ;;  %v7653_v36 = vor.u32 %v9413_v29, %v7650_v17  ;;  %v7618_v1 = vld [vmem:[%s14672_s4 + $0x38] sm:$0xf0]  ;;  %v8368_v30 = vld [vmem:[%s14672_s4 + $0x608] sm:$0xf]  ;;  %v9577_v2 = vld [vmem:[%s14672_s4 + $0x58c] sm:$0xf] }
 0x29b   :  { %5196 = vmatpush.bf16.msrb.mxu2 %v8433_v24  ;;  %v4968_v56 = vpop.f32.mrf.mxu3  ;;  %v9507_v24 = vld [vmem:[%s14672_s4 + $0x354] sm:$0xf0]  ;;  %v7602_v29 = vld [vmem:[%s14672_s4 + $0x18] sm:$0xf0]  ;;  %v8369_v37 = vor.u32 %v9595_v19, %v8368_v30 }
 0x29c   :  { %v7970_v17 = vld [vmem:[%s14672_s4 + $0x2f8] sm:$0xf0] }
 0x29d   :  { %5220 = vmatpush.bf16.msra.mxu3 %v7701_v52  ;;  %v7634_v52 = vld [vmem:[%s14672_s4 + $0x58] sm:$0xf0] }
 0x29e   :  { %5233 = vmatpush.bf16.msra.mxu1 %v7829_v32  ;;  %5156 = vmatpush.bf16.msra.mxu0 %v8065_v51  ;;  %v9441_v32 = vld [vmem:[%s14672_s4 + $0x14c] sm:$0xf]  ;;  %v7637_v7 = vor.u32 %v9409_v0, %v7634_v52  ;;  %v7938_v30 = vld [vmem:[%s14672_s4 + $0x2b8] sm:$0xf0] }
 0x29f   :  { %5197 = vmatpush.bf16.msrb.mxu2 %v8417_v34  ;;  %v7765_v8 = vor.u32 %v9441_v32, %v7762_v43  ;;  %v9493_v51 = vld [vmem:[%s14672_s4 + $0x2ec] sm:$0xf]  ;;  %v7730_v34 = vld [vmem:[%s14672_s4 + $0x118] sm:$0xf0]  ;;  %v4983_v32 = vpop.f32.mrf.mxu1  ;;  %v7605_v43 = vor.u32 %v9401_v23, %v7602_v29 }
 0x2a0   :  { %v9589_v0 = vld [vmem:[%s14672_s4 + $0x5ec] sm:$0xf]  ;;  %v7906_v32 = vld [vmem:[%s14672_s4 + $0x278] sm:$0xf0] }
 0x2a1   :  { %5221 = vmatpush.bf16.msra.mxu3 %v7685_v9  ;;  %v9405_v9 = vld [vmem:[%s14672_s4 + $0x2c] sm:$0xf] }
 0x2a2   :  { %5234 = vmatpush.bf16.msra.mxu1 %v7813_v11  ;;  %v4969_v11 = vadd.f32 %v4968_v56, %v13577_v58  ;;  %5157 = vmatpush.bf16.msra.mxu0 %v8049_v38  ;;  %v8016_v58 = vld [vmem:[%s14672_s4 + $0x348] sm:$0xf]  ;;  %v8354_v38 = vld [vmem:[%s14672_s4 + $0x5f8] sm:$0xf0]  ;;  %v9489_v56 = vld [vmem:[%s14672_s4 + $0x2cc] sm:$0xf] }
 0x2a3   :  { %5198 = vmatpush.bf16.msrb.mxu2 %v8401_v47  ;;  %v8017_v61 = vor.u32 %v9507_v24, %v8016_v58  ;;  %v4970_v52 = vpop.f32.mrf.mxu3  ;;  %v7733_v47 = vor.u32 %v9433_v35, %v7730_v34  ;;  %v9485_v24 = vld [vmem:[%s14672_s4 + $0x2ac] sm:$0xf] }
 0x2a4   :  { %v13742_v25 = vadd.f32 %v4981_v59, %v4969_v11  ;;  %v7954_v59 = vld [vmem:[%s14672_s4 + $0x2d8] sm:$0xf0]  ;;  %v9585_v11 = vld [vmem:[%s14672_s4 + $0x5cc] sm:$0xf]  ;;  %v7941_v35 = vor.u32 %v9485_v24, %v7938_v30  ;;  %v8544_v30 = vld [vmem:[%s14672_s4 + $0x768] sm:$0xf] }
 0x2a5   :  { %5222 = vmatpush.bf16.msra.mxu3 %v7669_v27  ;;  %v7621_v27 = vor.u32 %v9405_v9, %v7618_v1  ;;  %v8210_v9 = vld [vmem:[%s14672_s4 + $0x4d8] sm:$0xf0]  ;;  %v8608_v1 = vld [vmem:[%s14672_s4 + $0x7e8] sm:$0xf]  ;;  %v9581_v29 = vld [vmem:[%s14672_s4 + $0x5ac] sm:$0xf] }
 0x2a6   :  { %5235 = vmatpush.bf16.msra.mxu1 %v7797_v28  ;;  %v7749_v28 = vor.u32 %v9437_v49, %v7746_v53  ;;  %5158 = vmatpush.bf16.msra.mxu0 %v8033_v14  ;;  %v8338_v14 = vld [vmem:[%s14672_s4 + $0x5d8] sm:$0xf0]  ;;  %v9655_v49 = vld [vmem:[%s14672_s4 + $0x7f4] sm:$0xf0]  ;;  %v7957_v53 = vor.u32 %v9489_v56, %v7954_v59  ;;  %v9477_v52 = vld [vmem:[%s14672_s4 + $0x26c] sm:$0xf] }
 0x2a7   :  { %5199 = vmatpush.bf16.msrb.mxu2 %v8385_v21  ;;  %v7985_v21 = vor.u32 %v9499_v42, %v7984_v54  ;;  %v8341_v19 = vor.u32 %v9585_v11, %v8338_v14  ;;  %v8609_v23 = vor.u32 %v9655_v49, %v8608_v1  ;;  %v9541_v54 = vld [vmem:[%s14672_s4 + $0x46c] sm:$0xf]  ;;  %v8290_v42 = vld [vmem:[%s14672_s4 + $0x578] sm:$0xf0]  ;;  %v8560_v56 = vld [vmem:[%s14672_s4 + $0x788] sm:$0xf] }
 0x2a8   :  { %v9643_v59 = vld [vmem:[%s14672_s4 + $0x794] sm:$0xf0]  ;;  %v3620_v11 = vperm.slane %v13469_v46, 1  ;;  %v9473_v14 = vld [vmem:[%s14672_s4 + $0x24c] sm:$0xf] }
 0x2a9   :  { %5223 = vmatpush.bf16.msra.mxu3 %v7653_v36  ;;  %v8226_v36 = vld [vmem:[%s14672_s4 + $0x4f8] sm:$0xf0] }
 0x2aa   :  { %5236 = vmatpush.bf16.msra.mxu1 %v7781_v31  ;;  %v7973_v31 = vor.u32 %v9493_v51, %v7970_v17  ;;  %5159 = vmatpush.bf16.msra.mxu0 %v8017_v61  ;;  %v8229_v50 = vor.u32 %v9557_v39, %v8226_v36  ;;  %v8322_v51 = vld [vmem:[%s14672_s4 + $0x5b8] sm:$0xf0]  ;;  %v8592_v17 = vld [vmem:[%s14672_s4 + $0x7c8] sm:$0xf]  ;;  %v9651_v61 = vld [vmem:[%s14672_s4 + $0x7d4] sm:$0xf0] }
 0x2ab   :  { %5200 = vmatpush.bf16.msrb.mxu2 %v8369_v37  ;;  %v8593_v34 = vor.u32 %v9651_v61, %v8592_v17  ;;  %v8178_v37 = vld [vmem:[%s14672_s4 + $0x498] sm:$0xf0]  ;;  %v8576_v36 = vld [vmem:[%s14672_s4 + $0x7a8] sm:$0xf] }
 0x2ac   :  { %v8306_v39 = vld [vmem:[%s14672_s4 + $0x598] sm:$0xf0] }
 0x2ad   :  { %5224 = vmatpush.bf16.msra.mxu3 %v7637_v7  ;;  %v8357_v7 = vor.u32 %v9589_v0, %v8354_v38  ;;  %v8181_v38 = vor.u32 %v9545_v4, %v8178_v37  ;;  %v7890_v1 = vld [vmem:[%s14672_s4 + $0x258] sm:$0xf0]  ;;  %v9635_v4 = vld [vmem:[%s14672_s4 + $0x754] sm:$0xf0] }
 0x2ae   :  { %5237 = vmatpush.bf16.msra.mxu1 %v7765_v8  ;;  %v9553_v8 = vld [vmem:[%s14672_s4 + $0x4cc] sm:$0xf]  ;;  %5160 = vmatpush.bf16.msra.mxu0 %v8001_v48  ;;  %v8162_v48 = vld [vmem:[%s14672_s4 + $0x478] sm:$0xf0] }
 0x2af   :  { %5245 = vmatpush.bf16.msra.mxu2 %v7973_v31  ;;  %v8213_v58 = vor.u32 %v9553_v8, %v8210_v9  ;;  %v9647_v31 = vld [vmem:[%s14672_s4 + $0x7b4] sm:$0xf0]  ;;  %v7909_v8 = vor.u32 %v9477_v52, %v7906_v32  ;;  %v8165_v9 = vor.u32 %v9541_v54, %v8162_v48  ;;  %v8146_v46 = vld [vmem:[%s14672_s4 + $0x458] sm:$0xf0]  ;;  %v9621_v54 = vld [vmem:[%s14672_s4 + $0x6ec] sm:$0xf] }
 0x2b0   :  { %8682 = vmatmul.msk.bf16.vlgmr.msrb.gmra.mxu2 %vm13177_vm5, %v13184_v13  ;;  %v8274_v24 = vld [vmem:[%s14672_s4 + $0x558] sm:$0xf0] }
 0x2b1   :  { %5225 = vmatpush.bf16.msra.mxu3 %v7621_v27  ;;  %v9549_v27 = vld [vmem:[%s14672_s4 + $0x4ac] sm:$0xf]  ;;  %v8114_v52 = vld [vmem:[%s14672_s4 + $0x418] sm:$0xf0] }
 0x2b2   :  { %5238 = vmatpush.bf16.msra.mxu1 %v7749_v28  ;;  %v8194_v28 = vld [vmem:[%s14672_s4 + $0x4b8] sm:$0xf0]  ;;  %5161 = vmatpush.bf16.msra.mxu0 %v7985_v21  ;;  %v9537_v21 = vld [vmem:[%s14672_s4 + $0x44c] sm:$0xf] }
 0x2b3   :  { %5246 = vmatpush.bf16.msra.mxu2 %v7957_v53  ;;  %v8197_v55 = vor.u32 %v9549_v27, %v8194_v28  ;;  %v8561_v53 = vor.u32 %v9643_v59, %v8560_v56  ;;  %v8149_v28 = vor.u32 %v9537_v21, %v8146_v46  ;;  %v8482_v48 = vld [vmem:[%s14672_s4 + $0x6f8] sm:$0xf0]  ;;  %v9631_v56 = vld [vmem:[%s14672_s4 + $0x734] sm:$0xf0]  ;;  %v9617_v21 = vld [vmem:[%s14672_s4 + $0x6cc] sm:$0xf] }
 0x2b4   :  { %v8466_v46 = vld [vmem:[%s14672_s4 + $0x6d8] sm:$0xf0] }
 0x2b5   :  { %5226 = vmatpush.bf16.msra.mxu3 %v7605_v43  ;;  %8673 = vmatmul.msk.bf16.vlgmr.msra.gmra.mxu0 %vm12629_vm12, %v12641_v20  ;;  %v8309_v43 = vor.u32 %v9577_v2, %v8306_v39  ;;  %v9465_v39 = vld [vmem:[%s14672_s4 + $0x20c] sm:$0xf] }
 0x2b6   :  { %5239 = vmatpush.bf16.msra.mxu1 %v7733_v47  ;;  %5206 = vmatpush.bf16.msrb.mxu0 %v8609_v23  ;;  %v8577_v47 = vor.u32 %v9647_v31, %v8576_v36  ;;  %v7893_v23 = vor.u32 %v9473_v14, %v7890_v1  ;;  %v8485_v1 = vor.u32 %v9621_v54, %v8482_v48 }
 0x2b7   :  { %5247 = vmatpush.bf16.msra.mxu2 %v7941_v35 }
 0x2b8   :  { %8688 = vmatmul.msk.bf16.vlgmr.msra.gmra.mxu3 %vm12588_vm8, %v12612_v45  ;;  %v7922_v45 = vld [vmem:[%s14672_s4 + $0x298] sm:$0xf0] }
 0x2b9   :  { %5271 = vmatpush.bf16.msrb.mxu3 %v8229_v50  ;;  %8691 = vmatmul.msk.bf16.vlgmr.msra.gmra.mxu1 %vm12600_vm10, %v12620_v15  ;;  %v8325_v15 = vor.u32 %v9581_v29, %v8322_v51  ;;  %v7925_v0 = vor.u32 %v9481_v12, %v7922_v45  ;;  %v9573_v50 = vld [vmem:[%s14672_s4 + $0x56c] sm:$0xf]  ;;  %v7874_v51 = vld [vmem:[%s14672_s4 + $0x238] sm:$0xf0] }
 0x2ba   :  { %5284 = vmatpush.bf16.msrb.mxu1 %v8357_v7  ;;  %5207 = vmatpush.bf16.msrb.mxu0 %v8593_v34  ;;  %v5033_v7 = vpop.f32.mrf.mxu1  ;;  %v8293_v49 = vor.u32 %v9573_v50, %v8290_v42  ;;  %v9469_v29 = vld [vmem:[%s14672_s4 + $0x22c] sm:$0xf]  ;;  %v8130_v12 = vld [vmem:[%s14672_s4 + $0x438] sm:$0xf0]  ;;  %v8528_v34 = vld [vmem:[%s14672_s4 + $0x748] sm:$0xf] }
 0x2bb   :  { %5248 = vmatpush.bf16.msra.mxu2 %v7925_v0  ;;  %v5020_v27 = vpop.f32.mrf.mxu3  ;;  %v9565_v45 = vld [vmem:[%s14672_s4 + $0x52c] sm:$0xf]  ;;  %v7877_v2 = vor.u32 %v9469_v29, %v7874_v51  ;;  %v7858_v0 = vld [vmem:[%s14672_s4 + $0x218] sm:$0xf0]  ;;  %v8512_v42 = vld [vmem:[%s14672_s4 + $0x728] sm:$0xf]  ;;  %v8469_v51 = vor.u32 %v9617_v21, %v8466_v46 }
 0x2bc   :  { %v5021_v17 = vadd.f32 %v5020_v27, %v3620_v11  ;;  %v8242_v50 = vld [vmem:[%s14672_s4 + $0x518] sm:$0xf0]  ;;  %v7861_v59 = vor.u32 %v9465_v39, %v7858_v0  ;;  %v9669_v29 = vld [vmem:[%s14674_s6 + $0x64] sm:$0xf0]  ;;  %v9601_v21 = vld [vmem:[%s14672_s4 + $0x64c] sm:$0xf] }
 0x2bd   :  { %5272 = vmatpush.bf16.msrb.mxu3 %v8213_v58  ;;  %v9569_v58 = vld [vmem:[%s14672_s4 + $0x54c] sm:$0xf]  ;;  %v8098_v27 = vld [vmem:[%s14672_s4 + $0x3f8] sm:$0xf0]  ;;  %v9665_v0 = vld [vmem:[%s14674_s6 + $0x44] sm:$0xf0] }
 0x2be   :  { %5285 = vmatpush.bf16.msrb.mxu1 %v8341_v19  ;;  %5208 = vmatpush.bf16.msrb.mxu0 %v8577_v47  ;;  %v9639_v19 = vld [vmem:[%s14672_s4 + $0x774] sm:$0xf0]  ;;  %v8277_v61 = vor.u32 %v9569_v58, %v8274_v24  ;;  %v13952_v36 = vadd.f32 %v5033_v7, %v5021_v17  ;;  %v9561_v47 = vld [vmem:[%s14672_s4 + $0x50c] sm:$0xf]  ;;  %v8780_v7 = vld [vmem:[%s14674_s6 + $0x70] sm:$0xf] }
 0x2bf   :  { %5249 = vmatpush.bf16.msra.mxu2 %v7909_v8  ;;  %v8545_v35 = vor.u32 %v9639_v19, %v8544_v30  ;;  %v9671_v8 = vld [vmem:[%s14674_s6 + $0x74] sm:$0xf0]  ;;  %v8496_v58 = vld [vmem:[%s14672_s4 + $0x708] sm:$0xf]  ;;  %v9525_v30 = vld [vmem:[%s14672_s4 + $0x3ec] sm:$0xf] }
 0x2c0   :  { %v9627_v24 = vld [vmem:[%s14672_s4 + $0x714] sm:$0xf0]  ;;  %v8781_v19 = vor.u32 %v9671_v8, %v8780_v7  ;;  %v8066_v39 = vld [vmem:[%s14672_s4 + $0x3b8] sm:$0xf0]  ;;  %v8748_v7 = vld [vmem:[%s14674_s6 + $0x30] sm:$0xf] }
 0x2c1   :  { %5273 = vmatpush.bf16.msrb.mxu3 %v8197_v55  ;;  %v9533_v55 = vld [vmem:[%s14672_s4 + $0x42c] sm:$0xf]  ;;  %v8497_v17 = vor.u32 %v9627_v24, %v8496_v58  ;;  %v9663_v8 = vld [vmem:[%s14674_s6 + $0x34] sm:$0xf0]  ;;  %v8402_v46 = vld [vmem:[%s14672_s4 + $0x658] sm:$0xf0] }
 0x2c2   :  { %5286 = vmatpush.bf16.msrb.mxu1 %v8325_v15  ;;  %5209 = vmatpush.bf16.msrb.mxu0 %v8561_v53  ;;  %v8258_v15 = vld [vmem:[%s14672_s4 + $0x538] sm:$0xf0]  ;;  %v5035_v37 = vpop.f32.mrf.mxu1  ;;  %v8133_v31 = vor.u32 %v9533_v55, %v8130_v12  ;;  %v8513_v53 = vor.u32 %v9631_v56, %v8512_v42  ;;  %v8101_v55 = vor.u32 %v9525_v30, %v8098_v27  ;;  %v9521_v12 = vld [vmem:[%s14672_s4 + $0x3cc] sm:$0xf] }
 0x2c3   :  { %5250 = vmatpush.bf16.msra.mxu2 %v7893_v23  ;;  %v8261_v32 = vor.u32 %v9565_v45, %v8258_v15  ;;  %v5022_v11 = vpop.f32.mrf.mxu3  ;;  %v9509_v30 = vld [vmem:[%s14672_s4 + $0x36c] sm:$0xf]  ;;  %v8034_v27 = vld [vmem:[%s14672_s4 + $0x378] sm:$0xf0] }
 0x2c5   :  { %5274 = vmatpush.bf16.msrb.mxu3 %v8181_v38  ;;  %v9529_v38 = vld [vmem:[%s14672_s4 + $0x40c] sm:$0xf] }
 0x2c6   :  { %5287 = vmatpush.bf16.msrb.mxu1 %v8309_v43  ;;  %5210 = vmatpush.bf16.msrb.mxu0 %v8545_v35  ;;  %v8529_v43 = vor.u32 %v9635_v4, %v8528_v34  ;;  %v8117_v14 = vor.u32 %v9529_v38, %v8114_v52  ;;  %v8450_v35 = vld [vmem:[%s14672_s4 + $0x6b8] sm:$0xf0]  ;;  %v8844_v52 = vld [vmem:[%s14674_s6 + $0xf0] sm:$0xf] }
 0x2c7   :  { %5251 = vmatpush.bf16.msra.mxu2 %v7877_v2  ;;  %v8082_v34 = vld [vmem:[%s14672_s4 + $0x3d8] sm:$0xf0]  ;;  %v9517_v2 = vld [vmem:[%s14672_s4 + $0x3ac] sm:$0xf] }
 0x2c8   :  { %v8085_v37 = vor.u32 %v9521_v12, %v8082_v34  ;;  %v8069_v48 = vor.u32 %v9517_v2, %v8066_v39  ;;  %v8386_v12 = vld [vmem:[%s14672_s4 + $0x638] sm:$0xf0]  ;;  %v9505_v34 = vld [vmem:[%s14672_s4 + $0x34c] sm:$0xf] }
 0x2c9   :  { %5275 = vmatpush.bf16.msrb.mxu3 %v8165_v9  ;;  %v13988_v9 = vmul.u32 512, %v12153_v40 }
 0x2ca   :  { %5288 = vmatpush.bf16.msrb.mxu1 %v8293_v49  ;;  %5211 = vmatpush.bf16.msrb.mxu0 %v8529_v43  ;;  %v8245_v49 = vor.u32 %v9561_v47, %v8242_v50  ;;  %v9605_v43 = vld [vmem:[%s14672_s4 + $0x66c] sm:$0xf]  ;;  %v8418_v47 = vld [vmem:[%s14672_s4 + $0x678] sm:$0xf0] }
 0x2cb   :  { %v5336_v23 = vadd.s32 %v13988_v9, %v12155_v41  ;;  %5252 = vmatpush.bf16.msra.mxu2 %v7861_v59  ;;  %v9513_v50 = vld [vmem:[%s14672_s4 + $0x38c] sm:$0xf]  ;;  %v8050_v59 = vld [vmem:[%s14672_s4 + $0x398] sm:$0xf0] }
 0x2cc   :  { %v8053_v24 = vor.u32 %v9513_v50, %v8050_v59  ;;  %v9657_v50 = vld [vmem:[%s14674_s6 + $0x4] sm:$0xf0] }
 0x2cd   :  { %5276 = vmatpush.bf16.msrb.mxu3 %v8149_v28  ;;  %v8772_v28 = vld [vmem:[%s14674_s6 + $0x60] sm:$0xf]  ;;  %v5340_v15 = vxor.u32 %v5336_v23, %v12202_v5 }
 0x2ce   :  { %5289 = vmatpush.bf16.msrb.mxu1 %v8277_v61  ;;  %5212 = vmatpush.bf16.msrb.mxu0 %v8513_v53  ;;  %v9613_v61 = vld [vmem:[%s14672_s4 + $0x6ac] sm:$0xf]  ;;  %v8773_v45 = vor.u32 %v9669_v29, %v8772_v28  ;;  %v8740_v28 = vld [vmem:[%s14674_s6 + $0x20] sm:$0xf]  ;;  %v9661_v29 = vld [vmem:[%s14674_s6 + $0x24] sm:$0xf0] }
 0x2cf   :  { %5297 = vmatpush.bf16.msrb.mxu2 %v8485_v1  ;;  %v8453_v4 = vor.u32 %v9613_v61, %v8450_v35  ;;  %v8836_v1 = vld [vmem:[%s14674_s6 + $0xe0] sm:$0xf]  ;;  %v9683_v61 = vld [vmem:[%s14674_s6 + $0xd4] sm:$0xf0] }
 0x2d0   :  { %8694 = vmatmul.msk.bf16.vlgmr.msra.gmra.mxu2 %vm12614_vm11, %v12624_v16  ;;  %v9667_v16 = vld [vmem:[%s14674_s6 + $0x54] sm:$0xf0]  ;;  %v14097_v53 = vpop.f32.mrf.mxu2 }
 0x2d1   :  { %5277 = vmatpush.bf16.msrb.mxu3 %v8133_v31  ;;  %v8765_v22 = vor.u32 %v9667_v16, %v8764_v10  ;;  %v8756_v31 = vld [vmem:[%s14674_s6 + $0x40] sm:$0xf]  ;;  %v8741_v10 = vor.u32 %v9661_v29, %v8740_v28  ;;  %v8774_v28 = vld [vmem:[%s14674_s6 + $0x68] sm:$0xf0] }
 0x2d2   :  { %5290 = vmatpush.bf16.msrb.mxu1 %v8261_v32  ;;  %5213 = vmatpush.bf16.msrb.mxu0 %v8497_v17  ;;  %v9687_v32 = vld [vmem:[%s14674_s6 + $0xf4] sm:$0xf0]  ;;  %v8757_v42 = vor.u32 %v9665_v0, %v8756_v31  ;;  %v8828_v17 = vld [vmem:[%s14674_s6 + $0xd0] sm:$0xf]  ;;  %v9593_v31 = vld [vmem:[%s14672_s4 + $0x60c] sm:$0xf] }
 0x2d3   :  { %5298 = vmatpush.bf16.msrb.mxu2 %v8469_v51  ;;  %v8845_v54 = vor.u32 %v9687_v32, %v8844_v52  ;;  %v8405_v51 = vor.u32 %v9601_v21, %v8402_v46  ;;  %v8370_v0 = vld [vmem:[%s14672_s4 + $0x618] sm:$0xf0]  ;;  %v9497_v21 = vld [vmem:[%s14672_s4 + $0x30c] sm:$0xf]  ;;  %v8804_v29 = vld [vmem:[%s14674_s6 + $0xa0] sm:$0xf] }
 0x2d4   :  { %v8373_v59 = vor.u32 %v9593_v31, %v8370_v0  ;;  %v7986_v46 = vld [vmem:[%s14672_s4 + $0x318] sm:$0xf0]  ;;  %v9664_v0 = vld [vmem:[%s14674_s6 + $0x44] sm:$0xf] }
 0x2d5   :  { %5278 = vmatpush.bf16.msrb.mxu3 %v8117_v14  ;;  %8685 = vmatmul.msk.bf16.vlgmr.msrb.gmra.mxu0 %vm13397_vm9, %v13407_v57  ;;  %v8421_v14 = vor.u32 %v9605_v43, %v8418_v47  ;;  %v8002_v43 = vld [vmem:[%s14672_s4 + $0x338] sm:$0xf0] }
 0x2d6   :  { %5291 = vmatpush.bf16.msrb.mxu1 %v8245_v49  ;;  %5258 = vmatpush.bf16.msra.mxu0 %v8101_v55  ;;  %v14089_v11 = vpop.f32.mrf.mxu1  ;;  %v9685_v49 = vld [vmem:[%s14674_s6 + $0xe4] sm:$0xf0]  ;;  %v9597_v55 = vld [vmem:[%s14672_s4 + $0x62c] sm:$0xf] }
 0x2d7   :  { %5299 = vmatpush.bf16.msrb.mxu2 %v8453_v4  ;;  %v8837_v58 = vor.u32 %v9685_v49, %v8836_v1  ;;  %v8018_v4 = vld [vmem:[%s14672_s4 + $0x358] sm:$0xf0]  ;;  %v8389_v2 = vor.u32 %v9597_v55, %v8386_v12  ;;  %v7989_v55 = vor.u32 %v9497_v21, %v7986_v46  ;;  %v4995_v21 = vadd.f32 %v14097_v53, %v13742_v25 }
 0x2d8   :  { %8700 = vmatmul.msk.bf16.vlgmr.msrb.gmra.mxu3 %vm12808_vm15, %v12818_v60  ;;  %v8434_v60 = vld [vmem:[%s14672_s4 + $0x698] sm:$0xf0]  ;;  %v4996_v39 = vpop.f32.mrf.mxu2  ;;  %v8021_v32 = vor.u32 %v9505_v34, %v8018_v4  ;;  %v9649_v34 = vld [vmem:[%s14672_s4 + $0x7cc] sm:$0xf]  ;;  %v9666_v4 = vld [vmem:[%s14674_s6 + $0x54] sm:$0xf] }
 0x2d9   :  { %5802 = vmatpush.bf16.msra.mxu3 %v8781_v19  ;;  %8703 = vmatmul.msk.bf16.vlgmr.msrb.gmra.mxu1 %vm12862_vm2, %v12872_v62  ;;  %v5344_v62 = vxor.u32 320440878, %v5340_v15  ;;  %v8437_v38 = vor.u32 %v9609_v26, %v8434_v60  ;;  %v8749_v19 = vor.u32 %v9663_v8, %v8748_v7  ;;  %v8037_v15 = vor.u32 %v9509_v30, %v8034_v27  ;;  %v8732_v26 = vld [vmem:[%s14674_s6 + $0x10] sm:$0xf]  ;;  %v9659_v60 = vld [vmem:[%s14674_s6 + $0x14] sm:$0xf0] }
 0x2da   :  { %5259 = vmatpush.bf16.msra.mxu0 %v8085_v37  ;;  %5815 = vmatpush.bf16.msra.mxu1 %v8845_v54  ;;  %v8733_v47 = vor.u32 %v9659_v60, %v8732_v26  ;;  %v8724_v54 = vld [vmem:[%s14674_s6] sm:$0xf]  ;;  %v9670_v7 = vld [vmem:[%s14674_s6 + $0x74] sm:$0xf]  ;;  %v8782_v8 = vld [vmem:[%s14674_s6 + $0x78] sm:$0xf0]  ;;  %v8769_v31 = vor.u32 %v9666_v4, %v8766_v63 }
 0x2db   :  { %v8710_v56 = vshrl.u32 %v5344_v62, 16  ;;  %5300 = vmatpush.bf16.msrb.mxu2 %v8437_v38  ;;  %v14123_v35 = vpop.f32.mrf.mxu3  ;;  %v9501_v38 = vld [vmem:[%s14672_s4 + $0x32c] sm:$0xf]  ;;  %v9668_v27 = vld [vmem:[%s14674_s6 + $0x64] sm:$0xf] }
 0x2dc   :  { %v8005_v49 = vor.u32 %v9501_v38, %v8002_v43  ;;  %v9653_v30 = vld [vmem:[%s14672_s4 + $0x7ec] sm:$0xf]  ;;  %v9675_v26 = vld [vmem:[%s14674_s6 + $0x94] sm:$0xf0]  ;;  %v8578_v39 = vld [vmem:[%s14672_s4 + $0x7b8] sm:$0xf0] }
 0x2dd   :  { %5803 = vmatpush.bf16.msra.mxu3 %v8773_v45  ;;  %v5356_v23 = vxor.u32 %v8710_v56, %v5344_v62  ;;  %v8829_v45 = vor.u32 %v9683_v61, %v8828_v17  ;;  %v9681_v62 = vld [vmem:[%s14674_s6 + $0xc4] sm:$0xf0]  ;;  %v9679_v56 = vld [vmem:[%s14674_s6 + $0xb4] sm:$0xf0]  ;;  %v8758_v38 = vld [vmem:[%s14674_s6 + $0x48] sm:$0xf0] }
 0x2de   :  { %5260 = vmatpush.bf16.msra.mxu0 %v8069_v48  ;;  %5816 = vmatpush.bf16.msra.mxu1 %v8837_v58  ;;  %v5087_v37 = vpop.f32.mrf.mxu1  ;;  %v8725_v58 = vor.u32 %v9657_v50, %v8724_v54  ;;  %v9686_v54 = vld [vmem:[%s14674_s6 + $0xf4] sm:$0xf]  ;;  %v8546_v53 = vld [vmem:[%s14672_s4 + $0x778] sm:$0xf0] }
 0x2df   :  { %5301 = vmatpush.bf16.msrb.mxu2 %v8421_v14  ;;  %v5360_v16 = vmul.u32 2246822507, %v5356_v23  ;;  %v8785_v23 = vor.u32 %v9670_v7, %v8782_v8  ;;  %v9641_v7 = vld [vmem:[%s14672_s4 + $0x78c] sm:$0xf]  ;;  %v8761_v8 = vor.u32 %v9664_v0, %v8758_v38  ;;  %v8830_v63 = vld [vmem:[%s14674_s6 + $0xd8] sm:$0xf0] }
 0x2e0   :  { %v14203_v17 = vpop.f32.mrf.mxu2 }
 0x2e1   :  { %5804 = vmatpush.bf16.msra.mxu3 %v8765_v22  ;;  %v8820_v22 = vld [vmem:[%s14674_s6 + $0xc0] sm:$0xf]  ;;  %v8714_v48 = vshrl.u32 %v5360_v16, 13 }
 0x2e2   :  { %5261 = vmatpush.bf16.msra.mxu0 %v8053_v24  ;;  %5817 = vmatpush.bf16.msra.mxu1 %v8829_v45  ;;  %v8821_v52 = vor.u32 %v9681_v62, %v8820_v22  ;;  %v5337_v45 = vadd.s32 %v13988_v9, %v12195_v3  ;;  %v9645_v62 = vld [vmem:[%s14672_s4 + $0x7ac] sm:$0xf] }
 0x2e3   :  { %5302 = vmatpush.bf16.msrb.mxu2 %v8405_v51  ;;  %v5074_v1 = vpop.f32.mrf.mxu3  ;;  %v5372_v24 = vxor.u32 %v8714_v48, %v5360_v16  ;;  %v9677_v51 = vld [vmem:[%s14674_s6 + $0xa4] sm:$0xf0]  ;;  %v8777_v16 = vor.u32 %v9668_v27, %v8774_v28  ;;  %v8846_v48 = vld [vmem:[%s14674_s6 + $0xf8] sm:$0xf0] }
 0x2e4   :  { %v8805_v61 = vor.u32 %v9677_v51, %v8804_v29  ;;  %v9662_v1 = vld [vmem:[%s14674_s6 + $0x34] sm:$0xf] }
 0x2e5   :  { %5805 = vmatpush.bf16.msra.mxu3 %v8757_v42  ;;  %v8812_v42 = vld [vmem:[%s14674_s6 + $0xb0] sm:$0xf]  ;;  %v5376_v12 = vmul.u32 3266489909, %v5372_v24 }
 0x2e6   :  { %5262 = vmatpush.bf16.msra.mxu0 %v8037_v15  ;;  %5818 = vmatpush.bf16.msra.mxu1 %v8821_v52  ;;  %v8813_v14 = vor.u32 %v9679_v56, %v8812_v42  ;;  %v8788_v52 = vld [vmem:[%s14674_s6 + $0x80] sm:$0xf]  ;;  %v8849_v42 = vor.u32 %v9686_v54, %v8846_v48  ;;  %v9684_v56 = vld [vmem:[%s14674_s6 + $0xe4] sm:$0xf] }
 0x2e7   :  { %5303 = vmatpush.bf16.msrb.mxu2 %v8389_v2  ;;  %v8718_v37 = vshrl.u32 %v5376_v12, 16  ;;  %v5341_v2 = vxor.u32 %v5337_v45, %v12202_v5 }
 0x2e8   :  { %v5048_v43 = vpop.f32.mrf.mxu2 }
 0x2e9   :  { %5806 = vmatpush.bf16.msra.mxu3 %v8749_v19  ;;  %v8610_v19 = vld [vmem:[%s14672_s4 + $0x7f8] sm:$0xf0]  ;;  %v5388_v50 = vxor.u32 %v8718_v37, %v5376_v12  ;;  %v9633_v37 = vld [vmem:[%s14672_s4 + $0x74c] sm:$0xf] }
 0x2ea   :  { %5263 = vmatpush.bf16.msra.mxu0 %v8021_v32  ;;  %5819 = vmatpush.bf16.msra.mxu1 %v8813_v14  ;;  %v8613_v15 = vor.u32 %v9653_v30, %v8610_v19  ;;  %v9673_v32 = vld [vmem:[%s14674_s6 + $0x84] sm:$0xf0]  ;;  %v8562_v14 = vld [vmem:[%s14672_s4 + $0x798] sm:$0xf0]  ;;  %v14279_v30 = vld [vmem:[%s14673_s5] sm:$0xf] }
 0x2eb   :  { %5304 = vmatpush.bf16.msrb.mxu2 %v8373_v59  ;;  %v8581_v59 = vor.u32 %v9645_v62, %v8578_v39  ;;  %v3621_v19 = vperm.slane %v14279_v30, 2  ;;  %v5392_v27 = vand.u32 2147483647, %v5388_v50  ;;  %v8565_v25 = vor.u32 %v9641_v7, %v8562_v14  ;;  %v9658_v39 = vld [vmem:[%s14674_s6 + $0x14] sm:$0xf] }
 0x2ec   :  { %v9678_v7 = vld [vmem:[%s14674_s6 + $0xb4] sm:$0xf] }
 0x2ed   :  { %5807 = vmatpush.bf16.msra.mxu3 %v8741_v10  ;;  %v8594_v10 = vld [vmem:[%s14672_s4 + $0x7d8] sm:$0xf0]  ;;  %vm14299_vm10 = vcmp.ge.s32.totalorder %v5392_v27, 644245094 }
 0x2ee   :  { %5264 = vmatpush.bf16.msra.mxu0 %v8005_v49  ;;  %8706 = vmatmul.msk.bf16.vlgmr.msrb.gmra.mxu2 %vm13177_vm5, %v13184_v13  ;;  %v8796_v13 = vld [vmem:[%s14674_s6 + $0x90] sm:$0xf]  ;;  %v8597_v22 = vor.u32 %v9649_v34, %v8594_v10  ;;  %v8750_v49 = vld [vmem:[%s14674_s6 + $0x38] sm:$0xf0]  ;;  %vm8978_vm11 = vmpackc.low %vm14299_vm10, %vm14299_vm10 }
 0x2ef   :  { %5820 = vmatpush.bf16.msra.mxu1 %v8805_v61  ;;  %v8797_v60 = vor.u32 %v9675_v26, %v8796_v13  ;;  %v8753_v51 = vor.u32 %v9662_v1, %v8750_v49  ;;  %v9660_v61 = vld [vmem:[%s14674_s6 + $0x24] sm:$0xf]  ;;  %v8498_v27 = vld [vmem:[%s14672_s4 + $0x718] sm:$0xf0] }
 0x2f0   :  { %v14294_v45 = vpop.f32.mrf.mxu2 }
 0x2f1   :  { %5808 = vmatpush.bf16.msra.mxu3 %v8733_v47  ;;  %v8789_v47 = vor.u32 %v9673_v32, %v8788_v52  ;;  %v5007_v24 = vpop.f32.mrf.mxu0  ;;  %v9680_v52 = vld [vmem:[%s14674_s6 + $0xc4] sm:$0xf]  ;;  %v8822_v32 = vld [vmem:[%s14674_s6 + $0xc8] sm:$0xf0] }
 0x2f2   :  { %5265 = vmatpush.bf16.msra.mxu0 %v7989_v55  ;;  %v5008_v29 = vadd.f32 %v5007_v24, %v4995_v21  ;;  %v8742_v55 = vld [vmem:[%s14674_s6 + $0x28] sm:$0xf0]  ;;  %v8825_v54 = vor.u32 %v9680_v52, %v8822_v32 }
 0x2f3   :  { %5821 = vmatpush.bf16.msra.mxu1 %v8797_v60  ;;  %v8745_v4 = vor.u32 %v9660_v61, %v8742_v55  ;;  %v5047_v61 = vadd.f32 %v14203_v17, %v13952_v36  ;;  %v9672_v36 = vld [vmem:[%s14674_s6 + $0x84] sm:$0xf] }
 0x2f4   :  { %vm5323_vm8 = vcmp.ge.f32.partialorder %v5008_v29, 0.0  ;;  %v5327_v12 = vmul.f32 0.2, %v5008_v29 }
 0x2f5   :  { %5809 = vmatpush.bf16.msra.mxu3 %v8725_v58  ;;  %8697 = vmatmul.msk.bf16.vlgmr.msra.gmra.mxu0 %vm12629_vm12, %v12641_v20  ;;  %v5345_v20 = vxor.u32 320440878, %v5341_v2  ;;  %v8841_v58 = vor.u32 %v9684_v56, %v8838_v44  ;;  %v8530_v2 = vld [vmem:[%s14672_s4 + $0x758] sm:$0xf0] }
 0x2f6   :  { %5310 = vmatpush.bf16.msrb.mxu0 %v8613_v15  ;;  %v5137_v46 = vpop.f32.mrf.mxu1  ;;  %v9682_v15 = vld [vmem:[%s14674_s6 + $0xd4] sm:$0xf]  ;;  %v5331_v26 = vsel %vm5323_vm8, %v5008_v29, %v5327_v12  ;;  %v8533_v50 = vor.u32 %v9633_v37, %v8530_v2  ;;  %v8514_v56 = vld [vmem:[%s14672_s4 + $0x738] sm:$0xf0] }
 0x2f7   :  { %5822 = vmatpush.bf16.msra.mxu1 %v8789_v47  ;;  %v8711_v28 = vshrl.u32 %v5345_v20, 16  ;;  %v5400_v62 = vmul.f32 1.4285715, %v5331_v26  ;;  %v8790_v26 = vld [vmem:[%s14674_s6 + $0x88] sm:$0xf0] }
 0x2f8   :  { %v5100_v14 = vpop.f32.mrf.mxu2 }
 0x2f9   :  { %5854 = vmatpush.bf16.msrb.mxu3 %v8785_v23  ;;  %v9637_v23 = vld [vmem:[%s14672_s4 + $0x76c] sm:$0xf]  ;;  %v5357_v13 = vxor.u32 %v8711_v28, %v5345_v20  ;;  %v8979_v43 = vpack.c.bf16 %v5400_v62, %v5400_v62  ;;  %v5009_v47 = vpop.f32.mrf.mxu0  ;;  %v9656_v20 = vld [vmem:[%s14674_s6 + $0x4] sm:$0xf] }
 0x2fa   :  { %5311 = vmatpush.bf16.msrb.mxu0 %v8597_v22  ;;  %v8549_v10 = vor.u32 %v9637_v23, %v8546_v53  ;;  %v8833_v22 = vor.u32 %v9682_v15, %v8830_v63  ;;  %v9625_v23 = vld [vmem:[%s14672_s4 + $0x70c] sm:$0xf]  ;;  %v9674_v53 = vld [vmem:[%s14674_s6 + $0x94] sm:$0xf]  ;;  %v9703_v63 = vld [vmem:[%s14674_s6 + $0x174] sm:$0xf0] }
 0x2fb   :  { %5867 = vmatpush.bf16.msrb.mxu1 %v8849_v42  ;;  %v5124_v34 = vpop.f32.mrf.mxu3  ;;  %v5361_v48 = vmul.u32 2246822507, %v5357_v13  ;;  %v9629_v42 = vld [vmem:[%s14672_s4 + $0x72c] sm:$0xf]  ;;  %8980 = vmatmul.msk.bf16.vlgmr.msra.gmra.mxu3 %vm8978_vm11, %v8979_v43  ;;  %v8501_v55 = vor.u32 %v9625_v23, %v8498_v27  ;;  %v9691_v23 = vld [vmem:[%s14674_s6 + $0x114] sm:$0xf0] }
 0x2fc   :  { %v5125_v60 = vadd.f32 %v5124_v34, %v3621_v19  ;;  %v8517_v24 = vor.u32 %v9629_v42, %v8514_v56  ;;  %v9697_v42 = vld [vmem:[%s14674_s6 + $0x144] sm:$0xf0] }
 0x2fd   :  { %5855 = vmatpush.bf16.msrb.mxu3 %v8777_v16  ;;  %v8715_v21 = vshrl.u32 %v5361_v48, 13 }
 0x2fe   :  { %5312 = vmatpush.bf16.msrb.mxu0 %v8581_v59  ;;  %v5139_v0 = vpop.f32.mrf.mxu1  ;;  %v14321_v38 = vadd.f32 %v5137_v46, %v5125_v60  ;;  %v8726_v59 = vld [vmem:[%s14674_s6 + $0x8] sm:$0xf0]  ;;  %v9676_v46 = vld [vmem:[%s14674_s6 + $0xa4] sm:$0xf]  ;;  %v8793_v60 = vor.u32 %v9672_v36, %v8790_v26  ;;  %v3622_v36 = vperm.slane %v14279_v30, 3 }
 0x2ff   :  { %5868 = vmatpush.bf16.msrb.mxu1 %v8841_v58  ;;  %v8806_v58 = vld [vmem:[%s14674_s6 + $0xa8] sm:$0xf0]  ;;  %v8729_v19 = vor.u32 %v9656_v20, %v8726_v59  ;;  %v8876_v59 = vld [vmem:[%s14674_s6 + $0x130] sm:$0xf]  ;;  %v9696_v30 = vld [vmem:[%s14674_s6 + $0x144] sm:$0xf] }
 0x300   :  { %v8809_v28 = vor.u32 %v9676_v46, %v8806_v58 }
 0x301   :  { %5856 = vmatpush.bf16.msrb.mxu3 %v8769_v31  ;;  %v8734_v31 = vld [vmem:[%s14674_s6 + $0x18] sm:$0xf0]  ;;  %v5059_v29 = vpop.f32.mrf.mxu0 }
 0x302   :  { %5313 = vmatpush.bf16.msrb.mxu0 %v8565_v25  ;;  %v8737_v44 = vor.u32 %v9658_v39, %v8734_v31  ;;  %v5373_v25 = vxor.u32 %v8715_v21, %v5361_v48  ;;  %v5060_v12 = vadd.f32 %v5059_v29, %v5047_v61  ;;  %v8892_v39 = vld [vmem:[%s14674_s6 + $0x150] sm:$0xf]  ;;  %v9699_v31 = vld [vmem:[%s14674_s6 + $0x154] sm:$0xf0]  ;;  %v9693_v21 = vld [vmem:[%s14674_s6 + $0x124] sm:$0xf0] }
 0x303   :  { %5869 = vmatpush.bf16.msrb.mxu1 %v8833_v22  ;;  %v5126_v49 = vpop.f32.mrf.mxu3  ;;  %v8893_v32 = vor.u32 %v9699_v31, %v8892_v39  ;;  %v8852_v29 = vld [vmem:[%s14674_s6 + $0x100] sm:$0xf]  ;;  %v9702_v61 = vld [vmem:[%s14674_s6 + $0x174] sm:$0xf] }
 0x304   :  { %v5377_v34 = vmul.u32 3266489909, %v5373_v25  ;;  %v8868_v49 = vld [vmem:[%s14674_s6 + $0x120] sm:$0xf]  ;;  %v9689_v25 = vld [vmem:[%s14674_s6 + $0x104] sm:$0xf0] }
 0x305   :  { %5857 = vmatpush.bf16.msrb.mxu3 %v8761_v8  ;;  %v8814_v8 = vld [vmem:[%s14674_s6 + $0xb8] sm:$0xf0] }
 0x306   :  { %5314 = vmatpush.bf16.msrb.mxu0 %v8549_v10  ;;  %v8817_v1 = vor.u32 %v9678_v7, %v8814_v8  ;;  %v5073_v10 = vadd.f32 %v14123_v35, %v5060_v12  ;;  %v8719_v13 = vshrl.u32 %v5377_v34, 16  ;;  %v9695_v7 = vld [vmem:[%s14674_s6 + $0x134] sm:$0xf0]  ;;  %v9700_v12 = vld [vmem:[%s14674_s6 + $0x164] sm:$0xf] }
 0x307   :  { %5870 = vmatpush.bf16.msrb.mxu1 %v8825_v54 }
 0x308   :  { %v5086_v37 = vadd.f32 %v14089_v11, %v5073_v10  ;;  %v5389_v62 = vxor.u32 %v8719_v13, %v5377_v34  ;;  %v8894_v13 = vld [vmem:[%s14674_s6 + $0x158] sm:$0xf0] }
 0x309   :  { %5858 = vmatpush.bf16.msrb.mxu3 %v8753_v51  ;;  %v8798_v51 = vld [vmem:[%s14674_s6 + $0x98] sm:$0xf0]  ;;  %v5061_v17 = vpop.f32.mrf.mxu0 }
 0x30a   :  { %5315 = vmatpush.bf16.msrb.mxu0 %v8533_v50  ;;  %v8801_v15 = vor.u32 %v9674_v53, %v8798_v51  ;;  %v5099_v16 = vadd.f32 %v14294_v45, %v5086_v37  ;;  %v5393_v52 = vand.u32 2147483647, %v5389_v62  ;;  %v8884_v45 = vld [vmem:[%s14674_s6 + $0x140] sm:$0xf]  ;;  %v8853_v53 = vor.u32 %v9689_v25, %v8852_v29  ;;  %v9698_v17 = vld [vmem:[%s14674_s6 + $0x154] sm:$0xf] }
 0x30b   :  { %5871 = vmatpush.bf16.msrb.mxu1 %v8817_v1  ;;  %v8877_v1 = vor.u32 %v9695_v7, %v8876_v59  ;;  %v9690_v7 = vld [vmem:[%s14674_s6 + $0x114] sm:$0xf] }
 0x30c   :  { %vm14416_vm13 = vcmp.ge.s32.totalorder %v5393_v52, 644245094  ;;  %v8878_v52 = vld [vmem:[%s14674_s6 + $0x138] sm:$0xf0] }
 0x30d   :  { %5859 = vmatpush.bf16.msrb.mxu3 %v8745_v4  ;;  %v8908_v4 = vld [vmem:[%s14674_s6 + $0x170] sm:$0xf]  ;;  %vm8981_vm14 = vmpackc.low %vm14416_vm13, %vm14416_vm13 }
 0x30e   :  { %5316 = vmatpush.bf16.msrb.mxu0 %v8517_v24  ;;  %v8909_v35 = vor.u32 %v9703_v63, %v8908_v4  ;;  %v8869_v24 = vor.u32 %v9693_v21, %v8868_v49  ;;  %v9688_v21 = vld [vmem:[%s14674_s6 + $0x104] sm:$0xf] }
 0x30f   :  { %5872 = vmatpush.bf16.msrb.mxu1 %v8809_v28  ;;  %v5338_v28 = vadd.s32 %v13988_v9, %v12205_v6  ;;  %v8910_v6 = vld [vmem:[%s14674_s6 + $0x178] sm:$0xf0] }
 0x310   :  { %5828 = vmatpush.bf16.msra.mxu2 %v8909_v35  ;;  %v8897_v35 = vor.u32 %v9698_v17, %v8894_v13 }
 0x311   :  { %5860 = vmatpush.bf16.msrb.mxu3 %v8737_v44  ;;  %v8885_v44 = vor.u32 %v9697_v42, %v8884_v45  ;;  %v5342_v51 = vxor.u32 %v5338_v28, %v12202_v5 }
 0x312   :  { %5317 = vmatpush.bf16.msrb.mxu0 %v8501_v55  ;;  %v5111_v0 = vpop.f32.mrf.mxu0  ;;  %v8913_v55 = vor.u32 %v9702_v61, %v8910_v6 }
 0x313   :  { %5873 = vmatpush.bf16.msrb.mxu1 %v8801_v15  ;;  %v5112_v11 = vadd.f32 %v5111_v0, %v5099_v16  ;;  %v8902_v15 = vld [vmem:[%s14674_s6 + $0x168] sm:$0xf0]  ;;  %v5346_v34 = vxor.u32 320440878, %v5342_v51  ;;  %v9694_v0 = vld [vmem:[%s14674_s6 + $0x134] sm:$0xf] }
 0x314   :  { %v8905_v10 = vor.u32 %v9700_v12, %v8902_v15  ;;  %v9715_v51 = vld [vmem:[%s14674_s6 + $0x1d4] sm:$0xf0] }
 0x315   :  { %5861 = vmatpush.bf16.msrb.mxu3 %v8729_v19  ;;  %8709 = vmatmul.msk.bf16.vlgmr.msrb.gmra.mxu0 %vm13397_vm9, %v13407_v57  ;;  %v9701_v57 = vld [vmem:[%s14674_s6 + $0x164] sm:$0xf0]  ;;  %vm5324_vm12 = vcmp.ge.f32.partialorder %v5112_v11, 0.0  ;;  %v5328_v54 = vmul.f32 0.2, %v5112_v11  ;;  %v8712_v63 = vshrl.u32 %v5346_v34, 16 }
 0x316   :  { %v8901_v2 = vor.u32 %v9701_v57, %v8900_v18  ;;  %v14400_v22 = vpop.f32.mrf.mxu1  ;;  %v8860_v19 = vld [vmem:[%s14674_s6 + $0x110] sm:$0xf] }
 0x317   :  { %5874 = vmatpush.bf16.msrb.mxu1 %v8793_v60  ;;  %v5332_v56 = vsel %vm5324_vm12, %v5112_v11, %v5328_v54  ;;  %v8861_v27 = vor.u32 %v9691_v23, %v8860_v19  ;;  %v5358_v57 = vxor.u32 %v8712_v63, %v5346_v34  ;;  %v9692_v11 = vld [vmem:[%s14674_s6 + $0x124] sm:$0xf]  ;;  %v8870_v54 = vld [vmem:[%s14674_s6 + $0x128] sm:$0xf0]  ;;  %vm5984_vm12 = vcmask 7168  }
 0x318   :  { %8992 = vmatmul.msk.bf16.vlgmr.msrb.gmra.mxu3 %vm8978_vm11, %v8979_v43  ;;  %5829 = vmatpush.bf16.msra.mxu2 %v8901_v2  ;;  %v14409_v43 = vpop.f32.mrf.mxu2  ;;  %v5401_v20 = vmul.f32 1.4285715, %v5332_v56  ;;  %v8886_v2 = vld [vmem:[%s14674_s6 + $0x148] sm:$0xf0]  ;;  %v8972_v56 = vld [vmem:[%s14674_s6 + $0x1f0] sm:$0xf] }
 0x319   :  { %v8889_v16 = vor.u32 %v9696_v30, %v8886_v2  ;;  %v5362_v31 = vmul.u32 2246822507, %v5358_v57  ;;  %v9709_v30 = vld [vmem:[%s14674_s6 + $0x1a4] sm:$0xf0] }
 0x31a   :  { %v8982_v8 = vpack.c.bf16 %v5401_v20, %v5401_v20  ;;  %v5113_v14 = vpop.f32.mrf.mxu0  ;;  %v8873_v20 = vor.u32 %v9692_v11, %v8870_v54  ;;  %v5339_v54 = vadd.s32 %v13988_v9, %v12252_v33  ;;  %v8974_v33 = vld [vmem:[%s14674_s6 + $0x1f8] sm:$0xf0]  ;;  %v9716_v9 = vld [vmem:[%s14674_s6 + $0x1e4] sm:$0xf] }
 0x31b   :  { %v14411_v47 = vpop.f32.mrf.mxu3  ;;  %v8716_v42 = vshrl.u32 %v5362_v31, 13 }
 0x31c   :  { %5830 = vmatpush.bf16.msra.mxu2 %v8893_v32  ;;  %8983 = vmatmul.msk.bf16.vlgmr.msra.gmra.mxu1 %vm8981_vm14, %v8982_v8  ;;  %v8881_v32 = vor.u32 %v9694_v0, %v8878_v52  ;;  %v8924_v52 = vld [vmem:[%s14674_s6 + $0x190] sm:$0xf] }
 0x31d   :  { %v5374_v14 = vxor.u32 %v8716_v42, %v5362_v31 }
 0x31e   :  { %v5191_v48 = vpop.f32.mrf.mxu1 }
 0x320   :  { %5831 = vmatpush.bf16.msra.mxu2 %v8885_v44  ;;  %v5152_v46 = vpop.f32.mrf.mxu2  ;;  %v9719_v44 = vld [vmem:[%s14674_s6 + $0x1f4] sm:$0xf0] }
 0x321   :  { %v8973_v59 = vor.u32 %v9719_v44, %v8972_v56  ;;  %v8854_v46 = vld [vmem:[%s14674_s6 + $0x108] sm:$0xf0]  ;;  %v9718_v56 = vld [vmem:[%s14674_s6 + $0x1f4] sm:$0xf] }
 0x322   :  { %v8857_v19 = vor.u32 %v9688_v21, %v8854_v46  ;;  %v8977_v44 = vor.u32 %v9718_v56, %v8974_v33 }
 0x323   :  { %v5178_v58 = vpop.f32.mrf.mxu3  ;;  %5841 = vmatpush.bf16.msra.mxu0 %v8973_v59 }
 0x324   :  { %5832 = vmatpush.bf16.msra.mxu2 %v8877_v1  ;;  %v5151_v1 = vadd.f32 %v14409_v43, %v14321_v38  ;;  %v8964_v38 = vld [vmem:[%s14674_s6 + $0x1e0] sm:$0xf]  ;;  %v9717_v43 = vld [vmem:[%s14674_s6 + $0x1e4] sm:$0xf0] }
 0x325   :  { %v8965_v29 = vor.u32 %v9717_v43, %v8964_v38  ;;  %v9710_v38 = vld [vmem:[%s14674_s6 + $0x1b4] sm:$0xf]  ;;  %v8942_v43 = vld [vmem:[%s14674_s6 + $0x1b8] sm:$0xf0] }
 0x327   :  { %5842 = vmatpush.bf16.msra.mxu0 %v8965_v29  ;;  %v9708_v29 = vld [vmem:[%s14674_s6 + $0x1a4] sm:$0xf] }
 0x328   :  { %5833 = vmatpush.bf16.msra.mxu2 %v8869_v24  ;;  %v5378_v24 = vmul.u32 3266489909, %v5374_v14  ;;  %v9714_v14 = vld [vmem:[%s14674_s6 + $0x1d4] sm:$0xf] }
 0x32c   :  { %5834 = vmatpush.bf16.msra.mxu2 %v8861_v27  ;;  %8995 = vmatmul.msk.bf16.vlgmr.msrb.gmra.mxu1 %vm8981_vm14, %v8982_v8  ;;  %v8862_v8 = vld [vmem:[%s14674_s6 + $0x118] sm:$0xf0]  ;;  %v8720_v27 = vshrl.u32 %v5378_v24, 16 }
 0x32d   :  { %v8865_v49 = vor.u32 %v9690_v7, %v8862_v8 }
 0x330   :  { %5835 = vmatpush.bf16.msra.mxu2 %v8853_v53  ;;  %v5390_v53 = vxor.u32 %v8720_v27, %v5378_v24  ;;  %v9712_v24 = vld [vmem:[%s14674_s6 + $0x1c4] sm:$0xf] }
 0x332   :  { %v5163_v26 = vpop.f32.mrf.mxu0  ;;  %v5394_v15 = vand.u32 2147483647, %v5390_v53  ;;  %v8934_v53 = vld [vmem:[%s14674_s6 + $0x1a8] sm:$0xf0] }
 0x333   :  { %v5202_v60 = vpop.f32.mrf.mxu2  ;;  %v5164_v58 = vadd.f32 %v5163_v26, %v5151_v1  ;;  %v8940_v26 = vld [vmem:[%s14674_s6 + $0x1b0] sm:$0xf]  ;;  %v8958_v1 = vld [vmem:[%s14674_s6 + $0x1d8] sm:$0xf0] }
 0x334   :  { %5880 = vmatpush.bf16.msrb.mxu2 %v8913_v55  ;;  %vm14548_vm0 = vcmp.ge.s32.totalorder %v5394_v15, 644245094  ;;  %v9706_v15 = vld [vmem:[%s14674_s6 + $0x194] sm:$0xf] }
 0x335   :  { %v5177_v23 = vadd.f32 %v14411_v47, %v5164_v58  ;;  %v8956_v47 = vld [vmem:[%s14674_s6 + $0x1d0] sm:$0xf]  ;;  %vm8984_vm1 = vmpackc.low %vm14548_vm0, %vm14548_vm0 }
 0x336   :  { %v5241_v4 = vpop.f32.mrf.mxu1  ;;  %v8957_v6 = vor.u32 %v9715_v51, %v8956_v47 }
 0x337   :  { %v5190_v28 = vadd.f32 %v14400_v22, %v5177_v23 }
 0x338   :  { %5881 = vmatpush.bf16.msrb.mxu2 %v8905_v10  ;;  %5843 = vmatpush.bf16.msra.mxu0 %v8957_v6  ;;  %v8948_v10 = vld [vmem:[%s14674_s6 + $0x1c0] sm:$0xf]  ;;  %v8937_v6 = vor.u32 %v9708_v29, %v8934_v53 }
 0x339   :  { %v5203_v61 = vadd.f32 %v5202_v60, %v5190_v28  ;;  %v9711_v60 = vld [vmem:[%s14674_s6 + $0x1b4] sm:$0xf0]  ;;  %v8945_v28 = vor.u32 %v9710_v38, %v8942_v43 }
 0x33a   :  { %v5165_v45 = vpop.f32.mrf.mxu0  ;;  %v8941_v57 = vor.u32 %v9711_v60, %v8940_v26 }
 0x33b   :  { %v5228_v18 = vpop.f32.mrf.mxu3  ;;  %v5204_v48 = vpop.f32.mrf.mxu2  ;;  %v8916_v45 = vld [vmem:[%s14674_s6 + $0x180] sm:$0xf] }
 0x33c   :  { %v5229_v37 = vadd.f32 %v5228_v18, %v3622_v36  ;;  %5882 = vmatpush.bf16.msrb.mxu2 %v8897_v35  ;;  %v9705_v48 = vld [vmem:[%s14674_s6 + $0x184] sm:$0xf0] }
 0x33d   :  { %v8917_v42 = vor.u32 %v9705_v48, %v8916_v45 }
 0x33e   :  { %v5243_v62 = vpop.f32.mrf.mxu1  ;;  %v14488_v39 = vadd.f32 %v5241_v4, %v5229_v37  ;;  %v9713_v4 = vld [vmem:[%s14674_s6 + $0x1c4] sm:$0xf0]  ;;  %v8932_v37 = vld [vmem:[%s14674_s6 + $0x1a0] sm:$0xf] }
 0x33f   :  { %v8949_v36 = vor.u32 %v9713_v4, %v8948_v10  ;;  %v8933_v0 = vor.u32 %v9709_v30, %v8932_v37 }
 0x340   :  { %5883 = vmatpush.bf16.msrb.mxu2 %v8889_v16 }
 0x341   :  { %5844 = vmatpush.bf16.msra.mxu0 %v8949_v36  ;;  %v9704_v36 = vld [vmem:[%s14674_s6 + $0x184] sm:$0xf] }
 0x343   :  { %v5230_v50 = vpop.f32.mrf.mxu3 }
 0x344   :  { %5884 = vmatpush.bf16.msrb.mxu2 %v8881_v32  ;;  %v9707_v32 = vld [vmem:[%s14674_s6 + $0x194] sm:$0xf0]  ;;  %v5343_v50 = vxor.u32 %v5339_v54, %v12202_v5 }
 0x345   :  { %5845 = vmatpush.bf16.msra.mxu0 %v8941_v57  ;;  %v8925_v11 = vor.u32 %v9707_v32, %v8924_v52 }
 0x346   :  { %v5347_v7 = vxor.u32 320440878, %v5343_v50 }
 0x348   :  { %5885 = vmatpush.bf16.msrb.mxu2 %v8873_v20  ;;  %v8966_v20 = vld [vmem:[%s14674_s6 + $0x1e8] sm:$0xf0]  ;;  %v8713_v8 = vshrl.u32 %v5347_v7, 16 }
 0x349   :  { %5846 = vmatpush.bf16.msra.mxu0 %v8933_v0  ;;  %v8969_v59 = vor.u32 %v9716_v9, %v8966_v20 }
 0x34a   :  { %v5359_v58 = vxor.u32 %v8713_v8, %v5347_v7 }
 0x34c   :  { %5886 = vmatpush.bf16.msrb.mxu2 %v8865_v49  ;;  %v8961_v49 = vor.u32 %v9714_v14, %v8958_v1  ;;  %v5363_v27 = vmul.u32 2246822507, %v5359_v58 }
 0x34d   :  { %5847 = vmatpush.bf16.msra.mxu0 %v8925_v11  ;;  %v5476_v11 = vld [vmem:[%s14675_s7] sm:$0x3] }
 0x34e   :  { %v5478_v54 = vperm.slane %v5476_v11, 0  ;;  %v5479_v33 = vperm.slane %v5476_v11, 1 }
 0x350   :  { %5887 = vmatpush.bf16.msrb.mxu2 %v8857_v19  ;;  %v8950_v19 = vld [vmem:[%s14674_s6 + $0x1c8] sm:$0xf0] }
 0x351   :  { %5848 = vmatpush.bf16.msra.mxu0 %v8917_v42  ;;  %v8953_v23 = vor.u32 %v9712_v24, %v8950_v19 }
 0x352   :  { %v5215_v55 = vpop.f32.mrf.mxu0 }
 0x353   :  { %v14538_v12 = vpop.f32.mrf.mxu2  ;;  %v5216_v22 = vadd.f32 %v5215_v55, %v5203_v61  ;;  %v8717_v61 = vshrl.u32 %v5363_v27, 13 }
 0x354   :  { %v5255_v10 = vadd.f32 %v14538_v12, %v14488_v39 }
 0x355   :  { %vm5325_vm15 = vcmp.ge.f32.partialorder %v5216_v22, 0.0  ;;  %v5329_v63 = vmul.f32 0.2, %v5216_v22  ;;  %5893 = vmatpush.bf16.msrb.mxu0 %v8977_v44  ;;  %v5375_v55 = vxor.u32 %v8717_v61, %v5363_v27 }
 0x356   :  { %v14530_v25 = vpop.f32.mrf.mxu1 }
 0x357   :  { %v5333_v35 = vsel %vm5325_vm15, %v5216_v22, %v5329_v63  ;;  %v8926_v22 = vld [vmem:[%s14674_s6 + $0x198] sm:$0xf0]  ;;  %v5379_v13 = vmul.u32 3266489909, %v5375_v55 }
 0x358   :  { %v5402_v18 = vmul.f32 1.4285715, %v5333_v35  ;;  %v8929_v4 = vor.u32 %v9706_v15, %v8926_v22 }
 0x359   :  { %5894 = vmatpush.bf16.msrb.mxu0 %v8969_v59 }
 0x35a   :  { %v8985_v2 = vpack.c.bf16 %v5402_v18, %v5402_v18  ;;  %v5217_v62 = vpop.f32.mrf.mxu0  ;;  %v8721_v18 = vshrl.u32 %v5379_v13, 16 }
 0x35b   :  { %v14540_v34 = vpop.f32.mrf.mxu3  ;;  %v5256_v16 = vpop.f32.mrf.mxu2 }
 0x35c   :  { %8986 = vmatmul.msk.bf16.vlgmr.msra.gmra.mxu2 %vm8984_vm1, %v8985_v2  ;;  %v5391_v12 = vxor.u32 %v8721_v18, %v5379_v13 }
 0x35d   :  { %5895 = vmatpush.bf16.msrb.mxu0 %v8961_v49  ;;  %v5912_v49 = vmul.u32 256, %v12153_v40  ;;  %v16_v40 = vstv %s14676_s9 }
 0x35e   :  { %v5295_v17 = vpop.f32.mrf.mxu1  ;;  %17 = vst [vmem:[#allocation4] sm:$0x1] %v16_v40 }
 0x35f   :  { %v8918_v17 = vld [vmem:[%s14674_s6 + $0x188] sm:$0xf0]  ;;  %v5914_v58 = vadd.s32 %v5912_v49, %v12195_v3 }
 0x360   :  { %v8921_v35 = vor.u32 %v9704_v36, %v8918_v17 }
 0x361   :  { %5896 = vmatpush.bf16.msrb.mxu0 %v8953_v23  ;;  %v5916_v19 = vxor.u32 %v5914_v58, %v12202_v5 }
 0x363   :  { %v5282_v31 = vpop.f32.mrf.mxu3  ;;  %v5918_v27 = vxor.u32 57701188, %v5916_v19 }
 0x365   :  { %5897 = vmatpush.bf16.msrb.mxu0 %v8945_v28  ;;  %v9003_v43 = vshrl.u32 %v5918_v27, 16  ;;  %v9720_v11 = vld [vmem:[#allocation4] ss:$0 sm:$0xff] }
 0x367   :  { %v5924_v29 = vxor.u32 %v9003_v43, %v5918_v27 }
 0x369   :  { %5898 = vmatpush.bf16.msrb.mxu0 %v8937_v6 }
 0x36c   :  { %8998 = vmatmul.msk.bf16.vlgmr.msrb.gmra.mxu2 %vm8984_vm1, %v8985_v2  ;;  %v5395_v2 = vand.u32 2147483647, %v5391_v12 }
 0x36d   :  { %5899 = vmatpush.bf16.msrb.mxu0 %v8929_v4 }
 0x36e   :  { %vm14644_vm3 = vcmp.ge.s32.totalorder %v5395_v2, 644245094 }
 0x36f   :  { %vm8987_vm4 = vmpackc.low %vm14644_vm3, %vm14644_vm3 }
 0x371   :  { %v5306_v46 = vpop.f32.mrf.mxu2  ;;  %5900 = vmatpush.bf16.msrb.mxu0 %v8921_v35 }
 0x372   :  { %v5267_v21 = vpop.f32.mrf.mxu0 }
 0x373   :  { %v5268_v63 = vadd.f32 %v5267_v21, %v5255_v10  ;;  %v5913_v21 = vadd.s32 %v5912_v49, %v12155_v41 }
 0x375   :  { %v5281_v26 = vadd.f32 %v14540_v34, %v5268_v63  ;;  %v5915_v24 = vxor.u32 %v5913_v21, %v12202_v5 }
 0x377   :  { %v5294_v39 = vadd.f32 %v14530_v25, %v5281_v26  ;;  %v5917_v23 = vxor.u32 57701188, %v5915_v24 }
 0x379   :  { %v5308_v51 = vpop.f32.mrf.mxu2  ;;  %v5307_v57 = vadd.f32 %v5306_v46, %v5294_v39  ;;  %v9002_v38 = vshrl.u32 %v5917_v23, 16 }
 0x37a   :  { %v5269_v47 = vpop.f32.mrf.mxu0 }
 0x37b   :  { %v5923_v28 = vxor.u32 %v9002_v38, %v5917_v23  ;;  %v5926_v47 = vmul.u32 2246822507, %v5924_v29 }
 0x37d   :  { %v5925_v53 = vmul.u32 2246822507, %v5923_v28  ;;  %v9005_v61 = vshrl.u32 %v5926_v47, 13 }
 0x37e   :  { %v5811_v60 = vpop.f32.mrf.mxu3 }
 0x37f   :  { %v5812_v48 = vadd.f32 %v5811_v60, %v5478_v54  ;;  %v9004_v51 = vshrl.u32 %v5925_v53, 13  ;;  %v5932_v6 = vxor.u32 %v9005_v61, %v5926_v47 }
 0x381   :  { %v5931_v41 = vxor.u32 %v9004_v51, %v5925_v53  ;;  %v5934_v5 = vmul.u32 3266489909, %v5932_v6 }
 0x383   :  { %v5933_v55 = vmul.u32 3266489909, %v5931_v41  ;;  %v9007_v4 = vshrl.u32 %v5934_v5, 16 }
 0x385   :  { %v9006_v22 = vshrl.u32 %v5933_v55, 16  ;;  %v5940_v17 = vxor.u32 %v9007_v4, %v5934_v5 }
 0x386   :  { %v5813_v30 = vpop.f32.mrf.mxu3 }
 0x387   :  { %v5939_v36 = vxor.u32 %v9006_v22, %v5933_v55  ;;  %v5942_v39 = vand.u32 2147483647, %v5940_v17 }
 0x389   :  { %v5941_v26 = vand.u32 2147483647, %v5939_v36  ;;  %vm5944_vm9 = vcmp.ge.s32.totalorder %v5942_v39, 644245094 }
 0x38b   :  { %vm5943_vm7 = vcmp.ge.s32.totalorder %v5941_v26, 644245094 }
 0x392   :  { %v5319_v37 = vpop.f32.mrf.mxu0 }
 0x393   :  { %v5320_v62 = vadd.f32 %v5319_v37, %v5307_v57  ;;  %v5949_v57 = vld [vmem:[%s14677_s8] sm:$0x3] }
 0x394   :  { %v5951_v2 = vperm.slane %v5949_v57, 0 }
 0x395   :  { %vm5326_vm2 = vcmp.ge.f32.partialorder %v5320_v62, 0.0  ;;  %v5330_v16 = vmul.f32 0.2, %v5320_v62 }
 0x397   :  { %v5334_v0 = vsel %vm5326_vm2, %v5320_v62, %v5330_v16  ;;  %v5952_v62 = vperm.slane %v5949_v57, 1 }
 0x398   :  { %v5403_v52 = vmul.f32 1.4285715, %v5334_v0 }
 0x399   :  { %v5824_v50 = vpop.f32.mrf.mxu1 }
 0x39a   :  { %v8988_v34 = vpack.c.bf16 %v5403_v52, %v5403_v52  ;;  %v5321_v25 = vpop.f32.mrf.mxu0  ;;  %v5825_v42 = vadd.f32 %v5824_v50, %v5812_v48 }
 0x39b   :  { %v5863_v32 = vpop.f32.mrf.mxu3 }
 0x39c   :  { %8989 = vmatmul.msk.bf16.vlgmr.msra.gmra.mxu0 %vm8987_vm4, %v8988_v34  ;;  %v5864_v9 = vadd.f32 %v5863_v32, %v5479_v33 }
 0x3a1   :  { %v5826_v56 = vpop.f32.mrf.mxu1 }
 0x3a3   :  { %v5865_v45 = vpop.f32.mrf.mxu3 }
 0x3a9   :  { %v5876_v44 = vpop.f32.mrf.mxu1 }
 0x3aa   :  { %v5877_v20 = vadd.f32 %v5876_v44, %v5864_v9 }
 0x3ac   :  { %9001 = vmatmul.msk.bf16.vlgmr.msrb.gmra.mxu0 %vm8987_vm4, %v8988_v34 }
 0x3b1   :  { %v5878_v59 = vpop.f32.mrf.mxu1 }
 0x3df   :  { %v5837_v7 = vpop.f32.mrf.mxu2 }
 0x3e0   :  { %v5838_v8 = vadd.f32 %v5837_v7, %v5825_v42 }
 0x3e7   :  { %v5839_v14 = vpop.f32.mrf.mxu2 }
 0x3ef   :  { %v5889_v1 = vpop.f32.mrf.mxu2 }
 0x3f0   :  { %v5890_v13 = vadd.f32 %v5889_v1, %v5877_v20 }
 0x3f7   :  { %v5891_v46 = vpop.f32.mrf.mxu2 }
 0x419   :  { %v5850_v3 = vpop.f32.mrf.mxu0 }
 0x41a   :  { %v5851_v15 = vadd.f32 %v5850_v3, %v5838_v8 }
 0x41c   :  { %v5908_v63 = vmul.f32 0.2, %v5851_v15  ;;  %vm5906_vm5 = vcmp.ge.f32.partialorder %v5851_v15, 0.0 }
 0x41e   :  { %v5910_v35 = vsel %vm5906_vm5, %v5851_v15, %v5908_v63 }
 0x41f   :  { %v5945_v12 = vmul.f32 1.4285715, %v5910_v35 }
 0x421   :  { %v5852_v10 = vpop.f32.mrf.mxu0  ;;  %v5947_v31 = vsel %vm5943_vm7, %v5945_v12, 0.0 }
 0x422   :  { %v5955_v34 = vmul.f32 %v5951_v2, %v5947_v31 }
 0x429   :  { %v5902_v60 = vpop.f32.mrf.mxu0 }
 0x42a   :  { %v5903_v18 = vadd.f32 %v5902_v60, %v5890_v13 }
 0x42c   :  { %vm5907_vm6 = vcmp.ge.f32.partialorder %v5903_v18, 0.0  ;;  %v5909_v37 = vmul.f32 0.2, %v5903_v18 }
 0x42e   :  { %v5911_v30 = vsel %vm5907_vm6, %v5903_v18, %v5909_v37 }
 0x42f   :  { %v5946_v16 = vmul.f32 1.4285715, %v5911_v30 }
 0x431   :  { %v5904_v0 = vpop.f32.mrf.mxu0  ;;  %v5948_v52 = vsel %vm5944_vm9, %v5946_v16, 0.0 }
 0x432   :  { %v5956_v25 = vmul.f32 %v5952_v62, %v5948_v52 }
 0x434   :  { %v5957_v32 = vadd.f32 %v5956_v25, %v5955_v34 }
 0x436   :  { %5958 = vadd.xlane.f32.xlu0 %v5957_v32 }
 0x4a9   :  { %v5959_v54 = vpop.xlane.xlu0 %5958 }
 0x4aa   :  { %v5964_v45 = vadd.f32 %v9720_v11, %v5959_v54 }
 0x4ac   :  { %v5965_v48 = vsub.f32 0.0, %v5964_v45 }
 0x4ae   :  { %v5966_v50 = vmul.f32 1.442695, %v5965_v48 }
 0x4b0   :  { %9721 = vpow2.f32 %v5966_v50 }
 0x4b6   :  { %v9722_v42 = vpop.eup %9721 }
 0x4b7   :  { %v5968_v56 = vadd.f32 1.0, %v9722_v42 }
 0x4b9   :  { %9723 = vrcp.f32 %v5968_v56  ;;  %v5980_v20 = vand.u32 2147483648, %v5968_v56  ;;  %v5978_v7 = vand.u32 2147483647, %v5968_v56  ;;  %vm5974_vm10 = vweird.f32 %v5968_v56 }
 0x4bb   :  { %v5981_v14 = vor.u32 1.1754944e-38, %v5980_v20  ;;  %vm5979_vm13 = vcmp.eq.f32.partialorder %v5978_v7, 8.507059e+37 }
 0x4bf   :  { %v9724_v33 = vpop.eup %9723 }
 0x4c0   :  { %v5970_v9 = vmul.f32 %v9724_v33, %v5968_v56  ;;  %vm5975_vm8 = vweird.f32 %v9724_v33 }
 0x4c1   :  { %vm5976_vm11 = vmor %vm5974_vm10, %vm5975_vm8 }
 0x4c2   :  { %v5971_v44 = vsub.f32 1.0, %v5970_v9 }
 0x4c4   :  { %v5972_v59 = vmul.f32 %v9724_v33, %v5971_v44 }
 0x4c6   :  { %v5973_v8 = vadd.f32 %v9724_v33, %v5972_v59 }
 0x4c8   :  { %v5977_v1 = vsel %vm5976_vm11, %v9724_v33, %v5973_v8 }
 0x4c9   :  { %v5982_v49 = vsel %vm5979_vm13, %v5981_v14, %v5977_v1 }
 0x4ca   :  { %5985 = vst.msk [vmem:[%s14678_s10] sm:$0xff] %vm5984_vm12, %v5982_v49 }

</bundles_post_ra>
